<compile_context>
chip_gen: v7x
topology: tpu7x:2x2x1
jax: 0.10.0
libtpu: 0.0.40
codegen_flags: <defaults>
</compile_context>

<pallas_src>
import functools

import numpy as np
import jax
import jax.numpy as jnp
from jax import lax
from jax.experimental import pallas as pl
from jax.experimental.pallas import tpu as pltpu


# ---------------------------------------------------------------------------
# Pallas kernels
# ---------------------------------------------------------------------------

def _matmul_bias_kernel(x_ref, w_ref, b_ref, o_ref, *, relu):
    """One (tm, K) x (K, N) tile: bf16 matmul on the MXU, f32 bias/ReLU."""
    acc = jnp.dot(x_ref[...], w_ref[...], preferred_element_type=jnp.float32)
    acc = acc + b_ref[...]
    if relu:
        acc = jnp.maximum(acc, 0.0)
    o_ref[...] = acc.astype(o_ref.dtype)


def _pick_tm(M, K, itemsize):
    """Row tile for the M grid.

    Large matmuls get 2 parallel steps (feeds both TensorCores on v7x, only
    ~0.35us extra on single-core chips); keep halving only if a block would
    exceed ~2 MiB of VMEM.  Always returns a tile that divides M and is a
    multiple of 8 (falls back to a single full block otherwise).
    """
    tm = M
    if M >= 512 and M % 2 == 0 and (M // 2) % 8 == 0:
        tm = M // 2
    while tm * K * itemsize > (2 << 20) and tm % 16 == 0:
        tm //= 2
    if M % tm != 0 or tm % 8 != 0:
        tm = M  # robust fallback: single full-array block
    return tm


def matmul_bias(x, w, b, *, relu, out_dtype):
    """y = x @ w + b (optionally ReLU).  x:(M,K) bf16, w:(K,N) bf16, b:(N,) f32."""
    M, K = x.shape
    N = w.shape[1]
    tm = _pick_tm(M, K, x.dtype.itemsize)
    grid = (M // tm,)
    return pl.pallas_call(
        functools.partial(_matmul_bias_kernel, relu=relu),
        out_shape=jax.ShapeDtypeStruct((M, N), out_dtype),
        grid=grid,
        in_specs=[
            pl.BlockSpec((tm, K), lambda i: (i, 0)),
            pl.BlockSpec((K, N), lambda i: (0, 0)),
            pl.BlockSpec((1, N), lambda i: (0, 0)),
        ],
        out_specs=pl.BlockSpec((tm, N), lambda i: (i, 0)),
        compiler_params=pltpu.CompilerParams(
            dimension_semantics=("parallel",)),
    )(x, w, b.reshape(1, N))


def _tail_kernel(x_ref, wc_ref, bc_ref, a1w_ref, a1b_ref, o_ref, *, tools_num):
    """Fused: (conv4 + NCHW-flatten + fm_linear) composed matmul -> actor_linear1
    -> softmax(logits) * 2*sigmoid(margin).  Everything stays in VMEM/vregs."""
    # Composed conv4/flatten/fm_linear: bf16 operands, f32 accumulate.
    fm = jnp.dot(x_ref[...], wc_ref[...],
                 preferred_element_type=jnp.float32) + bc_ref[...]
    # actor_linear1 (tiny) in f32.
    tw = jnp.dot(fm, a1w_ref[...],
                 preferred_element_type=jnp.float32) + a1b_ref[...]
    logits = tw[:, :tools_num]
    m = jnp.max(logits, axis=1, keepdims=True)
    e = jnp.exp(logits - m)
    att = e / jnp.sum(e, axis=1, keepdims=True)
    margin = jax.nn.sigmoid(tw[:, tools_num:tools_num + 1]) * 2.0
    o_ref[...] = att * margin


def fused_tail(x_flat, wc, bc, a1_w, a1_b, *, tools_num):
    B = x_flat.shape[0]
    return pl.pallas_call(
        functools.partial(_tail_kernel, tools_num=tools_num),
        out_shape=jax.ShapeDtypeStruct((B, tools_num), jnp.float32),
        in_specs=[pl.BlockSpec(memory_space=pltpu.MemorySpace.VMEM)] * 5,
        out_specs=pl.BlockSpec(memory_space=pltpu.MemorySpace.VMEM),
    )(x_flat, wc, bc.reshape(1, -1), a1_w, a1_b.reshape(1, -1))


# ---------------------------------------------------------------------------
# Plain-JAX glue: im2col patch extraction (slices/reshapes, materialized bf16)
# ---------------------------------------------------------------------------
# TODO(synk): conv1-3 im2col still materializes a (bf16) patches array in HBM;
# a fully in-kernel tap loop would need strided in-kernel slices / relayouts
# that are not cleanly supported, so the traffic is instead halved via bf16
# and conv4's im2col is eliminated entirely by the offline weight composition.

def im2col(x, k, stride, pad):
    """x: (B, H, W, C) -> (B*Ho*Wo, k*k*C) with features ordered (kh, kw, Cin)."""
    B, H, W, C = x.shape
    xp = jnp.pad(x, ((0, 0), (pad, pad), (pad, pad), (0, 0)))
    Ho = (H + 2 * pad - k) // stride + 1
    Wo = (W + 2 * pad - k) // stride + 1
    rows = []
    for i in range(k):
        cols = []
        for j in range(k):
            cols.append(xp[:, i:i + stride * Ho:stride,
                           j:j + stride * Wo:stride, :])
        rows.append(jnp.stack(cols, axis=3))      # (B, Ho, Wo, kw, C)
    patches = jnp.stack(rows, axis=3)             # (B, Ho, Wo, kh, kw, C)
    return patches.reshape(B * Ho * Wo, k * k * C), (B, Ho, Wo)


def conv2d_pallas(x_nhwc, w2d, b, *, k, cout, stride, pad, relu):
    patches, (B, Ho, Wo) = im2col(x_nhwc, k, stride, pad)
    out = matmul_bias(patches, w2d, b, relu=relu, out_dtype=jnp.bfloat16)
    return out.reshape(B, Ho, Wo, cout)


# ---------------------------------------------------------------------------
# One-time (offline) parameter preparation: bf16 casts + weight composition
# ---------------------------------------------------------------------------

def prepare_params(params):
    """Pre-reshape/cast conv weights and fold conv4 + NCHW-flatten + fm_linear
    into a single (8*8*24, 64) weight expressed in the NHWC-flatten ordering of
    relu(conv3) -- so the kernel-side 'flatten' is a free row-major reshape."""

    def conv_w2d(w):   # HWIO (k,k,Cin,Cout) -> (k*k*Cin, Cout) bf16
        k, _, cin, cout = w.shape
        return jnp.asarray(w, jnp.float32).reshape(k * k * cin, cout).astype(jnp.bfloat16)

    w4 = np.asarray(params['conv4_w'], np.float32)    # (5,5,24,24) HWIO
    b4 = np.asarray(params['conv4_b'], np.float32)    # (24,)
    fw = np.asarray(params['fm_w'], np.float32)       # (384, 64), rows = NCHW flatten
    fb = np.asarray(params['fm_b'], np.float32)       # (64,)
    K, _, cin, cout = w4.shape
    Hi, Ho, F = 8, 4, fw.shape[1]
    fw4 = fw.reshape(cout, Ho, Ho, F)                 # (c, h, w, f) = fm_w[c*16+h*4+w]

    # wc[i, j, ci, f] = sum over conv4 taps mapping conv3-output pixel (i,j)
    # into conv4-output pixel (h,w):  sum_co w4[kh,kw,ci,co] * fm_w[(co,h,w), f]
    wc = np.zeros((Hi, Hi, cin, F), np.float32)
    for h in range(Ho):
        for w in range(Ho):
            for kh in range(K):
                i = 2 * h + kh - 2
                if not (0 <= i < Hi):
                    continue
                for kw in range(K):
                    j = 2 * w + kw - 2
                    if not (0 <= j < Hi):
                        continue
                    wc[i, j] += w4[kh, kw] @ fw4[:, h, w, :]   # (Cin,F)
    bc = fb + np.einsum('c,chwf->f', b4, fw4)

    return {
        'w1': conv_w2d(params['conv1_w']), 'b1': jnp.asarray(params['conv1_b'], jnp.float32),
        'w2': conv_w2d(params['conv2_w']), 'b2': jnp.asarray(params['conv2_b'], jnp.float32),
        'w3': conv_w2d(params['conv3_w']), 'b3': jnp.asarray(params['conv3_b'], jnp.float32),
        'wc': jnp.asarray(wc.reshape(Hi * Hi * cin, F), jnp.bfloat16),
        'bc': jnp.asarray(bc, jnp.float32),
        'a1_w': jnp.asarray(params['a1_w'], jnp.float32),
        'a1_b': jnp.asarray(params['a1_b'], jnp.float32),
    }


# ---------------------------------------------------------------------------
# Full forward (Attention.forward, 'na' policy)
# ---------------------------------------------------------------------------

def attention_forward(prep, imgs_nchw, *, tools_num):
    x = jnp.transpose(imgs_nchw, (0, 2, 3, 1)).astype(jnp.bfloat16)   # NCHW -> NHWC, bf16
    x = conv2d_pallas(x, prep['w1'], prep['b1'], k=9, cout=32, stride=2, pad=4, relu=True)
    x = conv2d_pallas(x, prep['w2'], prep['b2'], k=5, cout=24, stride=2, pad=2, relu=True)
    x = conv2d_pallas(x, prep['w3'], prep['b3'], k=5, cout=24, stride=2, pad=2, relu=True)
    B = x.shape[0]
    # relu(conv3) NHWC-flatten: free row-major reshape; the composed weight
    # 'wc' already encodes conv4, the NCHW-flatten permutation and fm_linear.
    x_flat = x.reshape(B, -1)
    return fused_tail(x_flat, prep['wc'], prep['bc'], prep['a1_w'], prep['a1_b'],
                      tools_num=tools_num)


# ---------------------------------------------------------------------------
# Pure-JAX f32 reference for numerical sanity check
# ---------------------------------------------------------------------------

def reference_forward(params, imgs_nchw, *, tools_num):
    x = jnp.transpose(imgs_nchw, (0, 2, 3, 1))

    def conv(x, w, b, stride, pad):
        y = lax.conv_general_dilated(
            x, w, (stride, stride), [(pad, pad), (pad, pad)],
            dimension_numbers=('NHWC', 'HWIO', 'NHWC'))
        return y + b

    x = jax.nn.relu(conv(x, params['conv1_w'], params['conv1_b'], 2, 4))
    x = jax.nn.relu(conv(x, params['conv2_w'], params['conv2_b'], 2, 2))
    x = jax.nn.relu(conv(x, params['conv3_w'], params['conv3_b'], 2, 2))
    x = conv(x, params['conv4_w'], params['conv4_b'], 2, 2)
    B = x.shape[0]
    fm_in = jnp.transpose(x, (0, 3, 1, 2)).reshape(B, -1)   # torch NCHW flatten
    fm = fm_in @ params['fm_w'] + params['fm_b']
    tw = fm @ params['a1_w'] + params['a1_b']
    att = jax.nn.softmax(tw[:, :tools_num], axis=1)
    margin = jax.nn.sigmoid(tw[:, -1:]) * 2.0
    return att * margin


if __name__ == "__main__":
    key = jax.random.PRNGKey(0)
    ks = jax.random.split(key, 8)

    def xavier(k, shape, fan_in, fan_out):
        limit = (6.0 / (fan_in + fan_out)) ** 0.5
        return jax.random.uniform(k, shape, jnp.float32, -limit, limit)

    tools_num = 12          # 'na' policy -> node_num = tools_num + 1 = 13
    params = {
        'conv1_w': xavier(ks[0], (9, 9, 3, 32), 9 * 9 * 3, 32),
        'conv1_b': jnp.zeros((32,), jnp.float32),
        'conv2_w': xavier(ks[1], (5, 5, 32, 24), 5 * 5 * 32, 24),
        'conv2_b': jnp.zeros((24,), jnp.float32),
        'conv3_w': xavier(ks[2], (5, 5, 24, 24), 5 * 5 * 24, 24),
        'conv3_b': jnp.zeros((24,), jnp.float32),
        'conv4_w': xavier(ks[3], (5, 5, 24, 24), 5 * 5 * 24, 24),
        'conv4_b': jnp.zeros((24,), jnp.float32),
        'fm_w': xavier(ks[4], (384, 64), 384, 64),       # img_fm_size -> feature_map_size
        'fm_b': jnp.zeros((64,), jnp.float32),
        'a1_w': xavier(ks[5], (64, tools_num + 1), 64, tools_num + 1),
        'a1_b': jnp.zeros((tools_num + 1,), jnp.float32),
    }

    # batch=2, 3-channel 64x64 images (required by the (24, 4, 4) assert).
    imgs = jax.random.normal(ks[6], (2, 3, 64, 64), jnp.float32)

    prep = prepare_params(params)            # one-time offline folding / casts
    fwd = jax.jit(functools.partial(attention_forward, tools_num=tools_num))
    out = jax.block_until_ready(fwd(prep, imgs))

    ref = reference_forward(params, imgs, tools_num=tools_num)
    assert out.shape == (2, tools_num), out.shape
    assert jnp.allclose(out, ref, rtol=3e-2, atol=3e-2), \
        float(jnp.max(jnp.abs(out - ref)))
    print("KERNEL_OK")
</pallas_src>

<mosaic_0001>
module attributes {stable_mosaic.version = 11 : i64} {
  func.func @_matmul_bias_kernel(%arg0: i32, %arg1: memref<1024x243xbf16, #tpu.memory_space<vmem>>, %arg2: memref<243x32xbf16, #tpu.memory_space<vmem>>, %arg3: memref<1x32xf32, #tpu.memory_space<vmem>>, %arg4: memref<1024x32xbf16, #tpu.memory_space<vmem>>) attributes {dimension_semantics = [#tpu.dimension_semantics<parallel>], iteration_bounds = array<i64: 2>, scalar_prefetch = 0 : i64, scratch_operands = 0 : i64, tpu.core_type = #tpu.core_type<tc>, window_params = [{transform_indices = @transform_0, window_bounds = array<i64: 1024, 243>}, {pipeline_mode = #tpu.pipeline_mode<synchronous>, transform_indices = @transform_1, window_bounds = array<i64: 243, 32>}, {pipeline_mode = #tpu.pipeline_mode<synchronous>, transform_indices = @transform_2, window_bounds = array<i64: 1, 32>}, {transform_indices = @transform_3, window_bounds = array<i64: 1024, 32>}]} {
    %c0 = arith.constant 0 : index
    %c0_0 = arith.constant 0 : index
    %0 = vector.load %arg1[%c0, %c0_0] : memref<1024x243xbf16, #tpu.memory_space<vmem>>, vector<1024x243xbf16>
    %c0_1 = arith.constant 0 : index
    %c0_2 = arith.constant 0 : index
    %1 = vector.load %arg2[%c0_1, %c0_2] : memref<243x32xbf16, #tpu.memory_space<vmem>>, vector<243x32xbf16>
    %cst = arith.constant dense<0.000000e+00> : vector<1024x32xf32>
    %2 = tpu.matmul %0, %1, %cst {dimension_numbers = #tpu.dot_dimension_numbers<[1], [0], [0], [1], [0, 0, 1, 1], [], []>} : vector<1024x243xbf16>, vector<243x32xbf16>, vector<1024x32xf32> -> vector<1024x32xf32>
    %c0_3 = arith.constant 0 : index
    %c0_4 = arith.constant 0 : index
    %3 = vector.load %arg3[%c0_3, %c0_4] : memref<1x32xf32, #tpu.memory_space<vmem>>, vector<1x32xf32>
    %4 = vector.broadcast %3 : vector<1x32xf32> to vector<1024x32xf32>
    %5 = arith.addf %2, %4 : vector<1024x32xf32>
    %cst_5 = arith.constant 0.000000e+00 : f32
    %6 = vector.broadcast %cst_5 : f32 to vector<1024x32xf32>
    %7 = arith.maximumf %5, %6 : vector<1024x32xf32>
    %8 = arith.truncf %7 : vector<1024x32xf32> to vector<1024x32xbf16>
    %c0_6 = arith.constant 0 : index
    %c0_7 = arith.constant 0 : index
    %9 = vector.load %arg4[%c0_6, %c0_7] : memref<1024x32xbf16, #tpu.memory_space<vmem>>, vector<1024x32xbf16>
    tpu.vector_store %arg4[%c0_6, %c0_7], %8 {strides = array<i32>} : memref<1024x32xbf16, #tpu.memory_space<vmem>>, vector<1024x32xbf16>,
    return
  }
  func.func @transform_0(%arg0: i32) -> (i32, i32) {
    %c0_i32 = arith.constant 0 : i32
    %c0_i32_0 = arith.constant 0 : i32
    return %arg0, %c0_i32 : i32, i32
  }
  func.func @transform_1(%arg0: i32) -> (i32, i32) {
    %c0_i32 = arith.constant 0 : i32
    %c0_i32_0 = arith.constant 0 : i32
    %c0_i32_1 = arith.constant 0 : i32
    return %c0_i32, %c0_i32_0 : i32, i32
  }
  func.func @transform_2(%arg0: i32) -> (i32, i32) {
    %c0_i32 = arith.constant 0 : i32
    %c0_i32_0 = arith.constant 0 : i32
    %c0_i32_1 = arith.constant 0 : i32
    return %c0_i32, %c0_i32_0 : i32, i32
  }
  func.func @transform_3(%arg0: i32) -> (i32, i32) {
    %c0_i32 = arith.constant 0 : i32
    %c0_i32_0 = arith.constant 0 : i32
    return %arg0, %c0_i32 : i32, i32
  }
}

module attributes {stable_mosaic.version = 11 : i64} {
  func.func @_matmul_bias_kernel(%arg0: i32, %arg1: memref<256x800xbf16, #tpu.memory_space<vmem>>, %arg2: memref<800x24xbf16, #tpu.memory_space<vmem>>, %arg3: memref<1x24xf32, #tpu.memory_space<vmem>>, %arg4: memref<256x24xbf16, #tpu.memory_space<vmem>>) attributes {dimension_semantics = [#tpu.dimension_semantics<parallel>], iteration_bounds = array<i64: 2>, scalar_prefetch = 0 : i64, scratch_operands = 0 : i64, tpu.core_type = #tpu.core_type<tc>, window_params = [{transform_indices = @transform_0, window_bounds = array<i64: 256, 800>}, {pipeline_mode = #tpu.pipeline_mode<synchronous>, transform_indices = @transform_1, window_bounds = array<i64: 800, 24>}, {pipeline_mode = #tpu.pipeline_mode<synchronous>, transform_indices = @transform_2, window_bounds = array<i64: 1, 24>}, {transform_indices = @transform_3, window_bounds = array<i64: 256, 24>}]} {
    %c0 = arith.constant 0 : index
    %c0_0 = arith.constant 0 : index
    %0 = vector.load %arg1[%c0, %c0_0] : memref<256x800xbf16, #tpu.memory_space<vmem>>, vector<256x800xbf16>
    %c0_1 = arith.constant 0 : index
    %c0_2 = arith.constant 0 : index
    %1 = vector.load %arg2[%c0_1, %c0_2] : memref<800x24xbf16, #tpu.memory_space<vmem>>, vector<800x24xbf16>
    %cst = arith.constant dense<0.000000e+00> : vector<256x24xf32>
    %2 = tpu.matmul %0, %1, %cst {dimension_numbers = #tpu.dot_dimension_numbers<[1], [0], [0], [1], [0, 0, 1, 1], [], []>} : vector<256x800xbf16>, vector<800x24xbf16>, vector<256x24xf32> -> vector<256x24xf32>
    %c0_3 = arith.constant 0 : index
    %c0_4 = arith.constant 0 : index
    %3 = vector.load %arg3[%c0_3, %c0_4] : memref<1x24xf32, #tpu.memory_space<vmem>>, vector<1x24xf32>
    %4 = vector.broadcast %3 : vector<1x24xf32> to vector<256x24xf32>
    %5 = arith.addf %2, %4 : vector<256x24xf32>
    %cst_5 = arith.constant 0.000000e+00 : f32
    %6 = vector.broadcast %cst_5 : f32 to vector<256x24xf32>
    %7 = arith.maximumf %5, %6 : vector<256x24xf32>
    %8 = arith.truncf %7 : vector<256x24xf32> to vector<256x24xbf16>
    %c0_6 = arith.constant 0 : index
    %c0_7 = arith.constant 0 : index
    %9 = vector.load %arg4[%c0_6, %c0_7] : memref<256x24xbf16, #tpu.memory_space<vmem>>, vector<256x24xbf16>
    tpu.vector_store %arg4[%c0_6, %c0_7], %8 {strides = array<i32>} : memref<256x24xbf16, #tpu.memory_space<vmem>>, vector<256x24xbf16>,
    return
  }
  func.func @transform_0(%arg0: i32) -> (i32, i32) {
    %c0_i32 = arith.constant 0 : i32
    %c0_i32_0 = arith.constant 0 : i32
    return %arg0, %c0_i32 : i32, i32
  }
  func.func @transform_1(%arg0: i32) -> (i32, i32) {
    %c0_i32 = arith.constant 0 : i32
    %c0_i32_0 = arith.constant 0 : i32
    %c0_i32_1 = arith.constant 0 : i32
    return %c0_i32, %c0_i32_0 : i32, i32
  }
  func.func @transform_2(%arg0: i32) -> (i32, i32) {
    %c0_i32 = arith.constant 0 : i32
    %c0_i32_0 = arith.constant 0 : i32
    %c0_i32_1 = arith.constant 0 : i32
    return %c0_i32, %c0_i32_0 : i32, i32
  }
  func.func @transform_3(%arg0: i32) -> (i32, i32) {
    %c0_i32 = arith.constant 0 : i32
    %c0_i32_0 = arith.constant 0 : i32
    return %arg0, %c0_i32 : i32, i32
  }
}

module attributes {stable_mosaic.version = 11 : i64} {
  func.func @_matmul_bias_kernel(%arg0: i32, %arg1: memref<128x600xbf16, #tpu.memory_space<vmem>>, %arg2: memref<600x24xbf16, #tpu.memory_space<vmem>>, %arg3: memref<1x24xf32, #tpu.memory_space<vmem>>, %arg4: memref<128x24xbf16, #tpu.memory_space<vmem>>) attributes {dimension_semantics = [#tpu.dimension_semantics<parallel>], iteration_bounds = array<i64: 1>, scalar_prefetch = 0 : i64, scratch_operands = 0 : i64, tpu.core_type = #tpu.core_type<tc>, window_params = [{transform_indices = @transform_0, window_bounds = array<i64: 128, 600>}, {pipeline_mode = #tpu.pipeline_mode<synchronous>, transform_indices = @transform_1, window_bounds = array<i64: 600, 24>}, {pipeline_mode = #tpu.pipeline_mode<synchronous>, transform_indices = @transform_2, window_bounds = array<i64: 1, 24>}, {transform_indices = @transform_3, window_bounds = array<i64: 128, 24>}]} {
    %c0 = arith.constant 0 : index
    %c0_0 = arith.constant 0 : index
    %0 = vector.load %arg1[%c0, %c0_0] : memref<128x600xbf16, #tpu.memory_space<vmem>>, vector<128x600xbf16>
    %c0_1 = arith.constant 0 : index
    %c0_2 = arith.constant 0 : index
    %1 = vector.load %arg2[%c0_1, %c0_2] : memref<600x24xbf16, #tpu.memory_space<vmem>>, vector<600x24xbf16>
    %cst = arith.constant dense<0.000000e+00> : vector<128x24xf32>
    %2 = tpu.matmul %0, %1, %cst {dimension_numbers = #tpu.dot_dimension_numbers<[1], [0], [0], [1], [0, 0, 1, 1], [], []>} : vector<128x600xbf16>, vector<600x24xbf16>, vector<128x24xf32> -> vector<128x24xf32>
    %c0_3 = arith.constant 0 : index
    %c0_4 = arith.constant 0 : index
    %3 = vector.load %arg3[%c0_3, %c0_4] : memref<1x24xf32, #tpu.memory_space<vmem>>, vector<1x24xf32>
    %4 = vector.broadcast %3 : vector<1x24xf32> to vector<128x24xf32>
    %5 = arith.addf %2, %4 : vector<128x24xf32>
    %cst_5 = arith.constant 0.000000e+00 : f32
    %6 = vector.broadcast %cst_5 : f32 to vector<128x24xf32>
    %7 = arith.maximumf %5, %6 : vector<128x24xf32>
    %8 = arith.truncf %7 : vector<128x24xf32> to vector<128x24xbf16>
    %c0_6 = arith.constant 0 : index
    %c0_7 = arith.constant 0 : index
    %9 = vector.load %arg4[%c0_6, %c0_7] : memref<128x24xbf16, #tpu.memory_space<vmem>>, vector<128x24xbf16>
    tpu.vector_store %arg4[%c0_6, %c0_7], %8 {strides = array<i32>} : memref<128x24xbf16, #tpu.memory_space<vmem>>, vector<128x24xbf16>,
    return
  }
  func.func @transform_0(%arg0: i32) -> (i32, i32) {
    %c0_i32 = arith.constant 0 : i32
    %c0_i32_0 = arith.constant 0 : i32
    return %arg0, %c0_i32 : i32, i32
  }
  func.func @transform_1(%arg0: i32) -> (i32, i32) {
    %c0_i32 = arith.constant 0 : i32
    %c0_i32_0 = arith.constant 0 : i32
    %c0_i32_1 = arith.constant 0 : i32
    return %c0_i32, %c0_i32_0 : i32, i32
  }
  func.func @transform_2(%arg0: i32) -> (i32, i32) {
    %c0_i32 = arith.constant 0 : i32
    %c0_i32_0 = arith.constant 0 : i32
    %c0_i32_1 = arith.constant 0 : i32
    return %c0_i32, %c0_i32_0 : i32, i32
  }
  func.func @transform_3(%arg0: i32) -> (i32, i32) {
    %c0_i32 = arith.constant 0 : i32
    %c0_i32_0 = arith.constant 0 : i32
    return %arg0, %c0_i32 : i32, i32
  }
}

module attributes {stable_mosaic.version = 11 : i64} {
  func.func @_tail_kernel(%arg0: memref<2x1536xbf16, #tpu.memory_space<vmem>>, %arg1: memref<1536x64xbf16, #tpu.memory_space<vmem>>, %arg2: memref<1x64xf32, #tpu.memory_space<vmem>>, %arg3: memref<64x13xf32, #tpu.memory_space<vmem>>, %arg4: memref<1x13xf32, #tpu.memory_space<vmem>>, %arg5: memref<2x12xf32, #tpu.memory_space<vmem>>) attributes {dimension_semantics = [], scalar_prefetch = 0 : i64, scratch_operands = 0 : i64, tpu.core_type = #tpu.core_type<tc>} {
    %c0 = arith.constant 0 : index
    %c0_0 = arith.constant 0 : index
    %0 = vector.load %arg0[%c0, %c0_0] : memref<2x1536xbf16, #tpu.memory_space<vmem>>, vector<2x1536xbf16>
    %c0_1 = arith.constant 0 : index
    %c0_2 = arith.constant 0 : index
    %1 = vector.load %arg1[%c0_1, %c0_2] : memref<1536x64xbf16, #tpu.memory_space<vmem>>, vector<1536x64xbf16>
    %cst = arith.constant dense<0.000000e+00> : vector<2x64xf32>
    %2 = tpu.matmul %0, %1, %cst {dimension_numbers = #tpu.dot_dimension_numbers<[1], [0], [0], [1], [0, 0, 1, 1], [], []>} : vector<2x1536xbf16>, vector<1536x64xbf16>, vector<2x64xf32> -> vector<2x64xf32>
    %c0_3 = arith.constant 0 : index
    %c0_4 = arith.constant 0 : index
    %3 = vector.load %arg2[%c0_3, %c0_4] : memref<1x64xf32, #tpu.memory_space<vmem>>, vector<1x64xf32>
    %4 = vector.broadcast %3 : vector<1x64xf32> to vector<2x64xf32>
    %5 = arith.addf %2, %4 : vector<2x64xf32>
    %c0_5 = arith.constant 0 : index
    %c0_6 = arith.constant 0 : index
    %6 = vector.load %arg3[%c0_5, %c0_6] : memref<64x13xf32, #tpu.memory_space<vmem>>, vector<64x13xf32>
    %cst_7 = arith.constant dense<0.000000e+00> : vector<2x13xf32>
    %7 = tpu.matmul %5, %6, %cst_7 {dimension_numbers = #tpu.dot_dimension_numbers<[1], [0], [0], [1], [0, 0, 1, 1], [], []>} : vector<2x64xf32>, vector<64x13xf32>, vector<2x13xf32> -> vector<2x13xf32>
    %c0_8 = arith.constant 0 : index
    %c0_9 = arith.constant 0 : index
    %8 = vector.load %arg4[%c0_8, %c0_9] : memref<1x13xf32, #tpu.memory_space<vmem>>, vector<1x13xf32>
    %9 = vector.broadcast %8 : vector<1x13xf32> to vector<2x13xf32>
    %10 = arith.addf %7, %9 : vector<2x13xf32>
    %11 = vector.extract_strided_slice %10 {offsets = [0, 0], sizes = [2, 12], strides = [1, 1]} : vector<2x13xf32> to vector<2x12xf32>
    %cst_10 = arith.constant dense<0xFF800000> : vector<2xf32>
    %12 = vector.multi_reduction <maximumf>, %11, %cst_10 [1] : vector<2x12xf32> to vector<2xf32>
    %13 = vector.shape_cast %12 : vector<2xf32> to vector<2x1xf32>
    %14 = vector.broadcast %13 : vector<2x1xf32> to vector<2x12xf32>
    %15 = arith.subf %11, %14 : vector<2x12xf32>
    %16 = math.exp %15 : vector<2x12xf32>
    %cst_11 = arith.constant dense<0.000000e+00> : vector<2xf32>
    %17 = vector.multi_reduction <add>, %16, %cst_11 [1] : vector<2x12xf32> to vector<2xf32>
    %18 = vector.shape_cast %17 : vector<2xf32> to vector<2x1xf32>
    %19 = vector.broadcast %18 : vector<2x1xf32> to vector<2x12xf32>
    %20 = arith.divf %16, %19 : vector<2x12xf32>
    %21 = vector.extract_strided_slice %10 {offsets = [0, 12], sizes = [2, 1], strides = [1, 1]} : vector<2x13xf32> to vector<2x1xf32>
    %22 = arith.negf %21 : vector<2x1xf32>
    %23 = math.exp %22 : vector<2x1xf32>
    %cst_12 = arith.constant 1.000000e+00 : f32
    %24 = vector.broadcast %cst_12 : f32 to vector<2x1xf32>
    %25 = arith.addf %24, %23 : vector<2x1xf32>
    %26 = arith.divf %24, %25 : vector<2x1xf32>
    %cst_13 = arith.constant 2.000000e+00 : f32
    %27 = vector.broadcast %cst_13 : f32 to vector<2x1xf32>
    %28 = arith.mulf %26, %27 : vector<2x1xf32>
    %29 = vector.broadcast %28 : vector<2x1xf32> to vector<2x12xf32>
    %30 = arith.mulf %20, %29 : vector<2x12xf32>
    %c0_14 = arith.constant 0 : index
    %c0_15 = arith.constant 0 : index
    %31 = vector.load %arg5[%c0_14, %c0_15] : memref<2x12xf32, #tpu.memory_space<vmem>>, vector<2x12xf32>
    tpu.vector_store %arg5[%c0_14, %c0_15], %30 {strides = array<i32>} : memref<2x12xf32, #tpu.memory_space<vmem>>, vector<2x12xf32>,
    return
  }
}

</mosaic_0001>

<bundles_post_ra>
// kernel: attention_forward.4
= control target key start
LH: loop header
LB: loop body
LE: loop exit
PB: predicated region body
PF: predicated region fallthrough
CT: control target
= control target key end

     0   :  { %s3342_s12 = smov 0   ;;  %s4033_s0 = inlined_call_operand.vmem [shape: bf16[2048,243], index: 0, kind: input, shape index: {}]   ;;  %s4034_s1 = inlined_call_operand.vmem [shape: bf16[243,32], index: 1, kind: input, shape index: {}]   ;;  %s4035_s2 = inlined_call_operand.vmem [shape: f32[1,32], index: 2, kind: input, shape index: {}]   ;;  %s4036_s3 = inlined_call_operand.vmem [shape: bf16[2048,32], index: 3, kind: output, shape index: {}]  }
   0x1 LB: > { %s2583_s13 = sadd.s32 4294967295, %s3318_s12   ;;  %p2587_p0 = scmp.ge.s32.totalorder %s3318_s12, 1  ;;  %s3318_s12 = sphi %s3342_s12, %s13_s12  }
   0x2   : > { %p139_p1 = scmp.lt.s32.totalorder %s3318_s12, 3 }
   0x4   : > { %p140_p2 = pnand %p2587_p0, %p139_p1 }
   0x5   : > { %v3103_v0 = vld [vmem:[%s4034_s1] sm:$0xff] (!%p140_p2)   ;;  %v3320_v1 = vmov (!%p140_p2), 0   ;;  %v3104_v2 = vld [vmem:[%s4034_s1 + $0x8] sm:$0xff] (!%p140_p2)   ;;  %v3105_v3 = vld [vmem:[%s4034_s1 + $0x10] sm:$0xff] (!%p140_p2)   ;;  %s2588_s20 = sshll.u32 (!%p140_p2), %s2583_s13, 7  ;;  %vm1013_vm0 = vcmask (!%p140_p2), 941056  }
   0x6   : > { %143 = sbr.rel (%p140_p2) target bundleno = 539 (0x21b), region = 32  ;;  %1213 = vmatprep.subr.bf16.mxu0 (!%p140_p2), %v3320_v1  ;;  %3061 = vmatprep.subr.bf16.mxu1 (!%p140_p2), %v3320_v1  ;;  %p165_p3 = scmp.lt.s32.totalorder (!%p140_p2), %s2588_s20, 255  ;;  %v3106_v4 = vld [vmem:[%s4034_s1 + $0x18] sm:$0xff] (!%p140_p2)   ;;  %v3107_v5 = vld [vmem:[%s4034_s1 + $0x20] sm:$0xff] (!%p140_p2)   ;;  %v3108_v7 = vld [vmem:[%s4034_s1 + $0x28] sm:$0xff] (!%p140_p2)   ;;  %vm1206_vm1 = vcmask (!%p140_p2), 1040384  }
   0x7   : > { %1214 = vmatpush1.bf16.msra.mxu0 (!%p140_p2), %v3103_v0  ;;  %3077 = vmatpush1.bf16.msra.mxu1 (!%p140_p2), %v3103_v0  ;;  %v3109_v9 = vld [vmem:[%s4034_s1 + $0x30] sm:$0xff] (!%p140_p2)   ;;  %v3110_v10 = vld [vmem:[%s4034_s1 + $0x38] sm:$0xff] (!%p140_p2)   ;;  %v3111_v11 = vld [vmem:[%s4034_s1 + $0x40] sm:$0xff] (!%p140_p2)   ;;  %vm1207_vm2 = vcmask (!%p140_p2), 1041408   ;;  %v3321_v17 = vmov (!%p140_p2), 65535   ;;  %vm2398_vm3 = vcmask (!%p140_p2), 257024  }
   0x8   : > { %1215 = vmatprep.subr.bf16.mxu0 (!%p140_p2), %v3320_v1  ;;  %3062 = vmatprep.subr.bf16.mxu1 (!%p140_p2), %v3320_v1  ;;  %v3112_v12 = vld [vmem:[%s4034_s1 + $0x48] sm:$0xff] (!%p140_p2)   ;;  %v3113_v13 = vld [vmem:[%s4034_s1 + $0x50] sm:$0xff] (!%p140_p2)   ;;  %v3114_v14 = vld [vmem:[%s4034_s1 + $0x58] sm:$0xff] (!%p140_p2)   ;;  %v1208_v18 = vsel (!%p140_p2), %vm1206_vm1, 4294967295, %v3321_v17 }
   0x9   : > { %v3115_v15 = vld [vmem:[%s4034_s1 + $0x60] sm:$0xff] (!%p140_p2)   ;;  %v3116_v16 = vld [vmem:[%s4034_s1 + $0x68] sm:$0xff] (!%p140_p2)   ;;  %v3117_v19 = vld [vmem:[%s4034_s1 + $0x70] sm:$0xff] (!%p140_p2)   ;;  %v1209_v21 = vsel (!%p140_p2), %vm1207_vm2, %v1208_v18, 0 }
   0xa   : > { %v3118_v20 = vld [vmem:[%s4034_s1 + $0x78] ss:$0 sps:$4 sm:$0x33] (!%p140_p2)  }
   0xb   : > { %1216 = vmatpush1.bf16.msra.mxu0 (!%p140_p2), %v3104_v2  ;;  %3078 = vmatpush1.bf16.msra.mxu1 (!%p140_p2), %v3104_v2  ;;  %v1211_v22 = vand.u32 (!%p140_p2), %v3118_v20, %v1209_v21 }
   0xc   : > { %1217 = vmatprep.subr.bf16.mxu0 (!%p140_p2), %v3320_v1  ;;  %3063 = vmatprep.subr.bf16.mxu1 (!%p140_p2), %v3320_v1 }
   0xd   : > { %s4038_s20 = smov (!%p165_p3, %s2588_s20), 255 }
   0xe   : > { %s2932_s23 = sshll.u32 %s4038_s20, 3  ;;  %s2592_s29 = sshll.u32 %s4038_s20, 2 }
   0xf   : > { %1218 = vmatpush1.bf16.msra.mxu0 %v3105_v3  ;;  %3079 = vmatpush1.bf16.msra.mxu1 %v3105_v3  ;;  %s3376_s26 = scalar_lea.vmem %s4033_s0, %s2932_s23  ;;  %s3621_s4 = scalar_lea.vmem %s4036_s3, %s2592_s29 }
  0x10   : > { %1219 = vmatprep.subr.bf16.mxu0 %v3320_v1  ;;  %3064 = vmatprep.subr.bf16.mxu1 %v3320_v1  ;;  %v3121_v6 = vld [vmem:[%s3376_s26 + $0x4] ss:$8 sps:$4 sm:$0xff]   ;;  %v3119_v23 = vld [vmem:[%s3376_s26] ss:$8 sps:$4 sm:$0xff]   ;;  %v3125_v25 = vld [vmem:[%s3376_s26 + $0x14] ss:$8 sps:$4 sm:$0xff]  }
  0x11   : > { %v3124_v8 = vld [vmem:[%s3376_s26 + $0x204] ss:$8 sps:$4 sm:$0xff]   ;;  %2738 = vmatprep.mubr.msk.bf16.mxu0 %vm1013_vm0, %v3121_v6  ;;  %v3122_v24 = vld [vmem:[%s3376_s26 + $0x200] ss:$8 sps:$4 sm:$0xff]   ;;  %v3127_v26 = vld [vmem:[%s3376_s26 + $0x214] ss:$8 sps:$4 sm:$0xff]  }
  0x12   : > { %2770 = vmatprep.mubr.msk.bf16.mxu1 %vm1013_vm0, %v3124_v8  ;;  %v3129_v27 = vld [vmem:[%s3376_s26 + $0x10] ss:$8 sps:$4 sm:$0xff]   ;;  %v3131_v29 = vld [vmem:[%s3376_s26 + $0x24] ss:$8 sps:$4 sm:$0xff]   ;;  %v3135_v31 = vld [vmem:[%s3376_s26 + $0x20] ss:$8 sps:$4 sm:$0xff]  }
  0x13   : > { %1220 = vmatpush1.bf16.msra.mxu0 %v3106_v4  ;;  %3080 = vmatpush1.bf16.msra.mxu1 %v3106_v4  ;;  %v3130_v28 = vld [vmem:[%s3376_s26 + $0x210] ss:$8 sps:$4 sm:$0xff]   ;;  %v3133_v30 = vld [vmem:[%s3376_s26 + $0x224] ss:$8 sps:$4 sm:$0xff]   ;;  %v3136_v32 = vld [vmem:[%s3376_s26 + $0x220] ss:$8 sps:$4 sm:$0xff]  }
  0x14   : > { %1221 = vmatprep.subr.bf16.mxu0 %v3320_v1  ;;  %3065 = vmatprep.subr.bf16.mxu1 %v3320_v1  ;;  %v3137_v33 = vld [vmem:[%s3376_s26 + $0x34] ss:$8 sps:$4 sm:$0xff]   ;;  %v3141_v35 = vld [vmem:[%s3376_s26 + $0x30] ss:$8 sps:$4 sm:$0xff]   ;;  %v3143_v37 = vld [vmem:[%s3376_s26 + $0x44] ss:$8 sps:$4 sm:$0xff]  }
  0x15   : > { %v3139_v34 = vld [vmem:[%s3376_s26 + $0x234] ss:$8 sps:$4 sm:$0xff]   ;;  %v3142_v36 = vld [vmem:[%s3376_s26 + $0x230] ss:$8 sps:$4 sm:$0xff]   ;;  %v3145_v38 = vld [vmem:[%s3376_s26 + $0x244] ss:$8 sps:$4 sm:$0xff]  }
  0x16   : > { %v3147_v39 = vld [vmem:[%s3376_s26 + $0x40] ss:$8 sps:$4 sm:$0xff]   ;;  %v3149_v41 = vld [vmem:[%s3376_s26 + $0x54] ss:$8 sps:$4 sm:$0xff]   ;;  %v3153_v43 = vld [vmem:[%s3376_s26 + $0x50] ss:$8 sps:$4 sm:$0xff]  }
  0x17   : > { %1222 = vmatpush1.bf16.msra.mxu0 %v3107_v5  ;;  %3081 = vmatpush1.bf16.msra.mxu1 %v3107_v5  ;;  %v3148_v40 = vld [vmem:[%s3376_s26 + $0x240] ss:$8 sps:$4 sm:$0xff]   ;;  %v3151_v42 = vld [vmem:[%s3376_s26 + $0x254] ss:$8 sps:$4 sm:$0xff]   ;;  %v3154_v44 = vld [vmem:[%s3376_s26 + $0x250] ss:$8 sps:$4 sm:$0xff]  }
  0x18   : > { %1223 = vmatprep.subr.bf16.mxu0 %v3320_v1  ;;  %3066 = vmatprep.subr.bf16.mxu1 %v3320_v1  ;;  %v3155_v45 = vld [vmem:[%s3376_s26 + $0x64] ss:$8 sps:$4 sm:$0xff]   ;;  %v3159_v47 = vld [vmem:[%s3376_s26 + $0x60] ss:$8 sps:$4 sm:$0xff]   ;;  %v3161_v49 = vld [vmem:[%s3376_s26 + $0x74] ss:$8 sps:$4 sm:$0xff]  }
  0x19   : > { %v3157_v46 = vld [vmem:[%s3376_s26 + $0x264] ss:$8 sps:$4 sm:$0xff]   ;;  %v3160_v48 = vld [vmem:[%s3376_s26 + $0x260] ss:$8 sps:$4 sm:$0xff]   ;;  %v3163_v50 = vld [vmem:[%s3376_s26 + $0x274] ss:$8 sps:$4 sm:$0xff]  }
  0x1a   : > { %v3165_v51 = vld [vmem:[%s3376_s26 + $0x70] ss:$8 sps:$4 sm:$0xff]   ;;  %v3167_v53 = vld [vmem:[%s3376_s26 + $0x84] ss:$8 sps:$4 sm:$0xff]   ;;  %v3171_v55 = vld [vmem:[%s3376_s26 + $0x80] ss:$8 sps:$4 sm:$0xff]  }
  0x1b   : > { %1224 = vmatpush1.bf16.msra.mxu0 %v3108_v7  ;;  %3082 = vmatpush1.bf16.msra.mxu1 %v3108_v7  ;;  %v3166_v52 = vld [vmem:[%s3376_s26 + $0x270] ss:$8 sps:$4 sm:$0xff]   ;;  %v3169_v54 = vld [vmem:[%s3376_s26 + $0x284] ss:$8 sps:$4 sm:$0xff]   ;;  %v3172_v56 = vld [vmem:[%s3376_s26 + $0x280] ss:$8 sps:$4 sm:$0xff]  }
  0x1c   : > { %1225 = vmatprep.subr.bf16.mxu0 %v3320_v1  ;;  %3067 = vmatprep.subr.bf16.mxu1 %v3320_v1  ;;  %v3173_v57 = vld [vmem:[%s3376_s26 + $0x94] ss:$8 sps:$4 sm:$0xff]   ;;  %v3177_v59 = vld [vmem:[%s3376_s26 + $0x90] ss:$8 sps:$4 sm:$0xff]   ;;  %v3179_v61 = vld [vmem:[%s3376_s26 + $0xa4] ss:$8 sps:$4 sm:$0xff]  }
  0x1d   : > { %v3175_v58 = vld [vmem:[%s3376_s26 + $0x294] ss:$8 sps:$4 sm:$0xff]   ;;  %v3178_v60 = vld [vmem:[%s3376_s26 + $0x290] ss:$8 sps:$4 sm:$0xff]   ;;  %v3181_v62 = vld [vmem:[%s3376_s26 + $0x2a4] ss:$8 sps:$4 sm:$0xff]  }
  0x1e   : > { %v3183_v63 = vld [vmem:[%s3376_s26 + $0xa0] ss:$8 sps:$4 sm:$0xff]   ;;  %v3187_v2 = vld [vmem:[%s3376_s26 + $0x2b4] ss:$8 sps:$4 sm:$0xff]   ;;  %v3189_v3 = vld [vmem:[%s3376_s26 + $0xb0] ss:$8 sps:$4 sm:$0xff]  }
  0x1f   : > { %1226 = vmatpush1.bf16.msra.mxu0 %v3109_v9  ;;  %3083 = vmatpush1.bf16.msra.mxu1 %v3109_v9  ;;  %v3184_v0 = vld [vmem:[%s3376_s26 + $0x2a0] ss:$8 sps:$4 sm:$0xff]   ;;  %v3190_v4 = vld [vmem:[%s3376_s26 + $0x2b0] ss:$8 sps:$4 sm:$0xff]   ;;  %v3191_v5 = vld [vmem:[%s3376_s26 + $0xc4] ss:$8 sps:$4 sm:$0xff]  }
  0x20   : > { %1227 = vmatprep.subr.bf16.mxu0 %v3320_v1  ;;  %3068 = vmatprep.subr.bf16.mxu1 %v3320_v1  ;;  %v3193_v6 = vld [vmem:[%s3376_s26 + $0x2c4] ss:$8 sps:$4 sm:$0xff]   ;;  %v3195_v7 = vld [vmem:[%s3376_s26 + $0xc0] ss:$8 sps:$4 sm:$0xff]   ;;  %v3197_v9 = vld [vmem:[%s3376_s26 + $0xd4] ss:$8 sps:$4 sm:$0xff]  }
  0x21   : > { %v3196_v8 = vld [vmem:[%s3376_s26 + $0x2c0] ss:$8 sps:$4 sm:$0xff]   ;;  %v3209_v17 = vld [vmem:[%s3376_s26 + $0xf4] ss:$8 sps:$4 sm:$0xff]   ;;  %v3214_v20 = vld [vmem:[%s3376_s26 + $0x2f0] ss:$8 sps:$4 sm:$0xff]  }
  0x22   : > { %v3211_v18 = vld [vmem:[%s3376_s26 + $0x2f4] ss:$8 sps:$4 sm:$0xff]   ;;  %v3215_v21 = vld [vmem:[%s3376_s26 + $0x104] ss:$8 sps:$4 sm:$0xff]  }
  0x23   : > { %1228 = vmatpush1.bf16.msra.mxu0 %v3110_v10  ;;  %3084 = vmatpush1.bf16.msra.mxu1 %v3110_v10  ;;  %v3199_v10 = vld [vmem:[%s3376_s26 + $0x2d4] ss:$8 sps:$4 sm:$0xff]  }
  0x24   : > { %1229 = vmatprep.subr.bf16.mxu0 %v3320_v1  ;;  %3069 = vmatprep.subr.bf16.mxu1 %v3320_v1 }
  0x27   : > { %1230 = vmatpush1.bf16.msra.mxu0 %v3111_v11  ;;  %3085 = vmatpush1.bf16.msra.mxu1 %v3111_v11  ;;  %v3201_v11 = vld [vmem:[%s3376_s26 + $0xd0] ss:$8 sps:$4 sm:$0xff]  }
  0x28   : > { %1231 = vmatprep.subr.bf16.mxu0 %v3320_v1  ;;  %3070 = vmatprep.subr.bf16.mxu1 %v3320_v1 }
  0x2b   : > { %1232 = vmatpush1.bf16.msra.mxu0 %v3112_v12  ;;  %3086 = vmatpush1.bf16.msra.mxu1 %v3112_v12  ;;  %v3202_v12 = vld [vmem:[%s3376_s26 + $0x2d0] ss:$8 sps:$4 sm:$0xff]  }
  0x2c   : > { %1233 = vmatprep.subr.bf16.mxu0 %v3320_v1  ;;  %3071 = vmatprep.subr.bf16.mxu1 %v3320_v1 }
  0x2f   : > { %1234 = vmatpush1.bf16.msra.mxu0 %v3113_v13  ;;  %3087 = vmatpush1.bf16.msra.mxu1 %v3113_v13  ;;  %v3203_v13 = vld [vmem:[%s3376_s26 + $0xe4] ss:$8 sps:$4 sm:$0xff]  }
  0x30   : > { %1235 = vmatprep.subr.bf16.mxu0 %v3320_v1  ;;  %3072 = vmatprep.subr.bf16.mxu1 %v3320_v1 }
  0x33   : > { %1236 = vmatpush1.bf16.msra.mxu0 %v3114_v14  ;;  %3088 = vmatpush1.bf16.msra.mxu1 %v3114_v14  ;;  %v3205_v14 = vld [vmem:[%s3376_s26 + $0x2e4] ss:$8 sps:$4 sm:$0xff]  }
  0x34   : > { %1237 = vmatprep.subr.bf16.mxu0 %v3320_v1  ;;  %3073 = vmatprep.subr.bf16.mxu1 %v3320_v1 }
  0x37   : > { %1238 = vmatpush1.bf16.msra.mxu0 %v3115_v15  ;;  %3089 = vmatpush1.bf16.msra.mxu1 %v3115_v15  ;;  %v3207_v15 = vld [vmem:[%s3376_s26 + $0xe0] ss:$8 sps:$4 sm:$0xff]  }
  0x38   : > { %1239 = vmatprep.subr.bf16.mxu0 %v3320_v1  ;;  %3074 = vmatprep.subr.bf16.mxu1 %v3320_v1 }
  0x3b   : > { %1240 = vmatpush1.bf16.msra.mxu0 %v3116_v16  ;;  %3090 = vmatpush1.bf16.msra.mxu1 %v3116_v16  ;;  %v3208_v16 = vld [vmem:[%s3376_s26 + $0x2e0] ss:$8 sps:$4 sm:$0xff]  }
  0x3c   : > { %1241 = vmatprep.subr.bf16.mxu0 %v3320_v1  ;;  %3075 = vmatprep.subr.bf16.mxu1 %v3320_v1 }
  0x3f   : > { %1242 = vmatpush1.bf16.msra.mxu0 %v3117_v19  ;;  %3091 = vmatpush1.bf16.msra.mxu1 %v3117_v19  ;;  %v3213_v19 = vld [vmem:[%s3376_s26 + $0xf0] ss:$8 sps:$4 sm:$0xff]  }
  0x40   : > { %1243 = vmatprep.subr.bf16.mxu0 %v3320_v1  ;;  %3076 = vmatprep.subr.bf16.mxu1 %v3320_v1  ;;  %v3185_v1 = vld [vmem:[%s3376_s26 + $0xb4] ss:$8 sps:$4 sm:$0xff]  }
  0x43   : > { %1244 = vmatpush1.bf16.msra.mxu0 %v1211_v22  ;;  %3092 = vmatpush1.bf16.msra.mxu1 %v1211_v22  ;;  %v3217_v22 = vld [vmem:[%s3376_s26 + $0x304] ss:$8 sps:$4 sm:$0xff]  }
  0x46   : > { %1246 = vmatmul.mubr.bf16.vlgmr.msra.gmra.mrb[0].mxu0 %v3119_v23  ;;  %1502 = vmatmul.mubr.bf16.vlgmr.msra.gmra.mrb[0].mxu1 %v3122_v24  ;;  %v3219_v23 = vld [vmem:[%s3376_s26 + $0x100] ss:$8 sps:$4 sm:$0xff]  }
  0x47   : > { %2739 = vmatprep.mubr.msk.bf16.mxu0 %vm1013_vm0, %v3125_v25  ;;  %2771 = vmatprep.mubr.msk.bf16.mxu1 %vm1013_vm0, %v3127_v26  ;;  %v3220_v24 = vld [vmem:[%s3376_s26 + $0x300] ss:$8 sps:$4 sm:$0xff]   ;;  %v3221_v25 = vld [vmem:[%s3376_s26 + $0x114] ss:$8 sps:$4 sm:$0xff]  }
  0x48   : > { %v3223_v26 = vld [vmem:[%s3376_s26 + $0x314] ss:$8 sps:$4 sm:$0xff]  }
  0x4e   : > { %1254 = vmatmul.mubr.bf16.gmra.mrb[4].mxu0 %v3129_v27  ;;  %1510 = vmatmul.mubr.bf16.gmra.mrb[4].mxu1 %v3130_v28  ;;  %v3225_v27 = vld [vmem:[%s3376_s26 + $0x110] ss:$8 sps:$4 sm:$0xff]  }
  0x4f   : > { %2740 = vmatprep.mubr.msk.bf16.mxu0 %vm1013_vm0, %v3131_v29  ;;  %2772 = vmatprep.mubr.msk.bf16.mxu1 %vm1013_vm0, %v3133_v30  ;;  %v3226_v28 = vld [vmem:[%s3376_s26 + $0x310] ss:$8 sps:$4 sm:$0xff]   ;;  %v3227_v29 = vld [vmem:[%s3376_s26 + $0x124] ss:$8 sps:$4 sm:$0xff]  }
  0x50   : > { %v3229_v30 = vld [vmem:[%s3376_s26 + $0x324] ss:$8 sps:$4 sm:$0xff]  }
  0x56   : > { %1262 = vmatmul.mubr.bf16.gmra.mrb[8].mxu0 %v3135_v31  ;;  %1518 = vmatmul.mubr.bf16.gmra.mrb[8].mxu1 %v3136_v32  ;;  %v3231_v31 = vld [vmem:[%s3376_s26 + $0x120] ss:$8 sps:$4 sm:$0xff]  }
  0x57   : > { %2741 = vmatprep.mubr.msk.bf16.mxu0 %vm1013_vm0, %v3137_v33  ;;  %2773 = vmatprep.mubr.msk.bf16.mxu1 %vm1013_vm0, %v3139_v34  ;;  %v3232_v32 = vld [vmem:[%s3376_s26 + $0x320] ss:$8 sps:$4 sm:$0xff]   ;;  %v3233_v33 = vld [vmem:[%s3376_s26 + $0x134] ss:$8 sps:$4 sm:$0xff]  }
  0x58   : > { %v3235_v34 = vld [vmem:[%s3376_s26 + $0x334] ss:$8 sps:$4 sm:$0xff]  }
  0x5e   : > { %1270 = vmatmul.mubr.bf16.gmra.mrb[12].mxu0 %v3141_v35  ;;  %1526 = vmatmul.mubr.bf16.gmra.mrb[12].mxu1 %v3142_v36  ;;  %v3237_v35 = vld [vmem:[%s3376_s26 + $0x130] ss:$8 sps:$4 sm:$0xff]  }
  0x5f   : > { %2742 = vmatprep.mubr.msk.bf16.mxu0 %vm1013_vm0, %v3143_v37  ;;  %2774 = vmatprep.mubr.msk.bf16.mxu1 %vm1013_vm0, %v3145_v38  ;;  %v3238_v36 = vld [vmem:[%s3376_s26 + $0x330] ss:$8 sps:$4 sm:$0xff]   ;;  %v3239_v37 = vld [vmem:[%s3376_s26 + $0x144] ss:$8 sps:$4 sm:$0xff]  }
  0x60   : > { %v3241_v38 = vld [vmem:[%s3376_s26 + $0x344] ss:$8 sps:$4 sm:$0xff]  }
  0x66   : > { %1278 = vmatmul.mubr.bf16.gmra.mrb[16].mxu0 %v3147_v39  ;;  %1534 = vmatmul.mubr.bf16.gmra.mrb[16].mxu1 %v3148_v40  ;;  %v3243_v39 = vld [vmem:[%s3376_s26 + $0x140] ss:$8 sps:$4 sm:$0xff]  }
  0x67   : > { %2743 = vmatprep.mubr.msk.bf16.mxu0 %vm1013_vm0, %v3149_v41  ;;  %2775 = vmatprep.mubr.msk.bf16.mxu1 %vm1013_vm0, %v3151_v42  ;;  %v3244_v40 = vld [vmem:[%s3376_s26 + $0x340] ss:$8 sps:$4 sm:$0xff]   ;;  %v3245_v41 = vld [vmem:[%s3376_s26 + $0x154] ss:$8 sps:$4 sm:$0xff]  }
  0x68   : > { %v3247_v42 = vld [vmem:[%s3376_s26 + $0x354] ss:$8 sps:$4 sm:$0xff]  }
  0x6e   : > { %1286 = vmatmul.mubr.bf16.gmra.mrb[20].mxu0 %v3153_v43  ;;  %1542 = vmatmul.mubr.bf16.gmra.mrb[20].mxu1 %v3154_v44  ;;  %v3249_v43 = vld [vmem:[%s3376_s26 + $0x150] ss:$8 sps:$4 sm:$0xff]  }
  0x6f   : > { %2744 = vmatprep.mubr.msk.bf16.mxu0 %vm1013_vm0, %v3155_v45  ;;  %2776 = vmatprep.mubr.msk.bf16.mxu1 %vm1013_vm0, %v3157_v46  ;;  %v3250_v44 = vld [vmem:[%s3376_s26 + $0x350] ss:$8 sps:$4 sm:$0xff]   ;;  %v3251_v45 = vld [vmem:[%s3376_s26 + $0x164] ss:$8 sps:$4 sm:$0xff]  }
  0x70   : > { %v3253_v46 = vld [vmem:[%s3376_s26 + $0x364] ss:$8 sps:$4 sm:$0xff]  }
  0x76   : > { %1294 = vmatmul.mubr.bf16.gmra.mrb[24].mxu0 %v3159_v47  ;;  %1550 = vmatmul.mubr.bf16.gmra.mrb[24].mxu1 %v3160_v48  ;;  %v3255_v47 = vld [vmem:[%s3376_s26 + $0x160] ss:$8 sps:$4 sm:$0xff]  }
  0x77   : > { %2745 = vmatprep.mubr.msk.bf16.mxu0 %vm1013_vm0, %v3161_v49  ;;  %2777 = vmatprep.mubr.msk.bf16.mxu1 %vm1013_vm0, %v3163_v50  ;;  %v3256_v48 = vld [vmem:[%s3376_s26 + $0x360] ss:$8 sps:$4 sm:$0xff]   ;;  %v3257_v49 = vld [vmem:[%s3376_s26 + $0x174] ss:$8 sps:$4 sm:$0xff]  }
  0x78   : > { %v3259_v50 = vld [vmem:[%s3376_s26 + $0x374] ss:$8 sps:$4 sm:$0xff]  }
  0x7e   : > { %1302 = vmatmul.mubr.bf16.gmra.mrb[28].mxu0 %v3165_v51  ;;  %1558 = vmatmul.mubr.bf16.gmra.mrb[28].mxu1 %v3166_v52  ;;  %v3261_v51 = vld [vmem:[%s3376_s26 + $0x170] ss:$8 sps:$4 sm:$0xff]  }
  0x7f   : > { %2746 = vmatprep.mubr.msk.bf16.mxu0 %vm1013_vm0, %v3167_v53  ;;  %2778 = vmatprep.mubr.msk.bf16.mxu1 %vm1013_vm0, %v3169_v54  ;;  %v3262_v52 = vld [vmem:[%s3376_s26 + $0x370] ss:$8 sps:$4 sm:$0xff]   ;;  %v3263_v53 = vld [vmem:[%s3376_s26 + $0x184] ss:$8 sps:$4 sm:$0xff]  }
  0x80   : > { %v3265_v54 = vld [vmem:[%s3376_s26 + $0x384] ss:$8 sps:$4 sm:$0xff]  }
  0x86   : > { %1310 = vmatmul.mubr.bf16.gmra.mrb[32].mxu0 %v3171_v55  ;;  %1566 = vmatmul.mubr.bf16.gmra.mrb[32].mxu1 %v3172_v56  ;;  %v3267_v55 = vld [vmem:[%s3376_s26 + $0x180] ss:$8 sps:$4 sm:$0xff]  }
  0x87   : > { %2747 = vmatprep.mubr.msk.bf16.mxu0 %vm1013_vm0, %v3173_v57  ;;  %2779 = vmatprep.mubr.msk.bf16.mxu1 %vm1013_vm0, %v3175_v58  ;;  %v3268_v56 = vld [vmem:[%s3376_s26 + $0x380] ss:$8 sps:$4 sm:$0xff]   ;;  %v3269_v57 = vld [vmem:[%s3376_s26 + $0x194] ss:$8 sps:$4 sm:$0xff]  }
  0x88   : > { %v3271_v58 = vld [vmem:[%s3376_s26 + $0x394] ss:$8 sps:$4 sm:$0xff]  }
  0x8e   : > { %1318 = vmatmul.mubr.bf16.gmra.mrb[36].mxu0 %v3177_v59  ;;  %1574 = vmatmul.mubr.bf16.gmra.mrb[36].mxu1 %v3178_v60  ;;  %v3273_v59 = vld [vmem:[%s3376_s26 + $0x190] ss:$8 sps:$4 sm:$0xff]  }
  0x8f   : > { %2748 = vmatprep.mubr.msk.bf16.mxu0 %vm1013_vm0, %v3179_v61  ;;  %2780 = vmatprep.mubr.msk.bf16.mxu1 %vm1013_vm0, %v3181_v62  ;;  %v3274_v60 = vld [vmem:[%s3376_s26 + $0x390] ss:$8 sps:$4 sm:$0xff]   ;;  %v3275_v61 = vld [vmem:[%s3376_s26 + $0x1a4] ss:$8 sps:$4 sm:$0xff]  }
  0x90   : > { %v3277_v62 = vld [vmem:[%s3376_s26 + $0x3a4] ss:$8 sps:$4 sm:$0xff]  }
  0x96   : > { %1326 = vmatmul.mubr.bf16.gmra.mrb[40].mxu0 %v3183_v63  ;;  %1582 = vmatmul.mubr.bf16.gmra.mrb[40].mxu1 %v3184_v0  ;;  %v3279_v63 = vld [vmem:[%s3376_s26 + $0x1a0] ss:$8 sps:$4 sm:$0xff]  }
  0x97   : > { %2749 = vmatprep.mubr.msk.bf16.mxu0 %vm1013_vm0, %v3185_v1  ;;  %2781 = vmatprep.mubr.msk.bf16.mxu1 %vm1013_vm0, %v3187_v2  ;;  %v3280_v0 = vld [vmem:[%s3376_s26 + $0x3a0] ss:$8 sps:$4 sm:$0xff]   ;;  %v3281_v1 = vld [vmem:[%s3376_s26 + $0x1b4] ss:$8 sps:$4 sm:$0xff]  }
  0x98   : > { %v3283_v2 = vld [vmem:[%s3376_s26 + $0x3b4] ss:$8 sps:$4 sm:$0xff]  }
  0x9e   : > { %1334 = vmatmul.mubr.bf16.gmra.mrb[44].mxu0 %v3189_v3  ;;  %1590 = vmatmul.mubr.bf16.gmra.mrb[44].mxu1 %v3190_v4  ;;  %v3605_v3 = vld [vmem:[%s4035_s2] ss:$0 sm:$0xff] }
  0x9f   : > { %2750 = vmatprep.mubr.msk.bf16.mxu0 %vm1013_vm0, %v3191_v5  ;;  %2782 = vmatprep.mubr.msk.bf16.mxu1 %vm1013_vm0, %v3193_v6 }
  0xa6   : > { %1342 = vmatmul.mubr.bf16.gmra.mrb[48].mxu0 %v3195_v7  ;;  %1598 = vmatmul.mubr.bf16.gmra.mrb[48].mxu1 %v3196_v8 }
  0xa7   : > { %2751 = vmatprep.mubr.msk.bf16.mxu0 %vm1013_vm0, %v3197_v9  ;;  %2783 = vmatprep.mubr.msk.bf16.mxu1 %vm1013_vm0, %v3199_v10  ;;  %v3285_v10 = vld [vmem:[%s3376_s26 + $0x1b0] ss:$8 sps:$4 sm:$0xff]  }
  0xae   : > { %1350 = vmatmul.mubr.bf16.gmra.mrb[52].mxu0 %v3201_v11  ;;  %1606 = vmatmul.mubr.bf16.gmra.mrb[52].mxu1 %v3202_v12  ;;  %v3286_v11 = vld [vmem:[%s3376_s26 + $0x3b0] ss:$8 sps:$4 sm:$0xff]  }
  0xaf   : > { %2752 = vmatprep.mubr.msk.bf16.mxu0 %vm1013_vm0, %v3203_v13  ;;  %2784 = vmatprep.mubr.msk.bf16.mxu1 %vm1013_vm0, %v3205_v14  ;;  %v3287_v14 = vld [vmem:[%s3376_s26 + $0x1c4] ss:$8 sps:$4 sm:$0xff]  }
  0xb6   : > { %1358 = vmatmul.mubr.bf16.gmra.mrb[56].mxu0 %v3207_v15  ;;  %1614 = vmatmul.mubr.bf16.gmra.mrb[56].mxu1 %v3208_v16  ;;  %v3289_v15 = vld [vmem:[%s3376_s26 + $0x3c4] ss:$8 sps:$4 sm:$0xff]  }
  0xb7   : > { %2753 = vmatprep.mubr.msk.bf16.mxu0 %vm1013_vm0, %v3209_v17  ;;  %2785 = vmatprep.mubr.msk.bf16.mxu1 %vm1013_vm0, %v3211_v18 }
  0xbe   : > { %1366 = vmatmul.mubr.bf16.gmra.mrb[60].mxu0 %v3213_v19  ;;  %1622 = vmatmul.mubr.bf16.gmra.mrb[60].mxu1 %v3214_v20 }
  0xbf   : > { %2754 = vmatprep.mubr.msk.bf16.mxu0 %vm1013_vm0, %v3215_v21  ;;  %2786 = vmatprep.mubr.msk.bf16.mxu1 %vm1013_vm0, %v3217_v22 }
  0xc6   : > { %1374 = vmatmul.mubr.bf16.gmra.mrb[64].mxu0 %v3219_v23  ;;  %1630 = vmatmul.mubr.bf16.gmra.mrb[64].mxu1 %v3220_v24 }
  0xc7   : > { %2755 = vmatprep.mubr.msk.bf16.mxu0 %vm1013_vm0, %v3221_v25  ;;  %2787 = vmatprep.mubr.msk.bf16.mxu1 %vm1013_vm0, %v3223_v26 }
  0xce   : > { %1382 = vmatmul.mubr.bf16.gmra.mrb[68].mxu0 %v3225_v27  ;;  %1638 = vmatmul.mubr.bf16.gmra.mrb[68].mxu1 %v3226_v28 }
  0xcf   : > { %2756 = vmatprep.mubr.msk.bf16.mxu0 %vm1013_vm0, %v3227_v29  ;;  %2788 = vmatprep.mubr.msk.bf16.mxu1 %vm1013_vm0, %v3229_v30 }
  0xd6   : > { %1390 = vmatmul.mubr.bf16.gmra.mrb[72].mxu0 %v3231_v31  ;;  %1646 = vmatmul.mubr.bf16.gmra.mrb[72].mxu1 %v3232_v32 }
  0xd7   : > { %2757 = vmatprep.mubr.msk.bf16.mxu0 %vm1013_vm0, %v3233_v33  ;;  %2789 = vmatprep.mubr.msk.bf16.mxu1 %vm1013_vm0, %v3235_v34  ;;  %v3291_v34 = vld [vmem:[%s3376_s26 + $0x1c0] ss:$8 sps:$4 sm:$0xff]  }
  0xde   : > { %1398 = vmatmul.mubr.bf16.gmra.mrb[76].mxu0 %v3237_v35  ;;  %1654 = vmatmul.mubr.bf16.gmra.mrb[76].mxu1 %v3238_v36  ;;  %v3292_v35 = vld [vmem:[%s3376_s26 + $0x3c0] ss:$8 sps:$4 sm:$0xff]  }
  0xdf   : > { %2758 = vmatprep.mubr.msk.bf16.mxu0 %vm1013_vm0, %v3239_v37  ;;  %2790 = vmatprep.mubr.msk.bf16.mxu1 %vm1013_vm0, %v3241_v38  ;;  %v3293_v38 = vld [vmem:[%s3376_s26 + $0x1d4] ss:$8 sps:$4 sm:$0xff]  }
  0xe6   : > { %1406 = vmatmul.mubr.bf16.gmra.mrb[80].mxu0 %v3243_v39  ;;  %1662 = vmatmul.mubr.bf16.gmra.mrb[80].mxu1 %v3244_v40  ;;  %v3295_v39 = vld [vmem:[%s3376_s26 + $0x3d4] ss:$8 sps:$4 sm:$0xff]  }
  0xe7   : > { %2759 = vmatprep.mubr.msk.bf16.mxu0 %vm1013_vm0, %v3245_v41  ;;  %2791 = vmatprep.mubr.msk.bf16.mxu1 %vm1013_vm0, %v3247_v42 }
  0xee   : > { %1414 = vmatmul.mubr.bf16.gmra.mrb[84].mxu0 %v3249_v43  ;;  %1670 = vmatmul.mubr.bf16.gmra.mrb[84].mxu1 %v3250_v44 }
  0xef   : > { %2760 = vmatprep.mubr.msk.bf16.mxu0 %vm1013_vm0, %v3251_v45  ;;  %2792 = vmatprep.mubr.msk.bf16.mxu1 %vm1013_vm0, %v3253_v46 }
  0xf6   : > { %1422 = vmatmul.mubr.bf16.gmra.mrb[88].mxu0 %v3255_v47  ;;  %1678 = vmatmul.mubr.bf16.gmra.mrb[88].mxu1 %v3256_v48 }
  0xf7   : > { %2761 = vmatprep.mubr.msk.bf16.mxu0 %vm1013_vm0, %v3257_v49  ;;  %2793 = vmatprep.mubr.msk.bf16.mxu1 %vm1013_vm0, %v3259_v50 }
  0xfe   : > { %1430 = vmatmul.mubr.bf16.gmra.mrb[92].mxu0 %v3261_v51  ;;  %1686 = vmatmul.mubr.bf16.gmra.mrb[92].mxu1 %v3262_v52 }
  0xff   : > { %2762 = vmatprep.mubr.msk.bf16.mxu0 %vm1013_vm0, %v3263_v53  ;;  %2794 = vmatprep.mubr.msk.bf16.mxu1 %vm1013_vm0, %v3265_v54 }
 0x106   : > { %1438 = vmatmul.mubr.bf16.gmra.mrb[96].mxu0 %v3267_v55  ;;  %1694 = vmatmul.mubr.bf16.gmra.mrb[96].mxu1 %v3268_v56 }
 0x107   : > { %2763 = vmatprep.mubr.msk.bf16.mxu0 %vm1013_vm0, %v3269_v57  ;;  %2795 = vmatprep.mubr.msk.bf16.mxu1 %vm1013_vm0, %v3271_v58  ;;  %v3297_v58 = vld [vmem:[%s3376_s26 + $0x1d0] ss:$8 sps:$4 sm:$0xff]  }
 0x10e   : > { %1446 = vmatmul.mubr.bf16.gmra.mrb[100].mxu0 %v3273_v59  ;;  %1702 = vmatmul.mubr.bf16.gmra.mrb[100].mxu1 %v3274_v60  ;;  %v3298_v59 = vld [vmem:[%s3376_s26 + $0x3d0] ss:$8 sps:$4 sm:$0xff]  }
 0x10f   : > { %2764 = vmatprep.mubr.msk.bf16.mxu0 %vm1013_vm0, %v3275_v61  ;;  %2796 = vmatprep.mubr.msk.bf16.mxu1 %vm1013_vm0, %v3277_v62  ;;  %v3299_v62 = vld [vmem:[%s3376_s26 + $0x1e4] ss:$8 sps:$4 sm:$0xff]  }
 0x116   : > { %1454 = vmatmul.mubr.bf16.gmra.mrb[104].mxu0 %v3279_v63  ;;  %1710 = vmatmul.mubr.bf16.gmra.mrb[104].mxu1 %v3280_v0  ;;  %v3301_v63 = vld [vmem:[%s3376_s26 + $0x3e4] ss:$8 sps:$4 sm:$0xff]  }
 0x117   : > { %2765 = vmatprep.mubr.msk.bf16.mxu0 %vm1013_vm0, %v3281_v1  ;;  %2797 = vmatprep.mubr.msk.bf16.mxu1 %vm1013_vm0, %v3283_v2 }
 0x119   : > { %v1247_v4 = vpop.f32.mrb[0].mxu0  ;;  %v1503_v5 = vpop.f32.mrb[0].mxu1 }
 0x11a   : > { %v1248_v6 = vadd.f32 %v3605_v3, %v1247_v4  ;;  %v1504_v7 = vadd.f32 %v3605_v3, %v1503_v5  ;;  %v1249_v8 = vpop.f32.mrb[1].mxu0  ;;  %v1505_v9 = vpop.f32.mrb[1].mxu1 }
 0x11b   : > { %v1250_v12 = vpop.f32.mrb[2].mxu0  ;;  %v1506_v13 = vpop.f32.mrb[2].mxu1 }
 0x11c   : > { %v1758_v16 = vmax.f32 %v1248_v6, 0.0  ;;  %v1822_v17 = vmax.f32 %v1504_v7, 0.0  ;;  %v1251_v18 = vadd.f32 %v3605_v3, %v1250_v12  ;;  %v1507_v19 = vadd.f32 %v3605_v3, %v1506_v13  ;;  %v1252_v20 = vpop.f32.mrb[3].mxu0  ;;  %v1508_v21 = vpop.f32.mrb[3].mxu1 }
 0x11d   : > { %v3304_v20 = vld [vmem:[%s3376_s26 + $0x3e0] ss:$8 sps:$4 sm:$0xff]  }
 0x11e   : > { %v2933_v22 = vpack.c.bf16 %v1758_v16, %v1758_v16  ;;  %v2997_v23 = vpack.c.bf16 %v1822_v17, %v1822_v17  ;;  %v1759_v24 = vmax.f32 %v1251_v18, 0.0  ;;  %v1823_v25 = vmax.f32 %v1507_v19, 0.0  ;;  %1462 = vmatmul.mubr.bf16.gmra.mrb[108].mxu0 %v3285_v10  ;;  %1718 = vmatmul.mubr.bf16.gmra.mrb[108].mxu1 %v3286_v11  ;;  %v3303_v19 = vld [vmem:[%s3376_s26 + $0x1e0] ss:$8 sps:$4 sm:$0xff]  }
 0x11f   : > { %2766 = vmatprep.mubr.msk.bf16.mxu0 %vm1013_vm0, %v3287_v14  ;;  %2798 = vmatprep.mubr.msk.bf16.mxu1 %vm1013_vm0, %v3289_v15 }
 0x120   : > { %2399 = vst.msk [vmem:[%s3621_s4] sm:$0xf] %vm2398_vm3, %v2933_v22  ;;  %2463 = vst.msk [vmem:[%s3621_s4 + $0x100] sm:$0xf] %vm2398_vm3, %v2997_v23  ;;  %v2934_v26 = vpack.c.bf16 %v1759_v24, %v1759_v24  ;;  %v2998_v27 = vpack.c.bf16 %v1823_v25, %v1823_v25  ;;  %v3305_v23 = vld [vmem:[%s3376_s26 + $0x1f4] ss:$8 sps:$4 sm:$0xff]  }
 0x121   : > { %v1255_v28 = vpop.f32.mrb[4].mxu0  ;;  %v1511_v29 = vpop.f32.mrb[4].mxu1  ;;  %v3307_v24 = vld [vmem:[%s3376_s26 + $0x3f4] ss:$8 sps:$4 sm:$0xff]  }
 0x122   : > { %2400 = vst.msk [vmem:[%s3621_s4 + $0x4] sm:$0xf] %vm2398_vm3, %v2934_v26  ;;  %2464 = vst.msk [vmem:[%s3621_s4 + $0x104] sm:$0xf] %vm2398_vm3, %v2998_v27  ;;  %v1256_v30 = vadd.f32 %v3605_v3, %v1255_v28  ;;  %v1512_v31 = vadd.f32 %v3605_v3, %v1511_v29  ;;  %v1257_v32 = vpop.f32.mrb[5].mxu0  ;;  %v1513_v33 = vpop.f32.mrb[5].mxu1 }
 0x123   : > { %v1258_v36 = vpop.f32.mrb[6].mxu0  ;;  %v1514_v37 = vpop.f32.mrb[6].mxu1 }
 0x124   : > { %v1760_v40 = vmax.f32 %v1256_v30, 0.0  ;;  %v1824_v41 = vmax.f32 %v1512_v31, 0.0  ;;  %v1259_v42 = vadd.f32 %v3605_v3, %v1258_v36  ;;  %v1515_v43 = vadd.f32 %v3605_v3, %v1514_v37  ;;  %v1260_v44 = vpop.f32.mrb[7].mxu0  ;;  %v1516_v45 = vpop.f32.mrb[7].mxu1 }
 0x125   : > { %v3310_v44 = vld [vmem:[%s3376_s26 + $0x3f0] ss:$8 sps:$4 sm:$0xff]  }
 0x126   : > { %v2935_v46 = vpack.c.bf16 %v1760_v40, %v1760_v40  ;;  %v2999_v47 = vpack.c.bf16 %v1824_v41, %v1824_v41  ;;  %v1761_v48 = vmax.f32 %v1259_v42, 0.0  ;;  %v1825_v49 = vmax.f32 %v1515_v43, 0.0  ;;  %1470 = vmatmul.mubr.bf16.gmra.mrb[112].mxu0 %v3291_v34  ;;  %1726 = vmatmul.mubr.bf16.gmra.mrb[112].mxu1 %v3292_v35  ;;  %v3309_v43 = vld [vmem:[%s3376_s26 + $0x1f0] ss:$8 sps:$4 sm:$0xff]  }
 0x127   : > { %2767 = vmatprep.mubr.msk.bf16.mxu0 %vm1013_vm0, %v3293_v38  ;;  %2799 = vmatprep.mubr.msk.bf16.mxu1 %vm1013_vm0, %v3295_v39 }
 0x128   : > { %2401 = vst.msk [vmem:[%s3621_s4 + $0x8] sm:$0xf] %vm2398_vm3, %v2935_v46  ;;  %2465 = vst.msk [vmem:[%s3621_s4 + $0x108] sm:$0xf] %vm2398_vm3, %v2999_v47  ;;  %v2936_v50 = vpack.c.bf16 %v1761_v48, %v1761_v48  ;;  %v3000_v51 = vpack.c.bf16 %v1825_v49, %v1825_v49 }
 0x129   : > { %v1263_v52 = vpop.f32.mrb[8].mxu0  ;;  %v1519_v53 = vpop.f32.mrb[8].mxu1 }
 0x12a   : > { %2402 = vst.msk [vmem:[%s3621_s4 + $0xc] sm:$0xf] %vm2398_vm3, %v2936_v50  ;;  %2466 = vst.msk [vmem:[%s3621_s4 + $0x10c] sm:$0xf] %vm2398_vm3, %v3000_v51  ;;  %v1264_v54 = vadd.f32 %v3605_v3, %v1263_v52  ;;  %v1520_v55 = vadd.f32 %v3605_v3, %v1519_v53  ;;  %v1265_v56 = vpop.f32.mrb[9].mxu0  ;;  %v1521_v57 = vpop.f32.mrb[9].mxu1 }
 0x12b   : > { %v1266_v60 = vpop.f32.mrb[10].mxu0  ;;  %v1522_v61 = vpop.f32.mrb[10].mxu1 }
 0x12c   : > { %v1762_v0 = vmax.f32 %v1264_v54, 0.0  ;;  %v1826_v1 = vmax.f32 %v1520_v55, 0.0  ;;  %v1267_v2 = vadd.f32 %v3605_v3, %v1266_v60  ;;  %v1523_v4 = vadd.f32 %v3605_v3, %v1522_v61  ;;  %v1268_v5 = vpop.f32.mrb[11].mxu0  ;;  %v1524_v6 = vpop.f32.mrb[11].mxu1 }
 0x12e   : > { %v2937_v7 = vpack.c.bf16 %v1762_v0, %v1762_v0  ;;  %v3001_v8 = vpack.c.bf16 %v1826_v1, %v1826_v1  ;;  %v1763_v9 = vmax.f32 %v1267_v2, 0.0  ;;  %v1827_v10 = vmax.f32 %v1523_v4, 0.0  ;;  %1478 = vmatmul.mubr.bf16.gmra.mrb[116].mxu0 %v3297_v58  ;;  %1734 = vmatmul.mubr.bf16.gmra.mrb[116].mxu1 %v3298_v59 }
 0x12f   : > { %2768 = vmatprep.mubr.msk.bf16.mxu0 %vm1013_vm0, %v3299_v62  ;;  %2800 = vmatprep.mubr.msk.bf16.mxu1 %vm1013_vm0, %v3301_v63 }
 0x130   : > { %2403 = vst.msk [vmem:[%s3621_s4 + $0x10] sm:$0xf] %vm2398_vm3, %v2937_v7  ;;  %2467 = vst.msk [vmem:[%s3621_s4 + $0x110] sm:$0xf] %vm2398_vm3, %v3001_v8  ;;  %v2938_v11 = vpack.c.bf16 %v1763_v9, %v1763_v9  ;;  %v3002_v12 = vpack.c.bf16 %v1827_v10, %v1827_v10 }
 0x131   : > { %v1271_v13 = vpop.f32.mrb[12].mxu0  ;;  %v1527_v14 = vpop.f32.mrb[12].mxu1 }
 0x132   : > { %2404 = vst.msk [vmem:[%s3621_s4 + $0x14] sm:$0xf] %vm2398_vm3, %v2938_v11  ;;  %2468 = vst.msk [vmem:[%s3621_s4 + $0x114] sm:$0xf] %vm2398_vm3, %v3002_v12  ;;  %v1272_v15 = vadd.f32 %v3605_v3, %v1271_v13  ;;  %v1528_v16 = vadd.f32 %v3605_v3, %v1527_v14  ;;  %v1273_v17 = vpop.f32.mrb[13].mxu0  ;;  %v1529_v18 = vpop.f32.mrb[13].mxu1 }
 0x133   : > { %v1274_v21 = vpop.f32.mrb[14].mxu0  ;;  %v1530_v22 = vpop.f32.mrb[14].mxu1 }
 0x134   : > { %v1764_v25 = vmax.f32 %v1272_v15, 0.0  ;;  %v1828_v26 = vmax.f32 %v1528_v16, 0.0  ;;  %v1275_v27 = vadd.f32 %v3605_v3, %v1274_v21  ;;  %v1531_v28 = vadd.f32 %v3605_v3, %v1530_v22  ;;  %v1276_v29 = vpop.f32.mrb[15].mxu0  ;;  %v1532_v30 = vpop.f32.mrb[15].mxu1 }
 0x136   : > { %v2939_v31 = vpack.c.bf16 %v1764_v25, %v1764_v25  ;;  %v3003_v32 = vpack.c.bf16 %v1828_v26, %v1828_v26  ;;  %v1765_v33 = vmax.f32 %v1275_v27, 0.0  ;;  %v1829_v34 = vmax.f32 %v1531_v28, 0.0  ;;  %1486 = vmatmul.mubr.bf16.gmra.mrb[120].mxu0 %v3303_v19  ;;  %1742 = vmatmul.mubr.bf16.gmra.mrb[120].mxu1 %v3304_v20 }
 0x137   : > { %2769 = vmatprep.mubr.msk.bf16.mxu0 %vm1013_vm0, %v3305_v23  ;;  %2801 = vmatprep.mubr.msk.bf16.mxu1 %vm1013_vm0, %v3307_v24 }
 0x138   : > { %2405 = vst.msk [vmem:[%s3621_s4 + $0x18] sm:$0xf] %vm2398_vm3, %v2939_v31  ;;  %2469 = vst.msk [vmem:[%s3621_s4 + $0x118] sm:$0xf] %vm2398_vm3, %v3003_v32  ;;  %v2940_v35 = vpack.c.bf16 %v1765_v33, %v1765_v33  ;;  %v3004_v36 = vpack.c.bf16 %v1829_v34, %v1829_v34 }
 0x139   : > { %v1279_v37 = vpop.f32.mrb[16].mxu0  ;;  %v1535_v38 = vpop.f32.mrb[16].mxu1 }
 0x13a   : > { %2406 = vst.msk [vmem:[%s3621_s4 + $0x1c] sm:$0xf] %vm2398_vm3, %v2940_v35  ;;  %2470 = vst.msk [vmem:[%s3621_s4 + $0x11c] sm:$0xf] %vm2398_vm3, %v3004_v36  ;;  %v1280_v39 = vadd.f32 %v3605_v3, %v1279_v37  ;;  %v1536_v40 = vadd.f32 %v3605_v3, %v1535_v38  ;;  %v1281_v41 = vpop.f32.mrb[17].mxu0  ;;  %v1537_v42 = vpop.f32.mrb[17].mxu1 }
 0x13b   : > { %v1282_v45 = vpop.f32.mrb[18].mxu0  ;;  %v1538_v46 = vpop.f32.mrb[18].mxu1 }
 0x13c   : > { %v1766_v47 = vmax.f32 %v1280_v39, 0.0  ;;  %v1830_v48 = vmax.f32 %v1536_v40, 0.0  ;;  %v1283_v49 = vadd.f32 %v3605_v3, %v1282_v45  ;;  %v1539_v50 = vadd.f32 %v3605_v3, %v1538_v46  ;;  %v1284_v51 = vpop.f32.mrb[19].mxu0  ;;  %v1540_v52 = vpop.f32.mrb[19].mxu1 }
 0x13e   : > { %v2941_v53 = vpack.c.bf16 %v1766_v47, %v1766_v47  ;;  %v3005_v54 = vpack.c.bf16 %v1830_v48, %v1830_v48  ;;  %v1767_v55 = vmax.f32 %v1283_v49, 0.0  ;;  %v1831_v56 = vmax.f32 %v1539_v50, 0.0  ;;  %1494 = vmatmul.mubr.bf16.gmra.mrb[124].mxu0 %v3309_v43  ;;  %1750 = vmatmul.mubr.bf16.gmra.mrb[124].mxu1 %v3310_v44 }
 0x140   : > { %2407 = vst.msk [vmem:[%s3621_s4 + $0x20] sm:$0xf] %vm2398_vm3, %v2941_v53  ;;  %2471 = vst.msk [vmem:[%s3621_s4 + $0x120] sm:$0xf] %vm2398_vm3, %v3005_v54  ;;  %v2942_v57 = vpack.c.bf16 %v1767_v55, %v1767_v55  ;;  %v3006_v58 = vpack.c.bf16 %v1831_v56, %v1831_v56 }
 0x141   : > { %v1287_v59 = vpop.f32.mrb[20].mxu0  ;;  %v1543_v60 = vpop.f32.mrb[20].mxu1 }
 0x142   : > { %2408 = vst.msk [vmem:[%s3621_s4 + $0x24] sm:$0xf] %vm2398_vm3, %v2942_v57  ;;  %2472 = vst.msk [vmem:[%s3621_s4 + $0x124] sm:$0xf] %vm2398_vm3, %v3006_v58  ;;  %v1288_v61 = vadd.f32 %v3605_v3, %v1287_v59  ;;  %v1544_v62 = vadd.f32 %v3605_v3, %v1543_v60  ;;  %v1289_v63 = vpop.f32.mrb[21].mxu0  ;;  %v1545_v0 = vpop.f32.mrb[21].mxu1 }
 0x143   : > { %v1290_v1 = vpop.f32.mrb[22].mxu0  ;;  %v1546_v2 = vpop.f32.mrb[22].mxu1 }
 0x144   : > { %v1768_v4 = vmax.f32 %v1288_v61, 0.0  ;;  %v1832_v5 = vmax.f32 %v1544_v62, 0.0  ;;  %v1291_v6 = vadd.f32 %v3605_v3, %v1290_v1  ;;  %v1547_v7 = vadd.f32 %v3605_v3, %v1546_v2  ;;  %v1292_v8 = vpop.f32.mrb[23].mxu0  ;;  %v1548_v9 = vpop.f32.mrb[23].mxu1 }
 0x146   : > { %v2943_v10 = vpack.c.bf16 %v1768_v4, %v1768_v4  ;;  %v3007_v11 = vpack.c.bf16 %v1832_v5, %v1832_v5  ;;  %v1769_v12 = vmax.f32 %v1291_v6, 0.0  ;;  %v1833_v13 = vmax.f32 %v1547_v7, 0.0 }
 0x148   : > { %2409 = vst.msk [vmem:[%s3621_s4 + $0x28] sm:$0xf] %vm2398_vm3, %v2943_v10  ;;  %2473 = vst.msk [vmem:[%s3621_s4 + $0x128] sm:$0xf] %vm2398_vm3, %v3007_v11  ;;  %v2944_v14 = vpack.c.bf16 %v1769_v12, %v1769_v12  ;;  %v3008_v15 = vpack.c.bf16 %v1833_v13, %v1833_v13 }
 0x149   : > { %v1295_v16 = vpop.f32.mrb[24].mxu0  ;;  %v1551_v17 = vpop.f32.mrb[24].mxu1 }
 0x14a   : > { %2410 = vst.msk [vmem:[%s3621_s4 + $0x2c] sm:$0xf] %vm2398_vm3, %v2944_v14  ;;  %2474 = vst.msk [vmem:[%s3621_s4 + $0x12c] sm:$0xf] %vm2398_vm3, %v3008_v15  ;;  %v1296_v18 = vadd.f32 %v3605_v3, %v1295_v16  ;;  %v1552_v19 = vadd.f32 %v3605_v3, %v1551_v17  ;;  %v1297_v20 = vpop.f32.mrb[25].mxu0  ;;  %v1553_v21 = vpop.f32.mrb[25].mxu1 }
 0x14b   : > { %v1298_v22 = vpop.f32.mrb[26].mxu0  ;;  %v1554_v23 = vpop.f32.mrb[26].mxu1 }
 0x14c   : > { %v1770_v24 = vmax.f32 %v1296_v18, 0.0  ;;  %v1834_v25 = vmax.f32 %v1552_v19, 0.0  ;;  %v1299_v26 = vadd.f32 %v3605_v3, %v1298_v22  ;;  %v1555_v27 = vadd.f32 %v3605_v3, %v1554_v23  ;;  %v1300_v28 = vpop.f32.mrb[27].mxu0  ;;  %v1556_v29 = vpop.f32.mrb[27].mxu1 }
 0x14e   : > { %v2945_v30 = vpack.c.bf16 %v1770_v24, %v1770_v24  ;;  %v3009_v31 = vpack.c.bf16 %v1834_v25, %v1834_v25  ;;  %v1771_v32 = vmax.f32 %v1299_v26, 0.0  ;;  %v1835_v33 = vmax.f32 %v1555_v27, 0.0 }
 0x150   : > { %2411 = vst.msk [vmem:[%s3621_s4 + $0x30] sm:$0xf] %vm2398_vm3, %v2945_v30  ;;  %2475 = vst.msk [vmem:[%s3621_s4 + $0x130] sm:$0xf] %vm2398_vm3, %v3009_v31  ;;  %v2946_v34 = vpack.c.bf16 %v1771_v32, %v1771_v32  ;;  %v3010_v35 = vpack.c.bf16 %v1835_v33, %v1835_v33 }
 0x151   : > { %v1303_v36 = vpop.f32.mrb[28].mxu0  ;;  %v1559_v37 = vpop.f32.mrb[28].mxu1 }
 0x152   : > { %2412 = vst.msk [vmem:[%s3621_s4 + $0x34] sm:$0xf] %vm2398_vm3, %v2946_v34  ;;  %2476 = vst.msk [vmem:[%s3621_s4 + $0x134] sm:$0xf] %vm2398_vm3, %v3010_v35  ;;  %v1304_v38 = vadd.f32 %v3605_v3, %v1303_v36  ;;  %v1560_v39 = vadd.f32 %v3605_v3, %v1559_v37  ;;  %v1305_v40 = vpop.f32.mrb[29].mxu0  ;;  %v1561_v41 = vpop.f32.mrb[29].mxu1 }
 0x153   : > { %v1306_v42 = vpop.f32.mrb[30].mxu0  ;;  %v1562_v43 = vpop.f32.mrb[30].mxu1 }
 0x154   : > { %v1772_v44 = vmax.f32 %v1304_v38, 0.0  ;;  %v1836_v45 = vmax.f32 %v1560_v39, 0.0  ;;  %v1307_v46 = vadd.f32 %v3605_v3, %v1306_v42  ;;  %v1563_v47 = vadd.f32 %v3605_v3, %v1562_v43  ;;  %v1308_v48 = vpop.f32.mrb[31].mxu0  ;;  %v1564_v49 = vpop.f32.mrb[31].mxu1 }
 0x156   : > { %v2947_v50 = vpack.c.bf16 %v1772_v44, %v1772_v44  ;;  %v3011_v51 = vpack.c.bf16 %v1836_v45, %v1836_v45  ;;  %v1773_v52 = vmax.f32 %v1307_v46, 0.0  ;;  %v1837_v53 = vmax.f32 %v1563_v47, 0.0 }
 0x158   : > { %2413 = vst.msk [vmem:[%s3621_s4 + $0x38] sm:$0xf] %vm2398_vm3, %v2947_v50  ;;  %2477 = vst.msk [vmem:[%s3621_s4 + $0x138] sm:$0xf] %vm2398_vm3, %v3011_v51  ;;  %v2948_v54 = vpack.c.bf16 %v1773_v52, %v1773_v52  ;;  %v3012_v55 = vpack.c.bf16 %v1837_v53, %v1837_v53 }
 0x159   : > { %v1311_v56 = vpop.f32.mrb[32].mxu0  ;;  %v1567_v57 = vpop.f32.mrb[32].mxu1 }
 0x15a   : > { %2414 = vst.msk [vmem:[%s3621_s4 + $0x3c] sm:$0xf] %vm2398_vm3, %v2948_v54  ;;  %2478 = vst.msk [vmem:[%s3621_s4 + $0x13c] sm:$0xf] %vm2398_vm3, %v3012_v55  ;;  %v1312_v58 = vadd.f32 %v3605_v3, %v1311_v56  ;;  %v1568_v59 = vadd.f32 %v3605_v3, %v1567_v57  ;;  %v1313_v60 = vpop.f32.mrb[33].mxu0  ;;  %v1569_v61 = vpop.f32.mrb[33].mxu1 }
 0x15b   : > { %v1314_v62 = vpop.f32.mrb[34].mxu0  ;;  %v1570_v63 = vpop.f32.mrb[34].mxu1 }
 0x15c   : > { %v1774_v0 = vmax.f32 %v1312_v58, 0.0  ;;  %v1838_v1 = vmax.f32 %v1568_v59, 0.0  ;;  %v1315_v2 = vadd.f32 %v3605_v3, %v1314_v62  ;;  %v1571_v4 = vadd.f32 %v3605_v3, %v1570_v63  ;;  %v1316_v5 = vpop.f32.mrb[35].mxu0  ;;  %v1572_v6 = vpop.f32.mrb[35].mxu1 }
 0x15e   : > { %v2949_v7 = vpack.c.bf16 %v1774_v0, %v1774_v0  ;;  %v3013_v8 = vpack.c.bf16 %v1838_v1, %v1838_v1  ;;  %v1775_v9 = vmax.f32 %v1315_v2, 0.0  ;;  %v1839_v10 = vmax.f32 %v1571_v4, 0.0 }
 0x160   : > { %2415 = vst.msk [vmem:[%s3621_s4 + $0x40] sm:$0xf] %vm2398_vm3, %v2949_v7  ;;  %2479 = vst.msk [vmem:[%s3621_s4 + $0x140] sm:$0xf] %vm2398_vm3, %v3013_v8  ;;  %v2950_v11 = vpack.c.bf16 %v1775_v9, %v1775_v9  ;;  %v3014_v12 = vpack.c.bf16 %v1839_v10, %v1839_v10 }
 0x161   : > { %v1319_v13 = vpop.f32.mrb[36].mxu0  ;;  %v1575_v14 = vpop.f32.mrb[36].mxu1 }
 0x162   : > { %2416 = vst.msk [vmem:[%s3621_s4 + $0x44] sm:$0xf] %vm2398_vm3, %v2950_v11  ;;  %2480 = vst.msk [vmem:[%s3621_s4 + $0x144] sm:$0xf] %vm2398_vm3, %v3014_v12  ;;  %v1320_v15 = vadd.f32 %v3605_v3, %v1319_v13  ;;  %v1576_v16 = vadd.f32 %v3605_v3, %v1575_v14  ;;  %v1321_v17 = vpop.f32.mrb[37].mxu0  ;;  %v1577_v18 = vpop.f32.mrb[37].mxu1 }
 0x163   : > { %v1322_v19 = vpop.f32.mrb[38].mxu0  ;;  %v1578_v20 = vpop.f32.mrb[38].mxu1 }
 0x164   : > { %v1776_v21 = vmax.f32 %v1320_v15, 0.0  ;;  %v1840_v22 = vmax.f32 %v1576_v16, 0.0  ;;  %v1323_v23 = vadd.f32 %v3605_v3, %v1322_v19  ;;  %v1579_v24 = vadd.f32 %v3605_v3, %v1578_v20  ;;  %v1324_v25 = vpop.f32.mrb[39].mxu0  ;;  %v1580_v26 = vpop.f32.mrb[39].mxu1 }
 0x166   : > { %v2951_v27 = vpack.c.bf16 %v1776_v21, %v1776_v21  ;;  %v3015_v28 = vpack.c.bf16 %v1840_v22, %v1840_v22  ;;  %v1777_v29 = vmax.f32 %v1323_v23, 0.0  ;;  %v1841_v30 = vmax.f32 %v1579_v24, 0.0 }
 0x168   : > { %2417 = vst.msk [vmem:[%s3621_s4 + $0x48] sm:$0xf] %vm2398_vm3, %v2951_v27  ;;  %2481 = vst.msk [vmem:[%s3621_s4 + $0x148] sm:$0xf] %vm2398_vm3, %v3015_v28  ;;  %v2952_v31 = vpack.c.bf16 %v1777_v29, %v1777_v29  ;;  %v3016_v32 = vpack.c.bf16 %v1841_v30, %v1841_v30 }
 0x169   : > { %v1327_v33 = vpop.f32.mrb[40].mxu0  ;;  %v1583_v34 = vpop.f32.mrb[40].mxu1 }
 0x16a   : > { %2418 = vst.msk [vmem:[%s3621_s4 + $0x4c] sm:$0xf] %vm2398_vm3, %v2952_v31  ;;  %2482 = vst.msk [vmem:[%s3621_s4 + $0x14c] sm:$0xf] %vm2398_vm3, %v3016_v32  ;;  %v1328_v35 = vadd.f32 %v3605_v3, %v1327_v33  ;;  %v1584_v36 = vadd.f32 %v3605_v3, %v1583_v34  ;;  %v1329_v37 = vpop.f32.mrb[41].mxu0  ;;  %v1585_v38 = vpop.f32.mrb[41].mxu1 }
 0x16b   : > { %v1330_v39 = vpop.f32.mrb[42].mxu0  ;;  %v1586_v40 = vpop.f32.mrb[42].mxu1 }
 0x16c   : > { %v1778_v41 = vmax.f32 %v1328_v35, 0.0  ;;  %v1842_v42 = vmax.f32 %v1584_v36, 0.0  ;;  %v1331_v43 = vadd.f32 %v3605_v3, %v1330_v39  ;;  %v1587_v44 = vadd.f32 %v3605_v3, %v1586_v40  ;;  %v1332_v45 = vpop.f32.mrb[43].mxu0  ;;  %v1588_v46 = vpop.f32.mrb[43].mxu1 }
 0x16e   : > { %v2953_v47 = vpack.c.bf16 %v1778_v41, %v1778_v41  ;;  %v3017_v48 = vpack.c.bf16 %v1842_v42, %v1842_v42  ;;  %v1779_v49 = vmax.f32 %v1331_v43, 0.0  ;;  %v1843_v50 = vmax.f32 %v1587_v44, 0.0 }
 0x170   : > { %2419 = vst.msk [vmem:[%s3621_s4 + $0x50] sm:$0xf] %vm2398_vm3, %v2953_v47  ;;  %2483 = vst.msk [vmem:[%s3621_s4 + $0x150] sm:$0xf] %vm2398_vm3, %v3017_v48  ;;  %v2954_v51 = vpack.c.bf16 %v1779_v49, %v1779_v49  ;;  %v3018_v52 = vpack.c.bf16 %v1843_v50, %v1843_v50 }
 0x171   : > { %v1335_v53 = vpop.f32.mrb[44].mxu0  ;;  %v1591_v54 = vpop.f32.mrb[44].mxu1 }
 0x172   : > { %2420 = vst.msk [vmem:[%s3621_s4 + $0x54] sm:$0xf] %vm2398_vm3, %v2954_v51  ;;  %2484 = vst.msk [vmem:[%s3621_s4 + $0x154] sm:$0xf] %vm2398_vm3, %v3018_v52  ;;  %v1336_v55 = vadd.f32 %v3605_v3, %v1335_v53  ;;  %v1592_v56 = vadd.f32 %v3605_v3, %v1591_v54  ;;  %v1337_v57 = vpop.f32.mrb[45].mxu0  ;;  %v1593_v58 = vpop.f32.mrb[45].mxu1 }
 0x173   : > { %v1338_v59 = vpop.f32.mrb[46].mxu0  ;;  %v1594_v60 = vpop.f32.mrb[46].mxu1 }
 0x174   : > { %v1780_v61 = vmax.f32 %v1336_v55, 0.0  ;;  %v1844_v62 = vmax.f32 %v1592_v56, 0.0  ;;  %v1339_v63 = vadd.f32 %v3605_v3, %v1338_v59  ;;  %v1595_v0 = vadd.f32 %v3605_v3, %v1594_v60  ;;  %v1340_v1 = vpop.f32.mrb[47].mxu0  ;;  %v1596_v2 = vpop.f32.mrb[47].mxu1 }
 0x176   : > { %v2955_v4 = vpack.c.bf16 %v1780_v61, %v1780_v61  ;;  %v3019_v5 = vpack.c.bf16 %v1844_v62, %v1844_v62  ;;  %v1781_v6 = vmax.f32 %v1339_v63, 0.0  ;;  %v1845_v7 = vmax.f32 %v1595_v0, 0.0 }
 0x178   : > { %2421 = vst.msk [vmem:[%s3621_s4 + $0x58] sm:$0xf] %vm2398_vm3, %v2955_v4  ;;  %2485 = vst.msk [vmem:[%s3621_s4 + $0x158] sm:$0xf] %vm2398_vm3, %v3019_v5  ;;  %v2956_v8 = vpack.c.bf16 %v1781_v6, %v1781_v6  ;;  %v3020_v9 = vpack.c.bf16 %v1845_v7, %v1845_v7 }
 0x179   : > { %v1343_v10 = vpop.f32.mrb[48].mxu0  ;;  %v1599_v11 = vpop.f32.mrb[48].mxu1 }
 0x17a   : > { %2422 = vst.msk [vmem:[%s3621_s4 + $0x5c] sm:$0xf] %vm2398_vm3, %v2956_v8  ;;  %2486 = vst.msk [vmem:[%s3621_s4 + $0x15c] sm:$0xf] %vm2398_vm3, %v3020_v9  ;;  %v1344_v12 = vadd.f32 %v3605_v3, %v1343_v10  ;;  %v1600_v13 = vadd.f32 %v3605_v3, %v1599_v11  ;;  %v1345_v14 = vpop.f32.mrb[49].mxu0  ;;  %v1601_v15 = vpop.f32.mrb[49].mxu1 }
 0x17b   : > { %v1346_v16 = vpop.f32.mrb[50].mxu0  ;;  %v1602_v17 = vpop.f32.mrb[50].mxu1 }
 0x17c   : > { %v1782_v18 = vmax.f32 %v1344_v12, 0.0  ;;  %v1846_v19 = vmax.f32 %v1600_v13, 0.0  ;;  %v1347_v20 = vadd.f32 %v3605_v3, %v1346_v16  ;;  %v1603_v21 = vadd.f32 %v3605_v3, %v1602_v17  ;;  %v1348_v22 = vpop.f32.mrb[51].mxu0  ;;  %v1604_v23 = vpop.f32.mrb[51].mxu1 }
 0x17e   : > { %v2957_v24 = vpack.c.bf16 %v1782_v18, %v1782_v18  ;;  %v3021_v25 = vpack.c.bf16 %v1846_v19, %v1846_v19  ;;  %v1783_v26 = vmax.f32 %v1347_v20, 0.0  ;;  %v1847_v27 = vmax.f32 %v1603_v21, 0.0 }
 0x180   : > { %2423 = vst.msk [vmem:[%s3621_s4 + $0x60] sm:$0xf] %vm2398_vm3, %v2957_v24  ;;  %2487 = vst.msk [vmem:[%s3621_s4 + $0x160] sm:$0xf] %vm2398_vm3, %v3021_v25  ;;  %v2958_v28 = vpack.c.bf16 %v1783_v26, %v1783_v26  ;;  %v3022_v29 = vpack.c.bf16 %v1847_v27, %v1847_v27 }
 0x181   : > { %v1351_v30 = vpop.f32.mrb[52].mxu0  ;;  %v1607_v31 = vpop.f32.mrb[52].mxu1 }
 0x182   : > { %2424 = vst.msk [vmem:[%s3621_s4 + $0x64] sm:$0xf] %vm2398_vm3, %v2958_v28  ;;  %2488 = vst.msk [vmem:[%s3621_s4 + $0x164] sm:$0xf] %vm2398_vm3, %v3022_v29  ;;  %v1352_v32 = vadd.f32 %v3605_v3, %v1351_v30  ;;  %v1608_v33 = vadd.f32 %v3605_v3, %v1607_v31  ;;  %v1353_v34 = vpop.f32.mrb[53].mxu0  ;;  %v1609_v35 = vpop.f32.mrb[53].mxu1 }
 0x183   : > { %v1354_v36 = vpop.f32.mrb[54].mxu0  ;;  %v1610_v37 = vpop.f32.mrb[54].mxu1 }
 0x184   : > { %v1784_v38 = vmax.f32 %v1352_v32, 0.0  ;;  %v1848_v39 = vmax.f32 %v1608_v33, 0.0  ;;  %v1355_v40 = vadd.f32 %v3605_v3, %v1354_v36  ;;  %v1611_v41 = vadd.f32 %v3605_v3, %v1610_v37  ;;  %v1356_v42 = vpop.f32.mrb[55].mxu0  ;;  %v1612_v43 = vpop.f32.mrb[55].mxu1 }
 0x186   : > { %v2959_v44 = vpack.c.bf16 %v1784_v38, %v1784_v38  ;;  %v3023_v45 = vpack.c.bf16 %v1848_v39, %v1848_v39  ;;  %v1785_v46 = vmax.f32 %v1355_v40, 0.0  ;;  %v1849_v47 = vmax.f32 %v1611_v41, 0.0 }
 0x188   : > { %2425 = vst.msk [vmem:[%s3621_s4 + $0x68] sm:$0xf] %vm2398_vm3, %v2959_v44  ;;  %2489 = vst.msk [vmem:[%s3621_s4 + $0x168] sm:$0xf] %vm2398_vm3, %v3023_v45  ;;  %v2960_v48 = vpack.c.bf16 %v1785_v46, %v1785_v46  ;;  %v3024_v49 = vpack.c.bf16 %v1849_v47, %v1849_v47 }
 0x189   : > { %v1359_v50 = vpop.f32.mrb[56].mxu0  ;;  %v1615_v51 = vpop.f32.mrb[56].mxu1 }
 0x18a   : > { %2426 = vst.msk [vmem:[%s3621_s4 + $0x6c] sm:$0xf] %vm2398_vm3, %v2960_v48  ;;  %2490 = vst.msk [vmem:[%s3621_s4 + $0x16c] sm:$0xf] %vm2398_vm3, %v3024_v49  ;;  %v1360_v52 = vadd.f32 %v3605_v3, %v1359_v50  ;;  %v1616_v53 = vadd.f32 %v3605_v3, %v1615_v51  ;;  %v1361_v54 = vpop.f32.mrb[57].mxu0  ;;  %v1617_v55 = vpop.f32.mrb[57].mxu1 }
 0x18b   : > { %v1362_v56 = vpop.f32.mrb[58].mxu0  ;;  %v1618_v57 = vpop.f32.mrb[58].mxu1 }
 0x18c   : > { %v1786_v58 = vmax.f32 %v1360_v52, 0.0  ;;  %v1850_v59 = vmax.f32 %v1616_v53, 0.0  ;;  %v1363_v60 = vadd.f32 %v3605_v3, %v1362_v56  ;;  %v1619_v61 = vadd.f32 %v3605_v3, %v1618_v57  ;;  %v1364_v62 = vpop.f32.mrb[59].mxu0  ;;  %v1620_v63 = vpop.f32.mrb[59].mxu1 }
 0x18e   : > { %v2961_v0 = vpack.c.bf16 %v1786_v58, %v1786_v58  ;;  %v3025_v1 = vpack.c.bf16 %v1850_v59, %v1850_v59  ;;  %v1787_v2 = vmax.f32 %v1363_v60, 0.0  ;;  %v1851_v4 = vmax.f32 %v1619_v61, 0.0 }
 0x190   : > { %2427 = vst.msk [vmem:[%s3621_s4 + $0x70] sm:$0xf] %vm2398_vm3, %v2961_v0  ;;  %2491 = vst.msk [vmem:[%s3621_s4 + $0x170] sm:$0xf] %vm2398_vm3, %v3025_v1  ;;  %v2962_v5 = vpack.c.bf16 %v1787_v2, %v1787_v2  ;;  %v3026_v6 = vpack.c.bf16 %v1851_v4, %v1851_v4 }
 0x191   : > { %v1367_v7 = vpop.f32.mrb[60].mxu0  ;;  %v1623_v8 = vpop.f32.mrb[60].mxu1 }
 0x192   : > { %2428 = vst.msk [vmem:[%s3621_s4 + $0x74] sm:$0xf] %vm2398_vm3, %v2962_v5  ;;  %2492 = vst.msk [vmem:[%s3621_s4 + $0x174] sm:$0xf] %vm2398_vm3, %v3026_v6  ;;  %v1368_v9 = vadd.f32 %v3605_v3, %v1367_v7  ;;  %v1624_v10 = vadd.f32 %v3605_v3, %v1623_v8  ;;  %v1369_v11 = vpop.f32.mrb[61].mxu0  ;;  %v1625_v12 = vpop.f32.mrb[61].mxu1 }
 0x193   : > { %v1370_v13 = vpop.f32.mrb[62].mxu0  ;;  %v1626_v14 = vpop.f32.mrb[62].mxu1 }
 0x194   : > { %v1788_v15 = vmax.f32 %v1368_v9, 0.0  ;;  %v1852_v16 = vmax.f32 %v1624_v10, 0.0  ;;  %v1371_v17 = vadd.f32 %v3605_v3, %v1370_v13  ;;  %v1627_v18 = vadd.f32 %v3605_v3, %v1626_v14  ;;  %v1372_v19 = vpop.f32.mrb[63].mxu0  ;;  %v1628_v20 = vpop.f32.mrb[63].mxu1 }
 0x196   : > { %v2963_v21 = vpack.c.bf16 %v1788_v15, %v1788_v15  ;;  %v3027_v22 = vpack.c.bf16 %v1852_v16, %v1852_v16  ;;  %v1789_v23 = vmax.f32 %v1371_v17, 0.0  ;;  %v1853_v24 = vmax.f32 %v1627_v18, 0.0 }
 0x198   : > { %2429 = vst.msk [vmem:[%s3621_s4 + $0x78] sm:$0xf] %vm2398_vm3, %v2963_v21  ;;  %2493 = vst.msk [vmem:[%s3621_s4 + $0x178] sm:$0xf] %vm2398_vm3, %v3027_v22  ;;  %v2964_v25 = vpack.c.bf16 %v1789_v23, %v1789_v23  ;;  %v3028_v26 = vpack.c.bf16 %v1853_v24, %v1853_v24 }
 0x199   : > { %v1375_v27 = vpop.f32.mrb[64].mxu0  ;;  %v1631_v28 = vpop.f32.mrb[64].mxu1 }
 0x19a   : > { %2430 = vst.msk [vmem:[%s3621_s4 + $0x7c] sm:$0xf] %vm2398_vm3, %v2964_v25  ;;  %2494 = vst.msk [vmem:[%s3621_s4 + $0x17c] sm:$0xf] %vm2398_vm3, %v3028_v26  ;;  %v1376_v29 = vadd.f32 %v3605_v3, %v1375_v27  ;;  %v1632_v30 = vadd.f32 %v3605_v3, %v1631_v28  ;;  %v1377_v31 = vpop.f32.mrb[65].mxu0  ;;  %v1633_v32 = vpop.f32.mrb[65].mxu1 }
 0x19b   : > { %v1378_v33 = vpop.f32.mrb[66].mxu0  ;;  %v1634_v34 = vpop.f32.mrb[66].mxu1 }
 0x19c   : > { %v1790_v35 = vmax.f32 %v1376_v29, 0.0  ;;  %v1854_v36 = vmax.f32 %v1632_v30, 0.0  ;;  %v1379_v37 = vadd.f32 %v3605_v3, %v1378_v33  ;;  %v1635_v38 = vadd.f32 %v3605_v3, %v1634_v34  ;;  %v1380_v39 = vpop.f32.mrb[67].mxu0  ;;  %v1636_v40 = vpop.f32.mrb[67].mxu1 }
 0x19e   : > { %v2965_v41 = vpack.c.bf16 %v1790_v35, %v1790_v35  ;;  %v3029_v42 = vpack.c.bf16 %v1854_v36, %v1854_v36  ;;  %v1791_v43 = vmax.f32 %v1379_v37, 0.0  ;;  %v1855_v44 = vmax.f32 %v1635_v38, 0.0 }
 0x1a0   : > { %2431 = vst.msk [vmem:[%s3621_s4 + $0x80] sm:$0xf] %vm2398_vm3, %v2965_v41  ;;  %2495 = vst.msk [vmem:[%s3621_s4 + $0x180] sm:$0xf] %vm2398_vm3, %v3029_v42  ;;  %v2966_v45 = vpack.c.bf16 %v1791_v43, %v1791_v43  ;;  %v3030_v46 = vpack.c.bf16 %v1855_v44, %v1855_v44 }
 0x1a1   : > { %v1383_v47 = vpop.f32.mrb[68].mxu0  ;;  %v1639_v48 = vpop.f32.mrb[68].mxu1 }
 0x1a2   : > { %2432 = vst.msk [vmem:[%s3621_s4 + $0x84] sm:$0xf] %vm2398_vm3, %v2966_v45  ;;  %2496 = vst.msk [vmem:[%s3621_s4 + $0x184] sm:$0xf] %vm2398_vm3, %v3030_v46  ;;  %v1384_v49 = vadd.f32 %v3605_v3, %v1383_v47  ;;  %v1640_v50 = vadd.f32 %v3605_v3, %v1639_v48  ;;  %v1385_v51 = vpop.f32.mrb[69].mxu0  ;;  %v1641_v52 = vpop.f32.mrb[69].mxu1 }
 0x1a3   : > { %v1386_v53 = vpop.f32.mrb[70].mxu0  ;;  %v1642_v54 = vpop.f32.mrb[70].mxu1 }
 0x1a4   : > { %v1792_v55 = vmax.f32 %v1384_v49, 0.0  ;;  %v1856_v56 = vmax.f32 %v1640_v50, 0.0  ;;  %v1387_v57 = vadd.f32 %v3605_v3, %v1386_v53  ;;  %v1643_v58 = vadd.f32 %v3605_v3, %v1642_v54  ;;  %v1388_v59 = vpop.f32.mrb[71].mxu0  ;;  %v1644_v60 = vpop.f32.mrb[71].mxu1 }
 0x1a6   : > { %v2967_v61 = vpack.c.bf16 %v1792_v55, %v1792_v55  ;;  %v3031_v62 = vpack.c.bf16 %v1856_v56, %v1856_v56  ;;  %v1793_v63 = vmax.f32 %v1387_v57, 0.0  ;;  %v1857_v0 = vmax.f32 %v1643_v58, 0.0 }
 0x1a8   : > { %2433 = vst.msk [vmem:[%s3621_s4 + $0x88] sm:$0xf] %vm2398_vm3, %v2967_v61  ;;  %2497 = vst.msk [vmem:[%s3621_s4 + $0x188] sm:$0xf] %vm2398_vm3, %v3031_v62  ;;  %v2968_v1 = vpack.c.bf16 %v1793_v63, %v1793_v63  ;;  %v3032_v2 = vpack.c.bf16 %v1857_v0, %v1857_v0 }
 0x1a9   : > { %v1391_v4 = vpop.f32.mrb[72].mxu0  ;;  %v1647_v5 = vpop.f32.mrb[72].mxu1 }
 0x1aa   : > { %2434 = vst.msk [vmem:[%s3621_s4 + $0x8c] sm:$0xf] %vm2398_vm3, %v2968_v1  ;;  %2498 = vst.msk [vmem:[%s3621_s4 + $0x18c] sm:$0xf] %vm2398_vm3, %v3032_v2  ;;  %v1392_v6 = vadd.f32 %v3605_v3, %v1391_v4  ;;  %v1648_v7 = vadd.f32 %v3605_v3, %v1647_v5  ;;  %v1393_v8 = vpop.f32.mrb[73].mxu0  ;;  %v1649_v9 = vpop.f32.mrb[73].mxu1 }
 0x1ab   : > { %v1394_v10 = vpop.f32.mrb[74].mxu0  ;;  %v1650_v11 = vpop.f32.mrb[74].mxu1 }
 0x1ac   : > { %v1794_v12 = vmax.f32 %v1392_v6, 0.0  ;;  %v1858_v13 = vmax.f32 %v1648_v7, 0.0  ;;  %v1395_v14 = vadd.f32 %v3605_v3, %v1394_v10  ;;  %v1651_v15 = vadd.f32 %v3605_v3, %v1650_v11  ;;  %v1396_v16 = vpop.f32.mrb[75].mxu0  ;;  %v1652_v17 = vpop.f32.mrb[75].mxu1 }
 0x1ae   : > { %v2969_v18 = vpack.c.bf16 %v1794_v12, %v1794_v12  ;;  %v3033_v19 = vpack.c.bf16 %v1858_v13, %v1858_v13  ;;  %v1795_v20 = vmax.f32 %v1395_v14, 0.0  ;;  %v1859_v21 = vmax.f32 %v1651_v15, 0.0 }
 0x1b0   : > { %2435 = vst.msk [vmem:[%s3621_s4 + $0x90] sm:$0xf] %vm2398_vm3, %v2969_v18  ;;  %2499 = vst.msk [vmem:[%s3621_s4 + $0x190] sm:$0xf] %vm2398_vm3, %v3033_v19  ;;  %v2970_v22 = vpack.c.bf16 %v1795_v20, %v1795_v20  ;;  %v3034_v23 = vpack.c.bf16 %v1859_v21, %v1859_v21 }
 0x1b1   : > { %v1399_v24 = vpop.f32.mrb[76].mxu0  ;;  %v1655_v25 = vpop.f32.mrb[76].mxu1 }
 0x1b2   : > { %2436 = vst.msk [vmem:[%s3621_s4 + $0x94] sm:$0xf] %vm2398_vm3, %v2970_v22  ;;  %2500 = vst.msk [vmem:[%s3621_s4 + $0x194] sm:$0xf] %vm2398_vm3, %v3034_v23  ;;  %v1400_v26 = vadd.f32 %v3605_v3, %v1399_v24  ;;  %v1656_v27 = vadd.f32 %v3605_v3, %v1655_v25  ;;  %v1401_v28 = vpop.f32.mrb[77].mxu0  ;;  %v1657_v29 = vpop.f32.mrb[77].mxu1 }
 0x1b3   : > { %v1402_v30 = vpop.f32.mrb[78].mxu0  ;;  %v1658_v31 = vpop.f32.mrb[78].mxu1 }
 0x1b4   : > { %v1796_v32 = vmax.f32 %v1400_v26, 0.0  ;;  %v1860_v33 = vmax.f32 %v1656_v27, 0.0  ;;  %v1403_v34 = vadd.f32 %v3605_v3, %v1402_v30  ;;  %v1659_v35 = vadd.f32 %v3605_v3, %v1658_v31  ;;  %v1404_v36 = vpop.f32.mrb[79].mxu0  ;;  %v1660_v37 = vpop.f32.mrb[79].mxu1  ;;  %v3884_v3 = vld [vmem:[%s4035_s2] ss:$0 sm:$0xff] }
 0x1b6   : > { %v2971_v38 = vpack.c.bf16 %v1796_v32, %v1796_v32  ;;  %v3035_v39 = vpack.c.bf16 %v1860_v33, %v1860_v33  ;;  %v1797_v40 = vmax.f32 %v1403_v34, 0.0  ;;  %v1861_v41 = vmax.f32 %v1659_v35, 0.0 }
 0x1b8   : > { %2437 = vst.msk [vmem:[%s3621_s4 + $0x98] sm:$0xf] %vm2398_vm3, %v2971_v38  ;;  %2501 = vst.msk [vmem:[%s3621_s4 + $0x198] sm:$0xf] %vm2398_vm3, %v3035_v39  ;;  %v2972_v42 = vpack.c.bf16 %v1797_v40, %v1797_v40  ;;  %v3036_v43 = vpack.c.bf16 %v1861_v41, %v1861_v41 }
 0x1b9   : > { %v1407_v44 = vpop.f32.mrb[80].mxu0  ;;  %v1663_v45 = vpop.f32.mrb[80].mxu1 }
 0x1ba   : > { %2438 = vst.msk [vmem:[%s3621_s4 + $0x9c] sm:$0xf] %vm2398_vm3, %v2972_v42  ;;  %2502 = vst.msk [vmem:[%s3621_s4 + $0x19c] sm:$0xf] %vm2398_vm3, %v3036_v43  ;;  %v1408_v46 = vadd.f32 %v3884_v3, %v1407_v44  ;;  %v1664_v47 = vadd.f32 %v3884_v3, %v1663_v45  ;;  %v1409_v48 = vpop.f32.mrb[81].mxu0  ;;  %v1665_v49 = vpop.f32.mrb[81].mxu1 }
 0x1bb   : > { %v1410_v50 = vpop.f32.mrb[82].mxu0  ;;  %v1666_v51 = vpop.f32.mrb[82].mxu1 }
 0x1bc   : > { %v1798_v52 = vmax.f32 %v1408_v46, 0.0  ;;  %v1862_v53 = vmax.f32 %v1664_v47, 0.0  ;;  %v1411_v54 = vadd.f32 %v3884_v3, %v1410_v50  ;;  %v1667_v55 = vadd.f32 %v3884_v3, %v1666_v51  ;;  %v1412_v56 = vpop.f32.mrb[83].mxu0  ;;  %v1668_v57 = vpop.f32.mrb[83].mxu1 }
 0x1be   : > { %v2973_v58 = vpack.c.bf16 %v1798_v52, %v1798_v52  ;;  %v3037_v59 = vpack.c.bf16 %v1862_v53, %v1862_v53  ;;  %v1799_v60 = vmax.f32 %v1411_v54, 0.0  ;;  %v1863_v61 = vmax.f32 %v1667_v55, 0.0 }
 0x1c0   : > { %2439 = vst.msk [vmem:[%s3621_s4 + $0xa0] sm:$0xf] %vm2398_vm3, %v2973_v58  ;;  %2503 = vst.msk [vmem:[%s3621_s4 + $0x1a0] sm:$0xf] %vm2398_vm3, %v3037_v59  ;;  %v2974_v62 = vpack.c.bf16 %v1799_v60, %v1799_v60  ;;  %v3038_v63 = vpack.c.bf16 %v1863_v61, %v1863_v61 }
 0x1c1   : > { %v1415_v0 = vpop.f32.mrb[84].mxu0  ;;  %v1671_v1 = vpop.f32.mrb[84].mxu1 }
 0x1c2   : > { %2440 = vst.msk [vmem:[%s3621_s4 + $0xa4] sm:$0xf] %vm2398_vm3, %v2974_v62  ;;  %2504 = vst.msk [vmem:[%s3621_s4 + $0x1a4] sm:$0xf] %vm2398_vm3, %v3038_v63  ;;  %v1416_v2 = vadd.f32 %v3884_v3, %v1415_v0  ;;  %v1672_v4 = vadd.f32 %v3884_v3, %v1671_v1  ;;  %v1417_v5 = vpop.f32.mrb[85].mxu0  ;;  %v1673_v6 = vpop.f32.mrb[85].mxu1 }
 0x1c3   : > { %v1418_v7 = vpop.f32.mrb[86].mxu0  ;;  %v1674_v8 = vpop.f32.mrb[86].mxu1 }
 0x1c4   : > { %v1800_v9 = vmax.f32 %v1416_v2, 0.0  ;;  %v1864_v10 = vmax.f32 %v1672_v4, 0.0  ;;  %v1419_v11 = vadd.f32 %v3884_v3, %v1418_v7  ;;  %v1675_v12 = vadd.f32 %v3884_v3, %v1674_v8  ;;  %v1420_v13 = vpop.f32.mrb[87].mxu0  ;;  %v1676_v14 = vpop.f32.mrb[87].mxu1 }
 0x1c6   : > { %v2975_v15 = vpack.c.bf16 %v1800_v9, %v1800_v9  ;;  %v3039_v16 = vpack.c.bf16 %v1864_v10, %v1864_v10  ;;  %v1801_v17 = vmax.f32 %v1419_v11, 0.0  ;;  %v1865_v18 = vmax.f32 %v1675_v12, 0.0 }
 0x1c8   : > { %2441 = vst.msk [vmem:[%s3621_s4 + $0xa8] sm:$0xf] %vm2398_vm3, %v2975_v15  ;;  %2505 = vst.msk [vmem:[%s3621_s4 + $0x1a8] sm:$0xf] %vm2398_vm3, %v3039_v16  ;;  %v2976_v19 = vpack.c.bf16 %v1801_v17, %v1801_v17  ;;  %v3040_v20 = vpack.c.bf16 %v1865_v18, %v1865_v18 }
 0x1c9   : > { %v1423_v21 = vpop.f32.mrb[88].mxu0  ;;  %v1679_v22 = vpop.f32.mrb[88].mxu1 }
 0x1ca   : > { %2442 = vst.msk [vmem:[%s3621_s4 + $0xac] sm:$0xf] %vm2398_vm3, %v2976_v19  ;;  %2506 = vst.msk [vmem:[%s3621_s4 + $0x1ac] sm:$0xf] %vm2398_vm3, %v3040_v20  ;;  %v1424_v23 = vadd.f32 %v3884_v3, %v1423_v21  ;;  %v1680_v24 = vadd.f32 %v3884_v3, %v1679_v22  ;;  %v1425_v25 = vpop.f32.mrb[89].mxu0  ;;  %v1681_v26 = vpop.f32.mrb[89].mxu1 }
 0x1cb   : > { %v1426_v27 = vpop.f32.mrb[90].mxu0  ;;  %v1682_v28 = vpop.f32.mrb[90].mxu1 }
 0x1cc   : > { %v1802_v29 = vmax.f32 %v1424_v23, 0.0  ;;  %v1866_v30 = vmax.f32 %v1680_v24, 0.0  ;;  %v1427_v31 = vadd.f32 %v3884_v3, %v1426_v27  ;;  %v1683_v32 = vadd.f32 %v3884_v3, %v1682_v28  ;;  %v1428_v33 = vpop.f32.mrb[91].mxu0  ;;  %v1684_v34 = vpop.f32.mrb[91].mxu1 }
 0x1ce   : > { %v2977_v35 = vpack.c.bf16 %v1802_v29, %v1802_v29  ;;  %v3041_v36 = vpack.c.bf16 %v1866_v30, %v1866_v30  ;;  %v1803_v37 = vmax.f32 %v1427_v31, 0.0  ;;  %v1867_v38 = vmax.f32 %v1683_v32, 0.0 }
 0x1d0   : > { %2443 = vst.msk [vmem:[%s3621_s4 + $0xb0] sm:$0xf] %vm2398_vm3, %v2977_v35  ;;  %2507 = vst.msk [vmem:[%s3621_s4 + $0x1b0] sm:$0xf] %vm2398_vm3, %v3041_v36  ;;  %v2978_v39 = vpack.c.bf16 %v1803_v37, %v1803_v37  ;;  %v3042_v40 = vpack.c.bf16 %v1867_v38, %v1867_v38 }
 0x1d1   : > { %v1431_v41 = vpop.f32.mrb[92].mxu0  ;;  %v1687_v42 = vpop.f32.mrb[92].mxu1 }
 0x1d2   : > { %2444 = vst.msk [vmem:[%s3621_s4 + $0xb4] sm:$0xf] %vm2398_vm3, %v2978_v39  ;;  %2508 = vst.msk [vmem:[%s3621_s4 + $0x1b4] sm:$0xf] %vm2398_vm3, %v3042_v40  ;;  %v1432_v43 = vadd.f32 %v3884_v3, %v1431_v41  ;;  %v1688_v44 = vadd.f32 %v3884_v3, %v1687_v42  ;;  %v1433_v45 = vpop.f32.mrb[93].mxu0  ;;  %v1689_v46 = vpop.f32.mrb[93].mxu1 }
 0x1d3   : > { %v1434_v47 = vpop.f32.mrb[94].mxu0  ;;  %v1690_v48 = vpop.f32.mrb[94].mxu1 }
 0x1d4   : > { %v1804_v49 = vmax.f32 %v1432_v43, 0.0  ;;  %v1868_v50 = vmax.f32 %v1688_v44, 0.0  ;;  %v1435_v51 = vadd.f32 %v3884_v3, %v1434_v47  ;;  %v1691_v52 = vadd.f32 %v3884_v3, %v1690_v48  ;;  %v1436_v53 = vpop.f32.mrb[95].mxu0  ;;  %v1692_v54 = vpop.f32.mrb[95].mxu1 }
 0x1d6   : > { %v2979_v55 = vpack.c.bf16 %v1804_v49, %v1804_v49  ;;  %v3043_v56 = vpack.c.bf16 %v1868_v50, %v1868_v50  ;;  %v1805_v57 = vmax.f32 %v1435_v51, 0.0  ;;  %v1869_v58 = vmax.f32 %v1691_v52, 0.0 }
 0x1d8   : > { %2445 = vst.msk [vmem:[%s3621_s4 + $0xb8] sm:$0xf] %vm2398_vm3, %v2979_v55  ;;  %2509 = vst.msk [vmem:[%s3621_s4 + $0x1b8] sm:$0xf] %vm2398_vm3, %v3043_v56  ;;  %v2980_v59 = vpack.c.bf16 %v1805_v57, %v1805_v57  ;;  %v3044_v60 = vpack.c.bf16 %v1869_v58, %v1869_v58 }
 0x1d9   : > { %v1439_v61 = vpop.f32.mrb[96].mxu0  ;;  %v1695_v62 = vpop.f32.mrb[96].mxu1 }
 0x1da   : > { %2446 = vst.msk [vmem:[%s3621_s4 + $0xbc] sm:$0xf] %vm2398_vm3, %v2980_v59  ;;  %2510 = vst.msk [vmem:[%s3621_s4 + $0x1bc] sm:$0xf] %vm2398_vm3, %v3044_v60  ;;  %v1440_v63 = vadd.f32 %v3884_v3, %v1439_v61  ;;  %v1696_v0 = vadd.f32 %v3884_v3, %v1695_v62  ;;  %v1441_v1 = vpop.f32.mrb[97].mxu0  ;;  %v1697_v2 = vpop.f32.mrb[97].mxu1 }
 0x1db   : > { %v1442_v4 = vpop.f32.mrb[98].mxu0  ;;  %v1698_v5 = vpop.f32.mrb[98].mxu1 }
 0x1dc   : > { %v1806_v6 = vmax.f32 %v1440_v63, 0.0  ;;  %v1870_v7 = vmax.f32 %v1696_v0, 0.0  ;;  %v1443_v8 = vadd.f32 %v3884_v3, %v1442_v4  ;;  %v1699_v9 = vadd.f32 %v3884_v3, %v1698_v5  ;;  %v1444_v10 = vpop.f32.mrb[99].mxu0  ;;  %v1700_v11 = vpop.f32.mrb[99].mxu1 }
 0x1de   : > { %v2981_v12 = vpack.c.bf16 %v1806_v6, %v1806_v6  ;;  %v3045_v13 = vpack.c.bf16 %v1870_v7, %v1870_v7  ;;  %v1807_v14 = vmax.f32 %v1443_v8, 0.0  ;;  %v1871_v15 = vmax.f32 %v1699_v9, 0.0 }
 0x1e0   : > { %2447 = vst.msk [vmem:[%s3621_s4 + $0xc0] sm:$0xf] %vm2398_vm3, %v2981_v12  ;;  %2511 = vst.msk [vmem:[%s3621_s4 + $0x1c0] sm:$0xf] %vm2398_vm3, %v3045_v13  ;;  %v2982_v16 = vpack.c.bf16 %v1807_v14, %v1807_v14  ;;  %v3046_v17 = vpack.c.bf16 %v1871_v15, %v1871_v15 }
 0x1e1   : > { %v1447_v18 = vpop.f32.mrb[100].mxu0  ;;  %v1703_v19 = vpop.f32.mrb[100].mxu1 }
 0x1e2   : > { %2448 = vst.msk [vmem:[%s3621_s4 + $0xc4] sm:$0xf] %vm2398_vm3, %v2982_v16  ;;  %2512 = vst.msk [vmem:[%s3621_s4 + $0x1c4] sm:$0xf] %vm2398_vm3, %v3046_v17  ;;  %v1448_v20 = vadd.f32 %v3884_v3, %v1447_v18  ;;  %v1704_v21 = vadd.f32 %v3884_v3, %v1703_v19  ;;  %v1449_v22 = vpop.f32.mrb[101].mxu0  ;;  %v1705_v23 = vpop.f32.mrb[101].mxu1 }
 0x1e3   : > { %v1450_v24 = vpop.f32.mrb[102].mxu0  ;;  %v1706_v25 = vpop.f32.mrb[102].mxu1 }
 0x1e4   : > { %v1808_v26 = vmax.f32 %v1448_v20, 0.0  ;;  %v1872_v27 = vmax.f32 %v1704_v21, 0.0  ;;  %v1451_v28 = vadd.f32 %v3884_v3, %v1450_v24  ;;  %v1707_v29 = vadd.f32 %v3884_v3, %v1706_v25  ;;  %v1452_v30 = vpop.f32.mrb[103].mxu0  ;;  %v1708_v31 = vpop.f32.mrb[103].mxu1 }
 0x1e6   : > { %v2983_v32 = vpack.c.bf16 %v1808_v26, %v1808_v26  ;;  %v3047_v33 = vpack.c.bf16 %v1872_v27, %v1872_v27  ;;  %v1809_v34 = vmax.f32 %v1451_v28, 0.0  ;;  %v1873_v35 = vmax.f32 %v1707_v29, 0.0 }
 0x1e8   : > { %2449 = vst.msk [vmem:[%s3621_s4 + $0xc8] sm:$0xf] %vm2398_vm3, %v2983_v32  ;;  %2513 = vst.msk [vmem:[%s3621_s4 + $0x1c8] sm:$0xf] %vm2398_vm3, %v3047_v33  ;;  %v2984_v36 = vpack.c.bf16 %v1809_v34, %v1809_v34  ;;  %v3048_v37 = vpack.c.bf16 %v1873_v35, %v1873_v35 }
 0x1e9   : > { %v1455_v38 = vpop.f32.mrb[104].mxu0  ;;  %v1711_v39 = vpop.f32.mrb[104].mxu1 }
 0x1ea   : > { %2450 = vst.msk [vmem:[%s3621_s4 + $0xcc] sm:$0xf] %vm2398_vm3, %v2984_v36  ;;  %2514 = vst.msk [vmem:[%s3621_s4 + $0x1cc] sm:$0xf] %vm2398_vm3, %v3048_v37  ;;  %v1456_v40 = vadd.f32 %v3884_v3, %v1455_v38  ;;  %v1712_v41 = vadd.f32 %v3884_v3, %v1711_v39  ;;  %v1457_v42 = vpop.f32.mrb[105].mxu0  ;;  %v1713_v43 = vpop.f32.mrb[105].mxu1 }
 0x1eb   : > { %v1458_v44 = vpop.f32.mrb[106].mxu0  ;;  %v1714_v45 = vpop.f32.mrb[106].mxu1 }
 0x1ec   : > { %v1810_v46 = vmax.f32 %v1456_v40, 0.0  ;;  %v1874_v47 = vmax.f32 %v1712_v41, 0.0  ;;  %v1459_v48 = vadd.f32 %v3884_v3, %v1458_v44  ;;  %v1715_v49 = vadd.f32 %v3884_v3, %v1714_v45  ;;  %v1460_v50 = vpop.f32.mrb[107].mxu0  ;;  %v1716_v51 = vpop.f32.mrb[107].mxu1 }
 0x1ee   : > { %v2985_v52 = vpack.c.bf16 %v1810_v46, %v1810_v46  ;;  %v3049_v53 = vpack.c.bf16 %v1874_v47, %v1874_v47  ;;  %v1811_v54 = vmax.f32 %v1459_v48, 0.0  ;;  %v1875_v55 = vmax.f32 %v1715_v49, 0.0 }
 0x1f0   : > { %2451 = vst.msk [vmem:[%s3621_s4 + $0xd0] sm:$0xf] %vm2398_vm3, %v2985_v52  ;;  %2515 = vst.msk [vmem:[%s3621_s4 + $0x1d0] sm:$0xf] %vm2398_vm3, %v3049_v53  ;;  %v2986_v56 = vpack.c.bf16 %v1811_v54, %v1811_v54  ;;  %v3050_v57 = vpack.c.bf16 %v1875_v55, %v1875_v55 }
 0x1f1   : > { %v1463_v58 = vpop.f32.mrb[108].mxu0  ;;  %v1719_v59 = vpop.f32.mrb[108].mxu1 }
 0x1f2   : > { %2452 = vst.msk [vmem:[%s3621_s4 + $0xd4] sm:$0xf] %vm2398_vm3, %v2986_v56  ;;  %2516 = vst.msk [vmem:[%s3621_s4 + $0x1d4] sm:$0xf] %vm2398_vm3, %v3050_v57  ;;  %v1464_v60 = vadd.f32 %v3884_v3, %v1463_v58  ;;  %v1720_v61 = vadd.f32 %v3884_v3, %v1719_v59  ;;  %v1465_v62 = vpop.f32.mrb[109].mxu0  ;;  %v1721_v63 = vpop.f32.mrb[109].mxu1 }
 0x1f3   : > { %v1466_v0 = vpop.f32.mrb[110].mxu0  ;;  %v1722_v1 = vpop.f32.mrb[110].mxu1 }
 0x1f4   : > { %v1812_v2 = vmax.f32 %v1464_v60, 0.0  ;;  %v1876_v4 = vmax.f32 %v1720_v61, 0.0  ;;  %v1467_v5 = vadd.f32 %v3884_v3, %v1466_v0  ;;  %v1723_v6 = vadd.f32 %v3884_v3, %v1722_v1  ;;  %v1468_v7 = vpop.f32.mrb[111].mxu0  ;;  %v1724_v8 = vpop.f32.mrb[111].mxu1 }
 0x1f6   : > { %v2987_v9 = vpack.c.bf16 %v1812_v2, %v1812_v2  ;;  %v3051_v10 = vpack.c.bf16 %v1876_v4, %v1876_v4  ;;  %v1813_v11 = vmax.f32 %v1467_v5, 0.0  ;;  %v1877_v12 = vmax.f32 %v1723_v6, 0.0 }
 0x1f8   : > { %2453 = vst.msk [vmem:[%s3621_s4 + $0xd8] sm:$0xf] %vm2398_vm3, %v2987_v9  ;;  %2517 = vst.msk [vmem:[%s3621_s4 + $0x1d8] sm:$0xf] %vm2398_vm3, %v3051_v10  ;;  %v2988_v13 = vpack.c.bf16 %v1813_v11, %v1813_v11  ;;  %v3052_v14 = vpack.c.bf16 %v1877_v12, %v1877_v12 }
 0x1f9   : > { %v1471_v15 = vpop.f32.mrb[112].mxu0  ;;  %v1727_v16 = vpop.f32.mrb[112].mxu1 }
 0x1fa   : > { %2454 = vst.msk [vmem:[%s3621_s4 + $0xdc] sm:$0xf] %vm2398_vm3, %v2988_v13  ;;  %2518 = vst.msk [vmem:[%s3621_s4 + $0x1dc] sm:$0xf] %vm2398_vm3, %v3052_v14  ;;  %v1472_v17 = vadd.f32 %v3884_v3, %v1471_v15  ;;  %v1728_v18 = vadd.f32 %v3884_v3, %v1727_v16  ;;  %v1473_v19 = vpop.f32.mrb[113].mxu0  ;;  %v1729_v20 = vpop.f32.mrb[113].mxu1 }
 0x1fb   : > { %v1474_v21 = vpop.f32.mrb[114].mxu0  ;;  %v1730_v22 = vpop.f32.mrb[114].mxu1 }
 0x1fc   : > { %v1814_v23 = vmax.f32 %v1472_v17, 0.0  ;;  %v1878_v24 = vmax.f32 %v1728_v18, 0.0  ;;  %v1475_v25 = vadd.f32 %v3884_v3, %v1474_v21  ;;  %v1731_v26 = vadd.f32 %v3884_v3, %v1730_v22  ;;  %v1476_v27 = vpop.f32.mrb[115].mxu0  ;;  %v1732_v28 = vpop.f32.mrb[115].mxu1 }
 0x1fe   : > { %v2989_v29 = vpack.c.bf16 %v1814_v23, %v1814_v23  ;;  %v3053_v30 = vpack.c.bf16 %v1878_v24, %v1878_v24  ;;  %v1815_v31 = vmax.f32 %v1475_v25, 0.0  ;;  %v1879_v32 = vmax.f32 %v1731_v26, 0.0 }
 0x200   : > { %2455 = vst.msk [vmem:[%s3621_s4 + $0xe0] sm:$0xf] %vm2398_vm3, %v2989_v29  ;;  %2519 = vst.msk [vmem:[%s3621_s4 + $0x1e0] sm:$0xf] %vm2398_vm3, %v3053_v30  ;;  %v2990_v33 = vpack.c.bf16 %v1815_v31, %v1815_v31  ;;  %v3054_v34 = vpack.c.bf16 %v1879_v32, %v1879_v32 }
 0x201   : > { %v1479_v35 = vpop.f32.mrb[116].mxu0  ;;  %v1735_v36 = vpop.f32.mrb[116].mxu1 }
 0x202   : > { %2456 = vst.msk [vmem:[%s3621_s4 + $0xe4] sm:$0xf] %vm2398_vm3, %v2990_v33  ;;  %2520 = vst.msk [vmem:[%s3621_s4 + $0x1e4] sm:$0xf] %vm2398_vm3, %v3054_v34  ;;  %v1480_v37 = vadd.f32 %v3884_v3, %v1479_v35  ;;  %v1736_v38 = vadd.f32 %v3884_v3, %v1735_v36  ;;  %v1481_v39 = vpop.f32.mrb[117].mxu0  ;;  %v1737_v40 = vpop.f32.mrb[117].mxu1 }
 0x203   : > { %v1482_v41 = vpop.f32.mrb[118].mxu0  ;;  %v1738_v42 = vpop.f32.mrb[118].mxu1 }
 0x204   : > { %v1816_v43 = vmax.f32 %v1480_v37, 0.0  ;;  %v1880_v44 = vmax.f32 %v1736_v38, 0.0  ;;  %v1483_v45 = vadd.f32 %v3884_v3, %v1482_v41  ;;  %v1739_v46 = vadd.f32 %v3884_v3, %v1738_v42  ;;  %v1484_v47 = vpop.f32.mrb[119].mxu0  ;;  %v1740_v48 = vpop.f32.mrb[119].mxu1 }
 0x206   : > { %v2991_v49 = vpack.c.bf16 %v1816_v43, %v1816_v43  ;;  %v3055_v50 = vpack.c.bf16 %v1880_v44, %v1880_v44  ;;  %v1817_v51 = vmax.f32 %v1483_v45, 0.0  ;;  %v1881_v52 = vmax.f32 %v1739_v46, 0.0 }
 0x208   : > { %2457 = vst.msk [vmem:[%s3621_s4 + $0xe8] sm:$0xf] %vm2398_vm3, %v2991_v49  ;;  %2521 = vst.msk [vmem:[%s3621_s4 + $0x1e8] sm:$0xf] %vm2398_vm3, %v3055_v50  ;;  %v2992_v53 = vpack.c.bf16 %v1817_v51, %v1817_v51  ;;  %v3056_v54 = vpack.c.bf16 %v1881_v52, %v1881_v52 }
 0x209   : > { %v1487_v55 = vpop.f32.mrb[120].mxu0  ;;  %v1743_v56 = vpop.f32.mrb[120].mxu1 }
 0x20a   : > { %2458 = vst.msk [vmem:[%s3621_s4 + $0xec] sm:$0xf] %vm2398_vm3, %v2992_v53  ;;  %2522 = vst.msk [vmem:[%s3621_s4 + $0x1ec] sm:$0xf] %vm2398_vm3, %v3056_v54  ;;  %v1488_v57 = vadd.f32 %v3884_v3, %v1487_v55  ;;  %v1744_v58 = vadd.f32 %v3884_v3, %v1743_v56  ;;  %v1489_v59 = vpop.f32.mrb[121].mxu0  ;;  %v1745_v60 = vpop.f32.mrb[121].mxu1 }
 0x20b   : > { %v1490_v61 = vpop.f32.mrb[122].mxu0  ;;  %v1746_v62 = vpop.f32.mrb[122].mxu1 }
 0x20c   : > { %v1818_v63 = vmax.f32 %v1488_v57, 0.0  ;;  %v1882_v0 = vmax.f32 %v1744_v58, 0.0  ;;  %v1491_v1 = vadd.f32 %v3884_v3, %v1490_v61  ;;  %v1747_v2 = vadd.f32 %v3884_v3, %v1746_v62  ;;  %v1492_v4 = vpop.f32.mrb[123].mxu0  ;;  %v1748_v5 = vpop.f32.mrb[123].mxu1 }
 0x20e   : > { %v2993_v6 = vpack.c.bf16 %v1818_v63, %v1818_v63  ;;  %v3057_v7 = vpack.c.bf16 %v1882_v0, %v1882_v0  ;;  %v1819_v8 = vmax.f32 %v1491_v1, 0.0  ;;  %v1883_v9 = vmax.f32 %v1747_v2, 0.0 }
 0x210   : > { %2459 = vst.msk [vmem:[%s3621_s4 + $0xf0] sm:$0xf] %vm2398_vm3, %v2993_v6  ;;  %2523 = vst.msk [vmem:[%s3621_s4 + $0x1f0] sm:$0xf] %vm2398_vm3, %v3057_v7  ;;  %v2994_v10 = vpack.c.bf16 %v1819_v8, %v1819_v8  ;;  %v3058_v11 = vpack.c.bf16 %v1883_v9, %v1883_v9 }
 0x211   : > { %v1495_v12 = vpop.f32.mrb[124].mxu0  ;;  %v1751_v13 = vpop.f32.mrb[124].mxu1 }
 0x212   : > { %2460 = vst.msk [vmem:[%s3621_s4 + $0xf4] sm:$0xf] %vm2398_vm3, %v2994_v10  ;;  %2524 = vst.msk [vmem:[%s3621_s4 + $0x1f4] sm:$0xf] %vm2398_vm3, %v3058_v11  ;;  %v1496_v14 = vadd.f32 %v3884_v3, %v1495_v12  ;;  %v1752_v15 = vadd.f32 %v3884_v3, %v1751_v13  ;;  %v1497_v16 = vpop.f32.mrb[125].mxu0  ;;  %v1753_v17 = vpop.f32.mrb[125].mxu1 }
 0x213   : > { %v1498_v18 = vpop.f32.mrb[126].mxu0  ;;  %v1754_v19 = vpop.f32.mrb[126].mxu1 }
 0x214   : > { %v1820_v20 = vmax.f32 %v1496_v14, 0.0  ;;  %v1884_v21 = vmax.f32 %v1752_v15, 0.0  ;;  %v1499_v22 = vadd.f32 %v3884_v3, %v1498_v18  ;;  %v1755_v23 = vadd.f32 %v3884_v3, %v1754_v19  ;;  %v1500_v24 = vpop.f32.mrb[127].mxu0  ;;  %v1756_v25 = vpop.f32.mrb[127].mxu1 }
 0x216   : > { %v2995_v26 = vpack.c.bf16 %v1820_v20, %v1820_v20  ;;  %v3059_v27 = vpack.c.bf16 %v1884_v21, %v1884_v21  ;;  %v1821_v28 = vmax.f32 %v1499_v22, 0.0  ;;  %v1885_v29 = vmax.f32 %v1755_v23, 0.0 }
 0x218   : > { %2461 = vst.msk [vmem:[%s3621_s4 + $0xf8] sm:$0xf] %vm2398_vm3, %v2995_v26  ;;  %2525 = vst.msk [vmem:[%s3621_s4 + $0x1f8] sm:$0xf] %vm2398_vm3, %v3059_v27  ;;  %v2996_v30 = vpack.c.bf16 %v1821_v28, %v1821_v28  ;;  %v3060_v31 = vpack.c.bf16 %v1885_v29, %v1885_v29 }
 0x21a   : > { %2462 = vst.msk [vmem:[%s3621_s4 + $0xfc] sm:$0xf] %vm2398_vm3, %v2996_v30  ;;  %2526 = vst.msk [vmem:[%s3621_s4 + $0x1fc] sm:$0xf] %vm2398_vm3, %v3060_v31 }
 0x21b PF: > { %s13_s12 = sadd.s32 1, %s3318_s12  }
 0x21c   : > { %p10_p4 = scmp.ge.s32.totalorder %s13_s12, 4  }
 0x21e   :  { %12 = sbr.rel (!%p10_p4) target bundleno = 1 (0x1), region = 62 }

// kernel: attention_forward.5
= control target key start
LH: loop header
LB: loop body
LE: loop exit
PB: predicated region body
PF: predicated region fallthrough
CT: control target
= control target key end

     0   :  { %s3122_s12 = smov 0   ;;  %s3742_s0 = inlined_call_operand.vmem [shape: bf16[512,800], index: 0, kind: input, shape index: {}]   ;;  %s3743_s1 = inlined_call_operand.vmem [shape: bf16[800,24], index: 1, kind: input, shape index: {}]   ;;  %s3744_s2 = inlined_call_operand.vmem [shape: f32[1,24], index: 2, kind: input, shape index: {}]   ;;  %s3745_s3 = inlined_call_operand.vmem [shape: bf16[512,24], index: 3, kind: output, shape index: {}]  }
   0x1 LB: > { %s2215_s13 = sadd.s32 4294967295, %s3100_s12   ;;  %p2219_p0 = scmp.ge.s32.totalorder %s3100_s12, 1  ;;  %s3100_s12 = sphi %s3122_s12, %s13_s12  }
   0x2   : > { %p139_p1 = scmp.lt.s32.totalorder %s3100_s12, 3 }
   0x4   : > { %p140_p2 = pnand %p2219_p0, %p139_p1 }
   0x5   : > { %v2884_v0 = vld [vmem:[%s3743_s1 + $0x40] sm:$0xff] (!%p140_p2)   ;;  %s2220_s16 = sshll.u32 (!%p140_p2), %s2215_s13, 5  ;;  %v2886_v2 = vld [vmem:[%s3743_s1 + $0x48] sm:$0xff] (!%p140_p2)   ;;  %v2888_v4 = vld [vmem:[%s3743_s1 + $0x50] sm:$0xff] (!%p140_p2)   ;;  %vm1273_vm0 = vcmask (!%p140_p2), 261120   ;;  %vm2126_vm1 = vcmask (!%p140_p2), 191488  }
   0x6   : > { %143 = sbr.rel (%p140_p2) target bundleno = 480 (0x1e0), region = 32  ;;  %v2885_v1 = vld [vmem:[%s3743_s1] sm:$0xff] (!%p140_p2)   ;;  %2469 = vmatprep.subr.bf16.mxu0 (!%p140_p2), %v2884_v0  ;;  %2859 = vmatprep.subr.bf16.mxu1 (!%p140_p2), %v2884_v0  ;;  %p165_p3 = scmp.lt.s32.totalorder (!%p140_p2), %s2220_s16, 63  ;;  %v2887_v3 = vld [vmem:[%s3743_s1 + $0x8] sm:$0xff] (!%p140_p2)   ;;  %v2889_v5 = vld [vmem:[%s3743_s1 + $0x10] sm:$0xff] (!%p140_p2)  }
   0x7   : > { %2470 = vmatpush3.bf16.msra.mxu0 (!%p140_p2), %v2885_v1  ;;  %2867 = vmatpush3.bf16.msra.mxu1 (!%p140_p2), %v2885_v1  ;;  %v2890_v6 = vld [vmem:[%s3743_s1 + $0x58] sm:$0xff] (!%p140_p2)   ;;  %v2892_v8 = vld [vmem:[%s3743_s1 + $0x60] sm:$0xff] (!%p140_p2)   ;;  %v2894_v10 = vld [vmem:[%s3743_s1 + $0x68] sm:$0xff] (!%p140_p2)  }
   0x8   : > { %2471 = vmatprep.subr.bf16.mxu0 (!%p140_p2), %v2886_v2  ;;  %2860 = vmatprep.subr.bf16.mxu1 (!%p140_p2), %v2886_v2  ;;  %v2891_v7 = vld [vmem:[%s3743_s1 + $0x18] sm:$0xff] (!%p140_p2)   ;;  %v2893_v9 = vld [vmem:[%s3743_s1 + $0x20] sm:$0xff] (!%p140_p2)   ;;  %v2895_v13 = vld [vmem:[%s3743_s1 + $0x28] sm:$0xff] (!%p140_p2)  }
   0x9   : > { %v2896_v14 = vld [vmem:[%s3743_s1 + $0x70] sm:$0xff] (!%p140_p2)   ;;  %v2898_v16 = vld [vmem:[%s3743_s1 + $0x78] sm:$0xff] (!%p140_p2)   ;;  %v2906_v18 = vld [vmem:[%s3743_s1 + $0xc0] sm:$0xff] (!%p140_p2)  }
   0xa   : > { %v2897_v15 = vld [vmem:[%s3743_s1 + $0x30] sm:$0xff] (!%p140_p2)   ;;  %v2899_v17 = vld [vmem:[%s3743_s1 + $0x38] sm:$0xff] (!%p140_p2)   ;;  %v2907_v21 = vld [vmem:[%s3743_s1 + $0x140] sm:$0xff] (!%p140_p2)  }
   0xb   : > { %2472 = vmatpush3.bf16.msra.mxu0 (!%p140_p2), %v2887_v3  ;;  %2868 = vmatpush3.bf16.msra.mxu1 (!%p140_p2), %v2887_v3  ;;  %v2908_v22 = vld [vmem:[%s3743_s1 + $0x80] sm:$0xff] (!%p140_p2)   ;;  %v2910_v24 = vld [vmem:[%s3743_s1 + $0xc8] sm:$0xff] (!%p140_p2)   ;;  %v2918_v32 = vld [vmem:[%s3743_s1 + $0xd0] sm:$0xff] (!%p140_p2)  }
   0xc   : > { %2473 = vmatprep.subr.bf16.mxu0 (!%p140_p2), %v2888_v4  ;;  %2861 = vmatprep.subr.bf16.mxu1 (!%p140_p2), %v2888_v4  ;;  %v2909_v23 = vld [vmem:[%s3743_s1 + $0x100] sm:$0xff] (!%p140_p2)   ;;  %v2921_v27 = vld [vmem:[%s3743_s1 + $0x148] sm:$0xff] (!%p140_p2)   ;;  %v2919_v33 = vld [vmem:[%s3743_s1 + $0x90] sm:$0xff] (!%p140_p2)  }
   0xd   : > { %s3747_s16 = smov (!%p165_p3, %s2220_s16), 63  ;;  %v2911_v28 = vld [vmem:[%s3743_s1 + $0x88] sm:$0xff]   ;;  %v2920_v34 = vld [vmem:[%s3743_s1 + $0xd8] sm:$0xff]   ;;  %v2930_v38 = vld [vmem:[%s3743_s1 + $0xe0] sm:$0xff]  }
   0xe   : > { %s2875_s29 = smul.u32 28, %s3747_s16  ;;  %v2923_v29 = vld [vmem:[%s3743_s1 + $0x108] sm:$0xff]   ;;  %v2922_v37 = vld [vmem:[%s3743_s1 + $0x98] sm:$0xff]   ;;  %v2941_v41 = vld [vmem:[%s3743_s1 + $0x150] sm:$0xff]   ;;  %s2223_s23 = sshll.u32 %s3747_s16, 2 }
   0xf   : > { %2474 = vmatpush3.bf16.msra.mxu0 %v2889_v5  ;;  %2869 = vmatpush3.bf16.msra.mxu1 %v2889_v5  ;;  %v2931_v42 = vld [vmem:[%s3743_s1 + $0xa0] sm:$0xff]   ;;  %v2932_v43 = vld [vmem:[%s3743_s1 + $0xe8] sm:$0xff]   ;;  %v2943_v44 = vld [vmem:[%s3743_s1 + $0x110] sm:$0xff]   ;;  %s3626_s26 = scalar_lea.vmem %s3745_s3, %s2223_s23 }
  0x10   : > { %2475 = vmatprep.subr.bf16.mxu0 %v2890_v6  ;;  %2862 = vmatprep.subr.bf16.mxu1 %v2890_v6  ;;  %s3163_s9 = scalar_lea.vmem %s3742_s0, %s2875_s29  ;;  %v2933_v47 = vld [vmem:[%s3743_s1 + $0xa8] sm:$0xff]   ;;  %v2940_v48 = vld [vmem:[%s3743_s1 + $0xf0] sm:$0xff]   ;;  %v2952_v51 = vld [vmem:[%s3743_s1 + $0x158] sm:$0xff]  }
  0x11   : > { %v2902_v11 = vld [vmem:[%s3163_s9 + $0x4] ss:$28 sps:$4 sm:$0xff]   ;;  %v2912_v25 = vld [vmem:[%s3163_s9 + $0x3c] ss:$28 sps:$4 sm:$0xff]   ;;  %v2924_v35 = vld [vmem:[%s3163_s9 + $0x74] ss:$28 sps:$4 sm:$0xff]  }
  0x12   : > { %v2905_v12 = vld [vmem:[%s3163_s9 + $0x2a4] ss:$28 sps:$4 sm:$0xff]   ;;  %1354 = vmatprep.mubr.bf16.mxu0 %v2902_v11  ;;  %v2914_v26 = vld [vmem:[%s3163_s9 + $0x2dc] ss:$28 sps:$4 sm:$0xff]   ;;  %v2926_v36 = vld [vmem:[%s3163_s9 + $0x314] ss:$28 sps:$4 sm:$0xff]  }
  0x13   : > { %2476 = vmatpush3.bf16.msra.mxu0 %v2891_v7  ;;  %2870 = vmatpush3.bf16.msra.mxu1 %v2891_v7  ;;  %v2900_v19 = vld [vmem:[%s3163_s9] ss:$28 sps:$4 sm:$0xff]   ;;  %v2916_v30 = vld [vmem:[%s3163_s9 + $0x38] ss:$28 sps:$4 sm:$0xff]   ;;  %v2928_v39 = vld [vmem:[%s3163_s9 + $0x70] ss:$28 sps:$4 sm:$0xff]  }
  0x14   : > { %2477 = vmatprep.subr.bf16.mxu0 %v2892_v8  ;;  %2863 = vmatprep.subr.bf16.mxu1 %v2892_v8  ;;  %v2903_v20 = vld [vmem:[%s3163_s9 + $0x2a0] ss:$28 sps:$4 sm:$0xff]   ;;  %v2917_v31 = vld [vmem:[%s3163_s9 + $0x2d8] ss:$28 sps:$4 sm:$0xff]   ;;  %v2929_v40 = vld [vmem:[%s3163_s9 + $0x310] ss:$28 sps:$4 sm:$0xff]  }
  0x15   : > { %1450 = vmatprep.mubr.bf16.mxu1 %v2905_v12  ;;  %v2934_v45 = vld [vmem:[%s3163_s9 + $0xac] ss:$28 sps:$4 sm:$0xff]   ;;  %v2942_v52 = vld [vmem:[%s3743_s1 + $0xb0] sm:$0xff]   ;;  %v2954_v53 = vld [vmem:[%s3743_s1 + $0x118] sm:$0xff]  }
  0x16   : > { %v2936_v46 = vld [vmem:[%s3163_s9 + $0x34c] ss:$28 sps:$4 sm:$0xff]   ;;  %v2946_v54 = vld [vmem:[%s3163_s9 + $0xe4] ss:$28 sps:$4 sm:$0xff]   ;;  %v2944_v55 = vld [vmem:[%s3743_s1 + $0xf8] sm:$0xff]  }
  0x17   : > { %2478 = vmatpush3.bf16.msra.mxu0 %v2893_v9  ;;  %2871 = vmatpush3.bf16.msra.mxu1 %v2893_v9  ;;  %v2938_v49 = vld [vmem:[%s3163_s9 + $0xa8] ss:$28 sps:$4 sm:$0xff]   ;;  %v2945_v57 = vld [vmem:[%s3743_s1 + $0xb8] sm:$0xff]   ;;  %v2961_v5 = vld [vmem:[%s3163_s9 + $0x154] ss:$28 sps:$4 sm:$0xff]  }
  0x18   : > { %2479 = vmatprep.subr.bf16.mxu0 %v2894_v10  ;;  %2864 = vmatprep.subr.bf16.mxu1 %v2894_v10  ;;  %v2939_v50 = vld [vmem:[%s3163_s9 + $0x348] ss:$28 sps:$4 sm:$0xff]   ;;  %v2951_v62 = vld [vmem:[%s3163_s9 + $0xe0] ss:$28 sps:$4 sm:$0xff]   ;;  %v2959_v3 = vld [vmem:[%s3163_s9 + $0x118] ss:$28 sps:$4 sm:$0xff]  }
  0x19   : > { %v2950_v56 = vld [vmem:[%s3163_s9 + $0xc] ss:$28 sps:$4 sm:$0xff]   ;;  %v2953_v58 = vld [vmem:[%s3743_s1 + $0x180] sm:$0xff]   ;;  %v2955_v63 = vld [vmem:[%s3163_s9 + $0x11c] ss:$28 sps:$4 sm:$0xff]  }
  0x1a   : > { %v2948_v59 = vld [vmem:[%s3163_s9 + $0x8] ss:$28 sps:$4 sm:$0xff]   ;;  %v2960_v4 = vld [vmem:[%s3163_s9 + $0x40] ss:$28 sps:$4 sm:$0xff]   ;;  %v2989_v7 = vld [vmem:[%s3743_s1 + $0x170] sm:$0xff]  }
  0x1b   : > { %2480 = vmatpush3.bf16.msra.mxu0 %v2895_v13  ;;  %2872 = vmatpush3.bf16.msra.mxu1 %v2895_v13  ;;  %v2967_v60 = vld [vmem:[%s3743_s1 + $0x160] sm:$0xff]   ;;  %v2975_v1 = vld [vmem:[%s3743_s1 + $0x168] sm:$0xff]   ;;  %v2963_v6 = vld [vmem:[%s3163_s9 + $0x7c] ss:$28 sps:$4 sm:$0xff]  }
  0x1c   : > { %2481 = vmatprep.subr.bf16.mxu0 %v2896_v14  ;;  %2865 = vmatprep.subr.bf16.mxu1 %v2896_v14  ;;  %v2968_v61 = vld [vmem:[%s3743_s1 + $0x120] sm:$0xff]   ;;  %v2976_v2 = vld [vmem:[%s3743_s1 + $0x128] sm:$0xff]   ;;  %v2990_v8 = vld [vmem:[%s3743_s1 + $0x130] sm:$0xff]  }
  0x1d   : > { %v2957_v0 = vld [vmem:[%s3163_s9 + $0x44] ss:$28 sps:$4 sm:$0xff]   ;;  %v2965_v9 = vld [vmem:[%s3163_s9 + $0x150] ss:$28 sps:$4 sm:$0xff]   ;;  %v2966_v10 = vld [vmem:[%s3163_s9 + $0x78] ss:$28 sps:$4 sm:$0xff]  }
  0x1e   : > { %v2969_v11 = vld [vmem:[%s3163_s9 + $0x18c] ss:$28 sps:$4 sm:$0xff]   ;;  %v2997_v12 = vld [vmem:[%s3743_s1 + $0x178] sm:$0xff]   ;;  %v2971_v14 = vld [vmem:[%s3163_s9 + $0xb4] ss:$28 sps:$4 sm:$0xff]  }
  0x1f   : > { %2482 = vmatpush3.bf16.msra.mxu0 %v2897_v15  ;;  %2873 = vmatpush3.bf16.msra.mxu1 %v2897_v15  ;;  %v2998_v13 = vld [vmem:[%s3743_s1 + $0x138] sm:$0xff]   ;;  %v3011_v15 = vld [vmem:[%s3743_s1 + $0x188] sm:$0xff]  }
  0x20   : > { %2483 = vmatprep.subr.bf16.mxu0 %v2898_v16  ;;  %2866 = vmatprep.subr.bf16.mxu1 %v2898_v16  ;;  %v2973_v16 = vld [vmem:[%s3163_s9 + $0x188] ss:$28 sps:$4 sm:$0xff]  }
  0x23   : > { %2484 = vmatpush3.bf16.msra.mxu0 %v2899_v17  ;;  %2874 = vmatpush3.bf16.msra.mxu1 %v2899_v17  ;;  %v2974_v17 = vld [vmem:[%s3163_s9 + $0xb0] ss:$28 sps:$4 sm:$0xff]  }
  0x24   : > { %2581 = vmatprep.subr.bf16.mxu1 %v2906_v18  ;;  %2693 = vmatprep.subr.bf16.mxu0 %v2907_v21  ;;  %v2977_v18 = vld [vmem:[%s3163_s9 + $0x1c4] ss:$28 sps:$4 sm:$0xff]  }
  0x25   : > { %v2982_v21 = vld [vmem:[%s3163_s9 + $0xe8] ss:$28 sps:$4 sm:$0xff]  }
  0x26   : > { %1355 = vmatmul.mubr.bf16.vlgmr.msra.gmra.mrb[0].mxu0 %v2900_v19  ;;  %1451 = vmatmul.mubr.bf16.vlgmr.msra.gmra.mrb[0].mxu1 %v2903_v20  ;;  %v2979_v19 = vld [vmem:[%s3163_s9 + $0xec] ss:$28 sps:$4 sm:$0xff]   ;;  %v2981_v20 = vld [vmem:[%s3163_s9 + $0x1c0] ss:$28 sps:$4 sm:$0xff]  }
  0x27   : > { %2582 = vmatpush3.bf16.msra.mxu1 %v2908_v22  ;;  %2694 = vmatpush3.bf16.msra.mxu0 %v2909_v23  ;;  %v2983_v22 = vld [vmem:[%s3163_s9 + $0x1fc] ss:$28 sps:$4 sm:$0xff]   ;;  %v2985_v23 = vld [vmem:[%s3163_s9 + $0x124] ss:$28 sps:$4 sm:$0xff]  }
  0x28   : > { %2583 = vmatprep.subr.bf16.mxu1 %v2910_v24  ;;  %1362 = vmatprep.mubr.bf16.mxu0 %v2912_v25  ;;  %v2987_v24 = vld [vmem:[%s3163_s9 + $0x1f8] ss:$28 sps:$4 sm:$0xff]   ;;  %v2988_v25 = vld [vmem:[%s3163_s9 + $0x120] ss:$28 sps:$4 sm:$0xff]  }
  0x29   : > { %1458 = vmatprep.mubr.bf16.mxu1 %v2914_v26  ;;  %2695 = vmatprep.subr.bf16.mxu0 %v2921_v27  ;;  %v2991_v26 = vld [vmem:[%s3163_s9 + $0x234] ss:$28 sps:$4 sm:$0xff]   ;;  %v2993_v27 = vld [vmem:[%s3163_s9 + $0x15c] ss:$28 sps:$4 sm:$0xff]  }
  0x2b   : > { %2584 = vmatpush3.bf16.msra.mxu1 %v2911_v28  ;;  %2696 = vmatpush3.bf16.msra.mxu0 %v2923_v29  ;;  %v2995_v28 = vld [vmem:[%s3163_s9 + $0x230] ss:$28 sps:$4 sm:$0xff]   ;;  %v2996_v29 = vld [vmem:[%s3163_s9 + $0x158] ss:$28 sps:$4 sm:$0xff]  }
  0x2c   : > { %2585 = vmatprep.subr.bf16.mxu1 %v2918_v32  ;;  %2697 = vmatprep.subr.bf16.mxu0 %v2941_v41  ;;  %v3003_v32 = vld [vmem:[%s3163_s9 + $0x268] ss:$28 sps:$4 sm:$0xff]  }
  0x2d   : > { %v3017_v41 = vld [vmem:[%s3163_s9 + $0x48] ss:$28 sps:$4 sm:$0xff]  }
  0x2e   : > { %1363 = vmatmul.mubr.bf16.gmra.mrb[4].mxu0 %v2916_v30  ;;  %1459 = vmatmul.mubr.bf16.gmra.mrb[4].mxu1 %v2917_v31  ;;  %v2999_v30 = vld [vmem:[%s3163_s9 + $0x26c] ss:$28 sps:$4 sm:$0xff]   ;;  %v3001_v31 = vld [vmem:[%s3163_s9 + $0x194] ss:$28 sps:$4 sm:$0xff]  }
  0x2f   : > { %2586 = vmatpush3.bf16.msra.mxu1 %v2919_v33  ;;  %1370 = vmatprep.mubr.bf16.mxu0 %v2924_v35  ;;  %v3004_v33 = vld [vmem:[%s3163_s9 + $0x190] ss:$28 sps:$4 sm:$0xff]  }
  0x30   : > { %2587 = vmatprep.subr.bf16.mxu1 %v2920_v34  ;;  %1466 = vmatprep.mubr.bf16.mxu1 %v2926_v36  ;;  %v3005_v34 = vld [vmem:[%s3163_s9 + $0x1cc] ss:$28 sps:$4 sm:$0xff]   ;;  %v3009_v35 = vld [vmem:[%s3163_s9 + $0x14] ss:$28 sps:$4 sm:$0xff]  }
  0x31   : > { %2698 = vmatpush3.bf16.msra.mxu0 %v2943_v44  ;;  %v3007_v36 = vld [vmem:[%s3163_s9 + $0x10] ss:$28 sps:$4 sm:$0xff]   ;;  %v3022_v44 = vld [vmem:[%s3163_s9 + $0x238] ss:$28 sps:$4 sm:$0xff]  }
  0x32   : > { %2699 = vmatprep.subr.bf16.mxu0 %v2952_v51  ;;  %v3032_v51 = vld [vmem:[%s3163_s9 + $0xf4] ss:$28 sps:$4 sm:$0xff]  }
  0x33   : > { %2588 = vmatpush3.bf16.msra.mxu1 %v2922_v37  ;;  %v3010_v37 = vld [vmem:[%s3163_s9 + $0x1c8] ss:$28 sps:$4 sm:$0xff]  }
  0x34   : > { %2589 = vmatprep.subr.bf16.mxu1 %v2930_v38  ;;  %v3012_v38 = vld [vmem:[%s3163_s9 + $0x204] ss:$28 sps:$4 sm:$0xff]  }
  0x35   : > { %2700 = vmatpush3.bf16.msra.mxu0 %v2954_v53  ;;  %v3035_v53 = vld [vmem:[%s3163_s9 + $0xf0] ss:$28 sps:$4 sm:$0xff]  }
  0x36   : > { %1371 = vmatmul.mubr.bf16.gmra.mrb[8].mxu0 %v2928_v39  ;;  %1467 = vmatmul.mubr.bf16.gmra.mrb[8].mxu1 %v2929_v40  ;;  %v3014_v39 = vld [vmem:[%s3163_s9 + $0x4c] ss:$28 sps:$4 sm:$0xff]   ;;  %v3016_v40 = vld [vmem:[%s3163_s9 + $0x200] ss:$28 sps:$4 sm:$0xff]  }
  0x37   : > { %2590 = vmatpush3.bf16.msra.mxu1 %v2931_v42  ;;  %1378 = vmatprep.mubr.bf16.mxu0 %v2934_v45  ;;  %v3018_v42 = vld [vmem:[%s3163_s9 + $0x23c] ss:$28 sps:$4 sm:$0xff]  }
  0x38   : > { %2591 = vmatprep.subr.bf16.mxu1 %v2932_v43  ;;  %1474 = vmatprep.mubr.bf16.mxu1 %v2936_v46  ;;  %v3020_v43 = vld [vmem:[%s3163_s9 + $0x84] ss:$28 sps:$4 sm:$0xff]   ;;  %v3024_v46 = vld [vmem:[%s3163_s9 + $0x274] ss:$28 sps:$4 sm:$0xff]  }
  0x39   : > { %2701 = vmatprep.subr.bf16.mxu0 %v2967_v60  ;;  %v3023_v45 = vld [vmem:[%s3163_s9 + $0x80] ss:$28 sps:$4 sm:$0xff]   ;;  %v3046_v60 = vld [vmem:[%s3163_s9 + $0x318] ss:$28 sps:$4 sm:$0xff]  }
  0x3a   : > { %2702 = vmatpush3.bf16.msra.mxu0 %v2968_v61  ;;  %v3047_v61 = vld [vmem:[%s3163_s9 + $0x160] ss:$28 sps:$4 sm:$0xff]  }
  0x3b   : > { %2592 = vmatpush3.bf16.msra.mxu1 %v2933_v47  ;;  %2703 = vmatprep.subr.bf16.mxu0 %v2975_v1  ;;  %v3026_v47 = vld [vmem:[%s3163_s9 + $0xbc] ss:$28 sps:$4 sm:$0xff]  }
  0x3c   : > { %2593 = vmatprep.subr.bf16.mxu1 %v2940_v48  ;;  %v3028_v48 = vld [vmem:[%s3163_s9 + $0x270] ss:$28 sps:$4 sm:$0xff]   ;;  %v3053_v1 = vld [vmem:[%s3163_s9 + $0x198] ss:$28 sps:$4 sm:$0xff]  }
  0x3e   : > { %1379 = vmatmul.mubr.bf16.gmra.mrb[12].mxu0 %v2938_v49  ;;  %1475 = vmatmul.mubr.bf16.gmra.mrb[12].mxu1 %v2939_v50  ;;  %v3029_v49 = vld [vmem:[%s3163_s9 + $0xb8] ss:$28 sps:$4 sm:$0xff]   ;;  %v3030_v50 = vld [vmem:[%s3163_s9 + $0x2ac] ss:$28 sps:$4 sm:$0xff]  }
  0x3f   : > { %2594 = vmatpush3.bf16.msra.mxu1 %v2942_v52  ;;  %1386 = vmatprep.mubr.bf16.mxu0 %v2946_v54  ;;  %v3034_v52 = vld [vmem:[%s3163_s9 + $0x2a8] ss:$28 sps:$4 sm:$0xff]  }
  0x40   : > { %2595 = vmatprep.subr.bf16.mxu1 %v2944_v55  ;;  %1515 = vmatprep.mubr.bf16.mxu1 %v2950_v56  ;;  %v3036_v54 = vld [vmem:[%s3163_s9 + $0x2e4] ss:$28 sps:$4 sm:$0xff]   ;;  %v3038_v55 = vld [vmem:[%s3163_s9 + $0x12c] ss:$28 sps:$4 sm:$0xff]  }
  0x41   : > { %2704 = vmatpush3.bf16.msra.mxu0 %v2976_v2  ;;  %v3040_v56 = vld [vmem:[%s3163_s9 + $0x2e0] ss:$28 sps:$4 sm:$0xff]   ;;  %v3054_v2 = vld [vmem:[%s3163_s9 + $0x1d4] ss:$28 sps:$4 sm:$0xff]  }
  0x42   : > { %2705 = vmatprep.subr.bf16.mxu0 %v2989_v7  ;;  %v3061_v7 = vld [vmem:[%s3163_s9 + $0x88] ss:$28 sps:$4 sm:$0xff]  }
  0x43   : > { %2596 = vmatpush3.bf16.msra.mxu1 %v2945_v57  ;;  %v3041_v57 = vld [vmem:[%s3163_s9 + $0x128] ss:$28 sps:$4 sm:$0xff]  }
  0x44   : > { %2823 = vmatprep.subr.bf16.mxu1 %v2953_v58 }
  0x45   : > { %2706 = vmatpush3.bf16.msra.mxu0 %v2990_v8  ;;  %v3062_v8 = vld [vmem:[%s3163_s9 + $0x208] ss:$28 sps:$4 sm:$0xff]  }
  0x46   : > { %1387 = vmatmul.mubr.bf16.gmra.mrb[16].mxu0 %v2951_v62  ;;  %1516 = vmatmul.mubr.bf16.vlgmr.msra.gmra.mrb[16].mxu1 %v2948_v59  ;;  %v3044_v59 = vld [vmem:[%s3163_s9 + $0x164] ss:$28 sps:$4 sm:$0xff]   ;;  %v3048_v62 = vld [vmem:[%s3163_s9 + $0x354] ss:$28 sps:$4 sm:$0xff]  }
  0x47   : > { %2824 = vmatpush3.bf16.msra.mxu1 %v2953_v58  ;;  %1394 = vmatprep.mubr.bf16.mxu0 %v2955_v63  ;;  %v3042_v58 = vld [vmem:[%s3163_s9 + $0x31c] ss:$28 sps:$4 sm:$0xff]  }
  0x48   : > { %1523 = vmatprep.mubr.bf16.mxu1 %v2957_v0  ;;  %2707 = vmatprep.subr.bf16.mxu0 %v2997_v12  ;;  %v3050_v63 = vld [vmem:[%s3163_s9 + $0x19c] ss:$28 sps:$4 sm:$0xff]   ;;  %v3052_v0 = vld [vmem:[%s3163_s9 + $0x350] ss:$28 sps:$4 sm:$0xff]  }
  0x49   : > { %2708 = vmatpush3.bf16.msra.mxu0 %v2998_v13  ;;  %2825 = vmatprep.subr.bf16.mxu1 %v3011_v15  ;;  %v3067_v12 = vld [vmem:[%s3163_s9 + $0x240] ss:$28 sps:$4 sm:$0xff]   ;;  %v3068_v13 = vld [vmem:[%s3163_s9 + $0x130] ss:$28 sps:$4 sm:$0xff]  }
  0x4b   : > { %2826 = vmatpush3.bf16.msra.mxu1 %v3011_v15  ;;  %v3071_v15 = vld [vmem:[%s3163_s9 + $0x168] ss:$28 sps:$4 sm:$0xff]  }
  0x4e   : > { %1395 = vmatmul.mubr.bf16.gmra.mrb[20].mxu0 %v2959_v3  ;;  %1524 = vmatmul.mubr.bf16.gmra.mrb[20].mxu1 %v2960_v4  ;;  %v3056_v3 = vld [vmem:[%s3163_s9 + $0x18] ss:$28 sps:$4 sm:$0xff]   ;;  %v3057_v4 = vld [vmem:[%s3163_s9 + $0x1d0] ss:$28 sps:$4 sm:$0xff]  }
  0x4f   : > { %1402 = vmatprep.mubr.bf16.mxu0 %v2961_v5  ;;  %1531 = vmatprep.mubr.bf16.mxu1 %v2963_v6  ;;  %v3058_v5 = vld [vmem:[%s3163_s9 + $0x50] ss:$28 sps:$4 sm:$0xff]  }
  0x50   : > { %v3059_v6 = vld [vmem:[%s3163_s9 + $0x20c] ss:$28 sps:$4 sm:$0xff]  }
  0x56   : > { %1403 = vmatmul.mubr.bf16.gmra.mrb[24].mxu0 %v2965_v9  ;;  %1532 = vmatmul.mubr.bf16.gmra.mrb[24].mxu1 %v2966_v10  ;;  %v3063_v9 = vld [vmem:[%s3163_s9 + $0xc0] ss:$28 sps:$4 sm:$0xff]  }
  0x57   : > { %1410 = vmatprep.mubr.bf16.mxu0 %v2969_v11  ;;  %1539 = vmatprep.mubr.bf16.mxu1 %v2971_v14  ;;  %v3064_v10 = vld [vmem:[%s3163_s9 + $0x244] ss:$28 sps:$4 sm:$0xff]   ;;  %v3066_v11 = vld [vmem:[%s3163_s9 + $0xf8] ss:$28 sps:$4 sm:$0xff]  }
  0x58   : > { %v3069_v14 = vld [vmem:[%s3163_s9 + $0x27c] ss:$28 sps:$4 sm:$0xff]  }
  0x5e   : > { %1411 = vmatmul.mubr.bf16.gmra.mrb[28].mxu0 %v2973_v16  ;;  %1540 = vmatmul.mubr.bf16.gmra.mrb[28].mxu1 %v2974_v17  ;;  %v3072_v16 = vld [vmem:[%s3163_s9 + $0x278] ss:$28 sps:$4 sm:$0xff]   ;;  %v3073_v17 = vld [vmem:[%s3163_s9 + $0x1a0] ss:$28 sps:$4 sm:$0xff]  }
  0x5f   : > { %1418 = vmatprep.mubr.bf16.mxu0 %v2977_v18  ;;  %1547 = vmatprep.mubr.bf16.mxu1 %v2979_v19  ;;  %v3074_v18 = vld [vmem:[%s3163_s9 + $0x2b4] ss:$28 sps:$4 sm:$0xff]  }
  0x60   : > { %v3076_v19 = vld [vmem:[%s3163_s9 + $0x1d8] ss:$28 sps:$4 sm:$0xff]  }
  0x66   : > { %1419 = vmatmul.mubr.bf16.gmra.mrb[32].mxu0 %v2981_v20  ;;  %1548 = vmatmul.mubr.bf16.gmra.mrb[32].mxu1 %v2982_v21  ;;  %v3077_v20 = vld [vmem:[%s3163_s9 + $0x2b0] ss:$28 sps:$4 sm:$0xff]  }
  0x67   : > { %1426 = vmatprep.mubr.bf16.mxu0 %v2983_v22  ;;  %1555 = vmatprep.mubr.bf16.mxu1 %v2985_v23  ;;  %v3078_v21 = vld [vmem:[%s3163_s9 + $0x210] ss:$28 sps:$4 sm:$0xff]   ;;  %v3081_v23 = vld [vmem:[%s3163_s9 + $0x248] ss:$28 sps:$4 sm:$0xff]  }
  0x68   : > { %v3079_v22 = vld [vmem:[%s3163_s9 + $0x2ec] ss:$28 sps:$4 sm:$0xff]  }
  0x6e   : > { %1427 = vmatmul.mubr.bf16.gmra.mrb[36].mxu0 %v2987_v24  ;;  %1556 = vmatmul.mubr.bf16.gmra.mrb[36].mxu1 %v2988_v25  ;;  %v3082_v24 = vld [vmem:[%s3163_s9 + $0x2e8] ss:$28 sps:$4 sm:$0xff]   ;;  %v3083_v25 = vld [vmem:[%s3163_s9 + $0x280] ss:$28 sps:$4 sm:$0xff]  }
  0x6f   : > { %1434 = vmatprep.mubr.bf16.mxu0 %v2991_v26  ;;  %1563 = vmatprep.mubr.bf16.mxu1 %v2993_v27  ;;  %v3084_v26 = vld [vmem:[%s3163_s9 + $0x324] ss:$28 sps:$4 sm:$0xff]   ;;  %v3086_v27 = vld [vmem:[%s3163_s9 + $0x2b8] ss:$28 sps:$4 sm:$0xff]  }
  0x76   : > { %1435 = vmatmul.mubr.bf16.gmra.mrb[40].mxu0 %v2995_v28  ;;  %1564 = vmatmul.mubr.bf16.gmra.mrb[40].mxu1 %v2996_v29  ;;  %v3087_v28 = vld [vmem:[%s3163_s9 + $0x320] ss:$28 sps:$4 sm:$0xff]   ;;  %v3088_v29 = vld [vmem:[%s3163_s9 + $0x2f0] ss:$28 sps:$4 sm:$0xff]  }
  0x77   : > { %1442 = vmatprep.mubr.bf16.mxu0 %v2999_v30  ;;  %1571 = vmatprep.mubr.bf16.mxu1 %v3001_v31  ;;  %v3089_v30 = vld [vmem:[%s3163_s9 + $0x35c] ss:$28 sps:$4 sm:$0xff]   ;;  %v3091_v31 = vld [vmem:[%s3163_s9 + $0x328] ss:$28 sps:$4 sm:$0xff]  }
  0x7e   : > { %1443 = vmatmul.mubr.bf16.gmra.mrb[44].mxu0 %v3003_v32  ;;  %1572 = vmatmul.mubr.bf16.gmra.mrb[44].mxu1 %v3004_v33 }
  0x7f   : > { %1579 = vmatprep.mubr.bf16.mxu1 %v3005_v34  ;;  %1676 = vmatprep.mubr.bf16.mxu0 %v3009_v35 }
  0x86   : > { %1580 = vmatmul.mubr.bf16.gmra.mrb[48].mxu1 %v3010_v37  ;;  %1677 = vmatmul.mubr.bf16.vlgmr.msra.gmra.mrb[48].mxu0 %v3007_v36  ;;  %v3092_v36 = vld [vmem:[%s3163_s9 + $0x358] ss:$28 sps:$4 sm:$0xff]   ;;  %v3093_v37 = vld [vmem:[%s3163_s9 + $0x360] ss:$28 sps:$4 sm:$0xff]  }
  0x87   : > { %1587 = vmatprep.mubr.bf16.mxu1 %v3012_v38  ;;  %1684 = vmatprep.mubr.bf16.mxu0 %v3014_v39 }
  0x8e   : > { %1588 = vmatmul.mubr.bf16.gmra.mrb[52].mxu1 %v3016_v40  ;;  %1685 = vmatmul.mubr.bf16.gmra.mrb[52].mxu0 %v3017_v41 }
  0x8f   : > { %1595 = vmatprep.mubr.bf16.mxu1 %v3018_v42  ;;  %1692 = vmatprep.mubr.bf16.mxu0 %v3020_v43 }
  0x96   : > { %1596 = vmatmul.mubr.bf16.gmra.mrb[56].mxu1 %v3022_v44  ;;  %1693 = vmatmul.mubr.bf16.gmra.mrb[56].mxu0 %v3023_v45 }
  0x97   : > { %1603 = vmatprep.mubr.bf16.mxu1 %v3024_v46  ;;  %1700 = vmatprep.mubr.bf16.mxu0 %v3026_v47 }
  0x9e   : > { %1604 = vmatmul.mubr.bf16.gmra.mrb[60].mxu1 %v3028_v48  ;;  %1701 = vmatmul.mubr.bf16.gmra.mrb[60].mxu0 %v3029_v49 }
  0x9f   : > { %1611 = vmatprep.mubr.bf16.mxu1 %v3030_v50  ;;  %1708 = vmatprep.mubr.bf16.mxu0 %v3032_v51 }
  0xa6   : > { %1612 = vmatmul.mubr.bf16.gmra.mrb[64].mxu1 %v3034_v52  ;;  %1709 = vmatmul.mubr.bf16.gmra.mrb[64].mxu0 %v3035_v53 }
  0xa7   : > { %1619 = vmatprep.mubr.bf16.mxu1 %v3036_v54  ;;  %1716 = vmatprep.mubr.bf16.mxu0 %v3038_v55 }
  0xae   : > { %1620 = vmatmul.mubr.bf16.gmra.mrb[68].mxu1 %v3040_v56  ;;  %1717 = vmatmul.mubr.bf16.gmra.mrb[68].mxu0 %v3041_v57 }
  0xaf   : > { %1627 = vmatprep.mubr.bf16.mxu1 %v3042_v58  ;;  %1724 = vmatprep.mubr.bf16.mxu0 %v3044_v59 }
  0xb6   : > { %1628 = vmatmul.mubr.bf16.gmra.mrb[72].mxu1 %v3046_v60  ;;  %1725 = vmatmul.mubr.bf16.gmra.mrb[72].mxu0 %v3047_v61 }
  0xb7   : > { %1635 = vmatprep.mubr.bf16.mxu1 %v3048_v62  ;;  %1732 = vmatprep.mubr.bf16.mxu0 %v3050_v63 }
  0xbe   : > { %1636 = vmatmul.mubr.bf16.gmra.mrb[76].mxu1 %v3052_v0  ;;  %1733 = vmatmul.mubr.bf16.gmra.mrb[76].mxu0 %v3053_v1 }
  0xbf   : > { %1740 = vmatprep.mubr.bf16.mxu0 %v3054_v2  ;;  %2827 = vmatprep.mubr.msk.bf16.mxu1 %vm1273_vm0, %v3056_v3 }
  0xc6   : > { %1741 = vmatmul.mubr.bf16.gmra.mrb[80].mxu0 %v3057_v4  ;;  %2828 = vmatmul.mubr.msk.bf16.vlgmr.msra.gmra.mrb[80].mxu1 %vm1273_vm0, %v3058_v5 }
  0xc7   : > { %1748 = vmatprep.mubr.bf16.mxu0 %v3059_v6  ;;  %2831 = vmatprep.mubr.msk.bf16.mxu1 %vm1273_vm0, %v3061_v7 }
  0xce   : > { %1749 = vmatmul.mubr.bf16.gmra.mrb[84].mxu0 %v3062_v8  ;;  %2832 = vmatmul.mubr.msk.bf16.gmra.mrb[84].mxu1 %vm1273_vm0, %v3063_v9 }
  0xcf   : > { %1756 = vmatprep.mubr.bf16.mxu0 %v3064_v10  ;;  %2835 = vmatprep.mubr.msk.bf16.mxu1 %vm1273_vm0, %v3066_v11 }
  0xd6   : > { %1757 = vmatmul.mubr.bf16.gmra.mrb[88].mxu0 %v3067_v12  ;;  %2836 = vmatmul.mubr.msk.bf16.gmra.mrb[88].mxu1 %vm1273_vm0, %v3068_v13 }
  0xd7   : > { %1764 = vmatprep.mubr.bf16.mxu0 %v3069_v14  ;;  %2839 = vmatprep.mubr.msk.bf16.mxu1 %vm1273_vm0, %v3071_v15 }
  0xde   : > { %1765 = vmatmul.mubr.bf16.gmra.mrb[92].mxu0 %v3072_v16  ;;  %2840 = vmatmul.mubr.msk.bf16.gmra.mrb[92].mxu1 %vm1273_vm0, %v3073_v17 }
  0xdf   : > { %1772 = vmatprep.mubr.bf16.mxu0 %v3074_v18  ;;  %2843 = vmatprep.mubr.msk.bf16.mxu1 %vm1273_vm0, %v3076_v19  ;;  %v3435_v18 = vld [vmem:[%s3744_s2] ss:$0 sm:$0xff] }
  0xe6   : > { %1773 = vmatmul.mubr.bf16.gmra.mrb[96].mxu0 %v3077_v20  ;;  %2844 = vmatmul.mubr.msk.bf16.gmra.mrb[96].mxu1 %vm1273_vm0, %v3078_v21 }
  0xe7   : > { %1780 = vmatprep.mubr.bf16.mxu0 %v3079_v22  ;;  %2847 = vmatprep.mubr.msk.bf16.mxu1 %vm1273_vm0, %v3081_v23 }
  0xee   : > { %1781 = vmatmul.mubr.bf16.gmra.mrb[100].mxu0 %v3082_v24  ;;  %2848 = vmatmul.mubr.msk.bf16.gmra.mrb[100].mxu1 %vm1273_vm0, %v3083_v25 }
  0xef   : > { %1788 = vmatprep.mubr.bf16.mxu0 %v3084_v26  ;;  %2851 = vmatprep.mubr.msk.bf16.mxu1 %vm1273_vm0, %v3086_v27 }
  0xf6   : > { %1789 = vmatmul.mubr.bf16.gmra.mrb[104].mxu0 %v3087_v28  ;;  %2852 = vmatmul.mubr.msk.bf16.gmra.mrb[104].mxu1 %vm1273_vm0, %v3088_v29 }
  0xf7   : > { %1796 = vmatprep.mubr.bf16.mxu0 %v3089_v30  ;;  %2855 = vmatprep.mubr.msk.bf16.mxu1 %vm1273_vm0, %v3091_v31 }
  0xf9   : > { %v2485_v32 = vpop.f32.mrb[0].mxu0  ;;  %v2557_v33 = vpop.f32.mrb[0].mxu1 }
  0xfa   : > { %v2486_v34 = vpop.f32.mrb[1].mxu0  ;;  %v2558_v35 = vpop.f32.mrb[1].mxu1 }
  0xfb   : > { %v2487_v38 = vadd.f32 %v2486_v34, %v2485_v32  ;;  %v2488_v39 = vpop.f32.mrb[2].mxu0  ;;  %v3415_v40 = vadd.f32 %v2558_v35, %v2557_v33  ;;  %v2560_v41 = vpop.f32.mrb[2].mxu1 }
  0xfc   : > { %v2489_v42 = vpop.f32.mrb[3].mxu0  ;;  %v2561_v43 = vpop.f32.mrb[3].mxu1 }
  0xfd   : > { %v2490_v44 = vadd.f32 %v2489_v42, %v2488_v39  ;;  %v3417_v45 = vadd.f32 %v2561_v43, %v2560_v41  ;;  %v1357_v23 = vadd.f32 %v2487_v38, %v3435_v18 }
  0xfe   : > { %1797 = vmatmul.mubr.bf16.gmra.mrb[108].mxu0 %v3092_v36  ;;  %2856 = vmatmul.mubr.msk.bf16.gmra.mrb[108].mxu1 %vm1273_vm0, %v3093_v37 }
  0xff   : > { %v1360_v30 = vadd.f32 %v2490_v44, %v3435_v18 }
 0x101   : > { %v2491_v46 = vpop.f32.mrb[4].mxu0  ;;  %v2563_v47 = vpop.f32.mrb[4].mxu1 }
 0x102   : > { %v2492_v48 = vpop.f32.mrb[5].mxu0  ;;  %v2564_v49 = vpop.f32.mrb[5].mxu1 }
 0x103   : > { %v2493_v50 = vadd.f32 %v2492_v48, %v2491_v46  ;;  %v2494_v51 = vpop.f32.mrb[6].mxu0  ;;  %v3420_v52 = vadd.f32 %v2564_v49, %v2563_v47  ;;  %v2566_v53 = vpop.f32.mrb[6].mxu1 }
 0x104   : > { %v2495_v54 = vpop.f32.mrb[7].mxu0  ;;  %v2567_v55 = vpop.f32.mrb[7].mxu1 }
 0x105   : > { %v2496_v56 = vadd.f32 %v2495_v54, %v2494_v51  ;;  %v3422_v57 = vadd.f32 %v2567_v55, %v2566_v53  ;;  %v1365_v38 = vadd.f32 %v2493_v50, %v3435_v18 }
 0x107   : > { %v1368_v44 = vadd.f32 %v2496_v56, %v3435_v18 }
 0x109   : > { %v2497_v58 = vpop.f32.mrb[8].mxu0  ;;  %v2569_v59 = vpop.f32.mrb[8].mxu1 }
 0x10a   : > { %v2498_v60 = vpop.f32.mrb[9].mxu0  ;;  %v2570_v61 = vpop.f32.mrb[9].mxu1 }
 0x10b   : > { %v2499_v62 = vadd.f32 %v2498_v60, %v2497_v58  ;;  %v2500_v63 = vpop.f32.mrb[10].mxu0  ;;  %v3424_v0 = vadd.f32 %v2570_v61, %v2569_v59  ;;  %v2572_v1 = vpop.f32.mrb[10].mxu1 }
 0x10c   : > { %v2501_v2 = vpop.f32.mrb[11].mxu0  ;;  %v2573_v3 = vpop.f32.mrb[11].mxu1 }
 0x10d   : > { %v2502_v4 = vadd.f32 %v2501_v2, %v2500_v63  ;;  %v3426_v5 = vadd.f32 %v2573_v3, %v2572_v1  ;;  %v1373_v50 = vadd.f32 %v2499_v62, %v3435_v18 }
 0x10f   : > { %v1376_v56 = vadd.f32 %v2502_v4, %v3435_v18 }
 0x111   : > { %v2503_v6 = vpop.f32.mrb[12].mxu0  ;;  %v2575_v7 = vpop.f32.mrb[12].mxu1 }
 0x112   : > { %v2504_v8 = vpop.f32.mrb[13].mxu0  ;;  %v2576_v9 = vpop.f32.mrb[13].mxu1 }
 0x113   : > { %v2505_v10 = vadd.f32 %v2504_v8, %v2503_v6  ;;  %v2506_v11 = vpop.f32.mrb[14].mxu0  ;;  %v3428_v12 = vadd.f32 %v2576_v9, %v2575_v7  ;;  %v2578_v13 = vpop.f32.mrb[14].mxu1 }
 0x114   : > { %v2507_v14 = vpop.f32.mrb[15].mxu0  ;;  %v2579_v15 = vpop.f32.mrb[15].mxu1 }
 0x115   : > { %v2508_v16 = vadd.f32 %v2507_v14, %v2506_v11  ;;  %v3430_v17 = vadd.f32 %v2579_v15, %v2578_v13  ;;  %v1381_v62 = vadd.f32 %v2505_v10, %v3435_v18 }
 0x117   : > { %v1384_v4 = vadd.f32 %v2508_v16, %v3435_v18 }
 0x119   : > { %v2509_v19 = vpop.f32.mrb[16].mxu0  ;;  %v2597_v20 = vpop.f32.mrb[16].mxu1 }
 0x11a   : > { %v2510_v21 = vpop.f32.mrb[17].mxu0  ;;  %v2598_v22 = vpop.f32.mrb[17].mxu1 }
 0x11b   : > { %v3438_v24 = vadd.f32 %v2510_v21, %v2509_v19  ;;  %v2599_v25 = vadd.f32 %v2598_v22, %v2597_v20  ;;  %v2512_v26 = vpop.f32.mrb[18].mxu0  ;;  %v2600_v27 = vpop.f32.mrb[18].mxu1 }
 0x11c   : > { %v2513_v28 = vpop.f32.mrb[19].mxu0  ;;  %v2601_v29 = vpop.f32.mrb[19].mxu1 }
 0x11d   : > { %v3441_v31 = vadd.f32 %v2599_v25, %v1357_v23  ;;  %v2514_v32 = vadd.f32 %v2513_v28, %v2512_v26  ;;  %v2602_v33 = vadd.f32 %v2601_v29, %v2600_v27  ;;  %v1389_v10 = vadd.f32 %v3438_v24, %v3435_v18 }
 0x11f   : > { %v3443_v34 = vadd.f32 %v2602_v33, %v1360_v30 }
 0x121   : > { %v2515_v35 = vpop.f32.mrb[20].mxu0  ;;  %v2603_v36 = vpop.f32.mrb[20].mxu1 }
 0x122   : > { %v2516_v37 = vpop.f32.mrb[21].mxu0  ;;  %v2604_v39 = vpop.f32.mrb[21].mxu1 }
 0x123   : > { %v3446_v41 = vadd.f32 %v2516_v37, %v2515_v35  ;;  %v2605_v42 = vadd.f32 %v2604_v39, %v2603_v36  ;;  %v2518_v43 = vpop.f32.mrb[22].mxu0  ;;  %v2606_v46 = vpop.f32.mrb[22].mxu1 }
 0x124   : > { %v2519_v47 = vpop.f32.mrb[23].mxu0  ;;  %v2607_v48 = vpop.f32.mrb[23].mxu1 }
 0x125   : > { %v3449_v49 = vadd.f32 %v2605_v42, %v1365_v38  ;;  %v2520_v51 = vadd.f32 %v2519_v47, %v2518_v43  ;;  %v2608_v53 = vadd.f32 %v2607_v48, %v2606_v46  ;;  %v1392_v47 = vadd.f32 %v2514_v32, %v3435_v18 }
 0x126   : > { %v1397_v24 = vadd.f32 %v3446_v41, %v3435_v18 }
 0x127   : > { %v3451_v54 = vadd.f32 %v2608_v53, %v1368_v44 }
 0x129   : > { %v2521_v55 = vpop.f32.mrb[24].mxu0  ;;  %v2609_v58 = vpop.f32.mrb[24].mxu1 }
 0x12a   : > { %v2522_v59 = vpop.f32.mrb[25].mxu0  ;;  %v2610_v60 = vpop.f32.mrb[25].mxu1 }
 0x12b   : > { %v3454_v61 = vadd.f32 %v2522_v59, %v2521_v55  ;;  %v2611_v63 = vadd.f32 %v2610_v60, %v2609_v58  ;;  %v2524_v1 = vpop.f32.mrb[26].mxu0  ;;  %v2612_v2 = vpop.f32.mrb[26].mxu1 }
 0x12c   : > { %v2525_v3 = vpop.f32.mrb[27].mxu0  ;;  %v2613_v6 = vpop.f32.mrb[27].mxu1 }
 0x12d   : > { %v3457_v7 = vadd.f32 %v2611_v63, %v1373_v50  ;;  %v2526_v8 = vadd.f32 %v2525_v3, %v2524_v1  ;;  %v2614_v9 = vadd.f32 %v2613_v6, %v2612_v2  ;;  %v1405_v41 = vadd.f32 %v3454_v61, %v3435_v18 }
 0x12f   : > { %v3459_v11 = vadd.f32 %v2614_v9, %v1376_v56  ;;  %v1400_v56 = vadd.f32 %v2520_v51, %v3435_v18 }
 0x131   : > { %v2527_v13 = vpop.f32.mrb[28].mxu0  ;;  %v2615_v14 = vpop.f32.mrb[28].mxu1 }
 0x132   : > { %v2528_v15 = vpop.f32.mrb[29].mxu0  ;;  %v2616_v19 = vpop.f32.mrb[29].mxu1 }
 0x133   : > { %v3462_v20 = vadd.f32 %v2528_v15, %v2527_v13  ;;  %v2617_v21 = vadd.f32 %v2616_v19, %v2615_v14  ;;  %v2530_v22 = vpop.f32.mrb[30].mxu0  ;;  %v2618_v23 = vpop.f32.mrb[30].mxu1 }
 0x134   : > { %v2531_v25 = vpop.f32.mrb[31].mxu0  ;;  %v2619_v26 = vpop.f32.mrb[31].mxu1 }
 0x135   : > { %v3465_v27 = vadd.f32 %v2617_v21, %v1381_v62  ;;  %v2532_v28 = vadd.f32 %v2531_v25, %v2530_v22  ;;  %v2620_v29 = vadd.f32 %v2619_v26, %v2618_v23 }
 0x137   : > { %v3467_v30 = vadd.f32 %v2620_v29, %v1384_v4 }
 0x139   : > { %v2533_v33 = vpop.f32.mrb[32].mxu0  ;;  %v2621_v35 = vpop.f32.mrb[32].mxu1 }
 0x13a   : > { %v2534_v36 = vpop.f32.mrb[33].mxu0  ;;  %v2622_v37 = vpop.f32.mrb[33].mxu1 }
 0x13b   : > { %v3471_v39 = vadd.f32 %v2534_v36, %v2533_v33  ;;  %v2623_v38 = vadd.f32 %v2622_v37, %v2621_v35  ;;  %v2536_v42 = vpop.f32.mrb[34].mxu0  ;;  %v2624_v43 = vpop.f32.mrb[34].mxu1  ;;  %v1408_v33 = vadd.f32 %v2526_v8, %v3435_v18 }
 0x13c   : > { %v2537_v46 = vpop.f32.mrb[35].mxu0  ;;  %v2625_v16 = vpop.f32.mrb[35].mxu1 }
 0x13d   : > { %v3474_v48 = vadd.f32 %v2623_v38, %v1389_v10  ;;  %v2538_v44 = vadd.f32 %v2537_v46, %v2536_v42  ;;  %v2626_v53 = vadd.f32 %v2625_v16, %v2624_v43  ;;  %v1413_v46 = vadd.f32 %v3462_v20, %v3435_v18 }
 0x13f   : > { %v3476_v55 = vadd.f32 %v2626_v53, %v1392_v47 }
 0x141   : > { %v2539_v58 = vpop.f32.mrb[36].mxu0  ;;  %v2627_v59 = vpop.f32.mrb[36].mxu1 }
 0x142   : > { %v2540_v60 = vpop.f32.mrb[37].mxu0  ;;  %v2628_v50 = vpop.f32.mrb[37].mxu1 }
 0x143   : > { %v3480_v63 = vadd.f32 %v2540_v60, %v2539_v58  ;;  %v2629_v1 = vadd.f32 %v2628_v50, %v2627_v59  ;;  %v2542_v2 = vpop.f32.mrb[38].mxu0  ;;  %v2630_v3 = vpop.f32.mrb[38].mxu1  ;;  %v1416_v60 = vadd.f32 %v2532_v28, %v3435_v18  ;;  %v1424_v28 = vadd.f32 %v2538_v44, %v3435_v18 }
 0x144   : > { %v2543_v6 = vpop.f32.mrb[39].mxu0  ;;  %v2631_v32 = vpop.f32.mrb[39].mxu1 }
 0x145   : > { %v3483_v9 = vadd.f32 %v2629_v1, %v1397_v24  ;;  %v2544_v13 = vadd.f32 %v2543_v6, %v2542_v2  ;;  %v2632_v14 = vadd.f32 %v2631_v32, %v2630_v3  ;;  %v1429_v44 = vadd.f32 %v3480_v63, %v3435_v18 }
 0x147   : > { %v3485_v15 = vadd.f32 %v2632_v14, %v1400_v56  ;;  %v1421_v56 = vadd.f32 %v3471_v39, %v3435_v18 }
 0x149   : > { %v2545_v19 = vpop.f32.mrb[40].mxu0  ;;  %v2633_v62 = vpop.f32.mrb[40].mxu1 }
 0x14a   : > { %v2546_v21 = vpop.f32.mrb[41].mxu0  ;;  %v2634_v22 = vpop.f32.mrb[41].mxu1 }
 0x14b   : > { %v3489_v23 = vadd.f32 %v2546_v21, %v2545_v19  ;;  %v2635_v25 = vadd.f32 %v2634_v22, %v2633_v62  ;;  %v2548_v26 = vpop.f32.mrb[42].mxu0  ;;  %v2636_v4 = vpop.f32.mrb[42].mxu1 }
 0x14c   : > { %v2549_v29 = vpop.f32.mrb[43].mxu0  ;;  %v2637_v51 = vpop.f32.mrb[43].mxu1 }
 0x14d   : > { %v3492_v35 = vadd.f32 %v2635_v25, %v1405_v41  ;;  %v3494_v36 = vadd.f32 %v2549_v29, %v2548_v26  ;;  %v2638_v37 = vadd.f32 %v2637_v51, %v2636_v4 }
 0x14f   : > { %v3496_v10 = vadd.f32 %v2638_v37, %v1408_v33 }
 0x151   : > { %v2551_v38 = vpop.f32.mrb[44].mxu0  ;;  %v2639_v42 = vpop.f32.mrb[44].mxu1 }
 0x152   : > { %v2552_v43 = vpop.f32.mrb[45].mxu0  ;;  %v2640_v61 = vpop.f32.mrb[45].mxu1 }
 0x153   : > { %v3500_v16 = vadd.f32 %v2552_v43, %v2551_v38  ;;  %v2641_v47 = vadd.f32 %v2640_v61, %v2639_v42  ;;  %v2554_v53 = vpop.f32.mrb[46].mxu0  ;;  %v2642_v58 = vpop.f32.mrb[46].mxu1 }
 0x154   : > { %v2555_v8 = vpop.f32.mrb[47].mxu0  ;;  %v2643_v59 = vpop.f32.mrb[47].mxu1 }
 0x155   : > { %v3503_v50 = vadd.f32 %v2641_v47, %v1413_v46  ;;  %v3505_v24 = vadd.f32 %v2555_v8, %v2554_v53  ;;  %v2644_v1 = vadd.f32 %v2643_v59, %v2642_v58  ;;  %v1432_v53 = vadd.f32 %v2544_v13, %v3435_v18 }
 0x156   : > { %v1437_v13 = vadd.f32 %v3489_v23, %v3435_v18 }
 0x157   : > { %v3507_v2 = vadd.f32 %v2644_v1, %v1416_v60 }
 0x159   : > { %v2645_v3 = vpop.f32.mrb[48].mxu1  ;;  %v2709_v6 = vpop.f32.mrb[48].mxu0 }
 0x15a   : > { %v2646_v32 = vpop.f32.mrb[49].mxu1  ;;  %v2710_v20 = vpop.f32.mrb[49].mxu0 }
 0x15b   : > { %v2647_v14 = vadd.f32 %v2646_v32, %v2645_v3  ;;  %v2711_v19 = vadd.f32 %v2710_v20, %v2709_v6  ;;  %v2648_v62 = vpop.f32.mrb[50].mxu1  ;;  %v2712_v21 = vpop.f32.mrb[50].mxu0 }
 0x15c   : > { %v2649_v22 = vpop.f32.mrb[51].mxu1  ;;  %v2713_v41 = vpop.f32.mrb[51].mxu0 }
 0x15d   : > { %v3512_v25 = vadd.f32 %v2647_v14, %v1421_v56  ;;  %v2650_v26 = vadd.f32 %v2649_v22, %v2648_v62  ;;  %v2714_v4 = vadd.f32 %v2713_v41, %v2712_v21  ;;  %v3515_v29 = vadd.f32 %v2711_v19, %v3441_v31 }
 0x15f   : > { %v3517_v51 = vadd.f32 %v2650_v26, %v1424_v28  ;;  %v3520_v33 = vadd.f32 %v2714_v4, %v3443_v34 }
 0x161   : > { %v2651_v39 = vpop.f32.mrb[52].mxu1  ;;  %v2715_v37 = vpop.f32.mrb[52].mxu0 }
 0x162   : > { %v2652_v38 = vpop.f32.mrb[53].mxu1  ;;  %v2716_v42 = vpop.f32.mrb[53].mxu0 }
 0x163   : > { %v2653_v43 = vadd.f32 %v2652_v38, %v2651_v39  ;;  %v2717_v61 = vadd.f32 %v2716_v42, %v2715_v37  ;;  %v2654_v46 = vpop.f32.mrb[54].mxu1  ;;  %v2718_v47 = vpop.f32.mrb[54].mxu0 }
 0x164   : > { %v2655_v31 = vpop.f32.mrb[55].mxu1  ;;  %v2719_v58 = vpop.f32.mrb[55].mxu0 }
 0x165   : > { %v3525_v8 = vadd.f32 %v2653_v43, %v1429_v44  ;;  %v2656_v59 = vadd.f32 %v2655_v31, %v2654_v46  ;;  %v2720_v34 = vadd.f32 %v2719_v58, %v2718_v47  ;;  %v3528_v60 = vadd.f32 %v2717_v61, %v3449_v49 }
 0x166   : > { %v1440_v49 = vadd.f32 %v3494_v36, %v3435_v18  ;;  %v1445_v36 = vadd.f32 %v3500_v16, %v3435_v18 }
 0x167   : > { %v3530_v1 = vadd.f32 %v2656_v59, %v1432_v53  ;;  %v3533_v3 = vadd.f32 %v2720_v34, %v3451_v54 }
 0x169   : > { %v2657_v63 = vpop.f32.mrb[56].mxu1  ;;  %v2721_v6 = vpop.f32.mrb[56].mxu0 }
 0x16a   : > { %v2658_v32 = vpop.f32.mrb[57].mxu1  ;;  %v2722_v20 = vpop.f32.mrb[57].mxu0 }
 0x16b   : > { %v2659_v56 = vadd.f32 %v2658_v32, %v2657_v63  ;;  %v2723_v14 = vadd.f32 %v2722_v20, %v2721_v6  ;;  %v2660_v19 = vpop.f32.mrb[58].mxu1  ;;  %v2724_v62 = vpop.f32.mrb[58].mxu0 }
 0x16c   : > { %v2661_v21 = vpop.f32.mrb[59].mxu1  ;;  %v2725_v28 = vpop.f32.mrb[59].mxu0 }
 0x16d   : > { %v3539_v22 = vadd.f32 %v2659_v56, %v1437_v13  ;;  %v2662_v54 = vadd.f32 %v2661_v21, %v2660_v19  ;;  %v2726_v41 = vadd.f32 %v2725_v28, %v2724_v62  ;;  %v3542_v26 = vadd.f32 %v2723_v14, %v3457_v7 }
 0x16e   : > { %v1448_v7 = vadd.f32 %v3505_v24, %v3435_v18  ;;  %v1453_v24 = vadd.f32 %v3415_v40, %v3435_v18 }
 0x16f   : > { %v3544_v4 = vadd.f32 %v2662_v54, %v1440_v49  ;;  %v3547_v23 = vadd.f32 %v2726_v41, %v3459_v11 }
 0x171   : > { %v2663_v39 = vpop.f32.mrb[60].mxu1  ;;  %v2727_v37 = vpop.f32.mrb[60].mxu0 }
 0x172   : > { %v2664_v38 = vpop.f32.mrb[61].mxu1  ;;  %v2728_v42 = vpop.f32.mrb[61].mxu0 }
 0x173   : > { %v2665_v44 = vadd.f32 %v2664_v38, %v2663_v39  ;;  %v2729_v43 = vadd.f32 %v2728_v42, %v2727_v37  ;;  %v2666_v61 = vpop.f32.mrb[62].mxu1  ;;  %v2730_v46 = vpop.f32.mrb[62].mxu0 }
 0x174   : > { %v2667_v47 = vpop.f32.mrb[63].mxu1  ;;  %v2731_v53 = vpop.f32.mrb[63].mxu0 }
 0x175   : > { %v3553_v31 = vadd.f32 %v2665_v44, %v1445_v36  ;;  %v2668_v11 = vadd.f32 %v2667_v47, %v2666_v61  ;;  %v2732_v58 = vadd.f32 %v2731_v53, %v2730_v46  ;;  %v3556_v59 = vadd.f32 %v2729_v43, %v3465_v27 }
 0x176   : > { %v1456_v27 = vadd.f32 %v3417_v45, %v3435_v18  ;;  %v1461_v45 = vadd.f32 %v3420_v52, %v3435_v18 }
 0x177   : > { %v3558_v34 = vadd.f32 %v2668_v11, %v1448_v7  ;;  %v3561_v16 = vadd.f32 %v2732_v58, %v3467_v30 }
 0x179   : > { %v2669_v63 = vpop.f32.mrb[64].mxu1  ;;  %v2733_v6 = vpop.f32.mrb[64].mxu0 }
 0x17a   : > { %v2670_v32 = vpop.f32.mrb[65].mxu1  ;;  %v2734_v20 = vpop.f32.mrb[65].mxu0 }
 0x17b   : > { %v2671_v13 = vadd.f32 %v2670_v32, %v2669_v63  ;;  %v2735_v56 = vadd.f32 %v2734_v20, %v2733_v6  ;;  %v2672_v14 = vpop.f32.mrb[66].mxu1  ;;  %v2736_v19 = vpop.f32.mrb[66].mxu0 }
 0x17c   : > { %v2673_v62 = vpop.f32.mrb[67].mxu1  ;;  %v2737_v49 = vpop.f32.mrb[67].mxu0 }
 0x17d   : > { %v3567_v21 = vadd.f32 %v2671_v13, %v1453_v24  ;;  %v2674_v30 = vadd.f32 %v2673_v62, %v2672_v14  ;;  %v2738_v28 = vadd.f32 %v2737_v49, %v2736_v19  ;;  %v3570_v54 = vadd.f32 %v2735_v56, %v3474_v48 }
 0x17e   : > { %v1464_v48 = vadd.f32 %v3422_v57, %v3435_v18  ;;  %v1469_v57 = vadd.f32 %v3424_v0, %v3435_v18 }
 0x17f   : > { %v3572_v41 = vadd.f32 %v2674_v30, %v1456_v27  ;;  %v3575_v40 = vadd.f32 %v2738_v28, %v3476_v55 }
 0x181   : > { %v2675_v39 = vpop.f32.mrb[68].mxu1  ;;  %v2739_v37 = vpop.f32.mrb[68].mxu0 }
 0x182   : > { %v2676_v38 = vpop.f32.mrb[69].mxu1  ;;  %v2740_v42 = vpop.f32.mrb[69].mxu0 }
 0x183   : > { %v2677_v36 = vadd.f32 %v2676_v38, %v2675_v39  ;;  %v2741_v44 = vadd.f32 %v2740_v42, %v2739_v37  ;;  %v2678_v43 = vpop.f32.mrb[70].mxu1  ;;  %v2742_v61 = vpop.f32.mrb[70].mxu0 }
 0x184   : > { %v2679_v46 = vpop.f32.mrb[71].mxu1  ;;  %v2743_v7 = vpop.f32.mrb[71].mxu0 }
 0x185   : > { %v3581_v47 = vadd.f32 %v2677_v36, %v1461_v45  ;;  %v2680_v55 = vadd.f32 %v2679_v46, %v2678_v43  ;;  %v2744_v53 = vadd.f32 %v2743_v7, %v2742_v61  ;;  %v3584_v11 = vadd.f32 %v2741_v44, %v3483_v9 }
 0x186   : > { %v1472_v9 = vadd.f32 %v3426_v5, %v3435_v18  ;;  %v1477_v5 = vadd.f32 %v3428_v12, %v3435_v18 }
 0x187   : > { %v3586_v58 = vadd.f32 %v2680_v55, %v1464_v48  ;;  %v3589_v52 = vadd.f32 %v2744_v53, %v3485_v15 }
 0x189   : > { %v2681_v63 = vpop.f32.mrb[72].mxu1  ;;  %v2745_v6 = vpop.f32.mrb[72].mxu0 }
 0x18a   : > { %v2682_v32 = vpop.f32.mrb[73].mxu1  ;;  %v2746_v20 = vpop.f32.mrb[73].mxu0 }
 0x18b   : > { %v2683_v24 = vadd.f32 %v2682_v32, %v2681_v63  ;;  %v2747_v13 = vadd.f32 %v2746_v20, %v2745_v6  ;;  %v2684_v56 = vpop.f32.mrb[74].mxu1  ;;  %v2748_v14 = vpop.f32.mrb[74].mxu0 }
 0x18c   : > { %v2685_v19 = vpop.f32.mrb[75].mxu1  ;;  %v2749_v27 = vpop.f32.mrb[75].mxu0 }
 0x18d   : > { %v3595_v62 = vadd.f32 %v2683_v24, %v1469_v57  ;;  %v2686_v15 = vadd.f32 %v2685_v19, %v2684_v56  ;;  %v2750_v49 = vadd.f32 %v2749_v27, %v2748_v14  ;;  %v3598_v30 = vadd.f32 %v2747_v13, %v3492_v35 }
 0x18e   : > { %v1480_v35 = vadd.f32 %v3430_v17, %v3435_v18 }
 0x18f   : > { %v3600_v28 = vadd.f32 %v2686_v15, %v1472_v9  ;;  %v3603_v0 = vadd.f32 %v2750_v49, %v3496_v10 }
 0x191   : > { %v2687_v39 = vpop.f32.mrb[76].mxu1  ;;  %v2751_v37 = vpop.f32.mrb[76].mxu0 }
 0x192   : > { %v2688_v38 = vpop.f32.mrb[77].mxu1  ;;  %v2752_v42 = vpop.f32.mrb[77].mxu0 }
 0x193   : > { %v2689_v45 = vadd.f32 %v2688_v38, %v2687_v39  ;;  %v2753_v36 = vadd.f32 %v2752_v42, %v2751_v37  ;;  %v2690_v44 = vpop.f32.mrb[78].mxu1  ;;  %v2754_v43 = vpop.f32.mrb[78].mxu0 }
 0x194   : > { %v2691_v61 = vpop.f32.mrb[79].mxu1  ;;  %v2755_v48 = vpop.f32.mrb[79].mxu0 }
 0x195   : > { %v3609_v46 = vadd.f32 %v2689_v45, %v1477_v5  ;;  %v2692_v10 = vadd.f32 %v2691_v61, %v2690_v44  ;;  %v2756_v7 = vadd.f32 %v2755_v48, %v2754_v43  ;;  %v3612_v55 = vadd.f32 %v2753_v36, %v3503_v50 }
 0x197   : > { %v3614_v53 = vadd.f32 %v2692_v10, %v1480_v35  ;;  %v3617_v12 = vadd.f32 %v2756_v7, %v3507_v2 }
 0x199   : > { %v2757_v63 = vpop.f32.mrb[80].mxu0  ;;  %v2829_v6 = vpop.f32.mrb[80].mxu1 }
 0x19a   : > { %v1848_v32 = vadd.f32 %v2829_v6, %v3528_v60  ;;  %v2758_v17 = vpop.f32.mrb[81].mxu0  ;;  %v1839_v18 = vpop.f32.mrb[81].mxu1 }
 0x19b   : > { %v2759_v20 = vadd.f32 %v2758_v17, %v2757_v63  ;;  %v1840_v57 = vadd.f32 %v1839_v18, %v3515_v29  ;;  %v2760_v24 = vpop.f32.mrb[82].mxu0  ;;  %v2830_v13 = vpop.f32.mrb[82].mxu1 }
 0x19c   : > { %v1968_v56 = vmax.f32 %v1848_v32, 0.0  ;;  %v1851_v50 = vadd.f32 %v2830_v13, %v3533_v3  ;;  %v2761_v14 = vpop.f32.mrb[83].mxu0  ;;  %v1842_v9 = vpop.f32.mrb[83].mxu1 }
 0x19d   : > { %v1966_v2 = vmax.f32 %v1840_v57, 0.0  ;;  %v2762_v60 = vadd.f32 %v2761_v14, %v2760_v24  ;;  %v1843_v29 = vadd.f32 %v1842_v9, %v3520_v33  ;;  %v3630_v19 = vadd.f32 %v2759_v20, %v3512_v25 }
 0x19e   : > { %v2439_v27 = vpack.c.bf16 %v1968_v56, %v1968_v56  ;;  %v1969_v3 = vmax.f32 %v1851_v50, 0.0 }
 0x19f   : > { %v2437_v15 = vpack.c.bf16 %v1966_v2, %v1966_v2  ;;  %v1967_v49 = vmax.f32 %v1843_v29, 0.0  ;;  %v3633_v39 = vadd.f32 %v2762_v60, %v3517_v51 }
 0x1a0   : > { %2129 = vst.msk [vmem:[%s3626_s26 + $0x8] sm:$0xf] %vm2126_vm1, %v2439_v27  ;;  %v2440_v37 = vpack.c.bf16 %v1969_v3, %v1969_v3 }
 0x1a1   : > { %2127 = vst.msk [vmem:[%s3626_s26] sm:$0xf] %vm2126_vm1, %v2437_v15  ;;  %v2438_v38 = vpack.c.bf16 %v1967_v49, %v1967_v49  ;;  %v2763_v42 = vpop.f32.mrb[84].mxu0  ;;  %v2833_v5 = vpop.f32.mrb[84].mxu1 }
 0x1a2   : > { %2130 = vst.msk [vmem:[%s3626_s26 + $0xc] sm:$0xf] %vm2126_vm1, %v2440_v37  ;;  %v1864_v25 = vadd.f32 %v2833_v5, %v3556_v59  ;;  %v2764_v33 = vpop.f32.mrb[85].mxu0  ;;  %v1855_v45 = vpop.f32.mrb[85].mxu1 }
 0x1a3   : > { %2128 = vst.msk [vmem:[%s3626_s26 + $0x4] sm:$0xf] %vm2126_vm1, %v2438_v38  ;;  %v2765_v36 = vadd.f32 %v2764_v33, %v2763_v42  ;;  %v1856_v51 = vadd.f32 %v1855_v45, %v3542_v26  ;;  %v2766_v44 = vpop.f32.mrb[86].mxu0  ;;  %v2834_v43 = vpop.f32.mrb[86].mxu1 }
 0x1a4   : > { %v1972_v35 = vmax.f32 %v1864_v25, 0.0  ;;  %v1867_v61 = vadd.f32 %v2834_v43, %v3561_v16  ;;  %v2767_v48 = vpop.f32.mrb[87].mxu0  ;;  %v1858_v10 = vpop.f32.mrb[87].mxu1 }
 0x1a5   : > { %v1970_v7 = vmax.f32 %v1856_v51, 0.0  ;;  %v2768_v63 = vadd.f32 %v2767_v48, %v2766_v44  ;;  %v1859_v59 = vadd.f32 %v1858_v10, %v3547_v23  ;;  %v3648_v6 = vadd.f32 %v2765_v36, %v3525_v8 }
 0x1a6   : > { %v2443_v32 = vpack.c.bf16 %v1972_v35, %v1972_v35  ;;  %v1973_v26 = vmax.f32 %v1867_v61, 0.0 }
 0x1a7   : > { %v2441_v17 = vpack.c.bf16 %v1970_v7, %v1970_v7  ;;  %v1971_v18 = vmax.f32 %v1859_v59, 0.0  ;;  %v3651_v20 = vadd.f32 %v2768_v63, %v3530_v1 }
 0x1a8   : > { %2133 = vst.msk [vmem:[%s3626_s26 + $0x18] sm:$0xf] %vm2126_vm1, %v2443_v32  ;;  %v2444_v16 = vpack.c.bf16 %v1973_v26, %v1973_v26 }
 0x1a9   : > { %2131 = vst.msk [vmem:[%s3626_s26 + $0x10] sm:$0xf] %vm2126_vm1, %v2441_v17  ;;  %v2442_v57 = vpack.c.bf16 %v1971_v18, %v1971_v18  ;;  %v2769_v24 = vpop.f32.mrb[88].mxu0  ;;  %v2837_v13 = vpop.f32.mrb[88].mxu1 }
 0x1aa   : > { %2134 = vst.msk [vmem:[%s3626_s26 + $0x1c] sm:$0xf] %vm2126_vm1, %v2444_v16  ;;  %v1880_v8 = vadd.f32 %v2837_v13, %v3584_v11  ;;  %v2770_v23 = vpop.f32.mrb[89].mxu0  ;;  %v1871_v56 = vpop.f32.mrb[89].mxu1 }
 0x1ab   : > { %2132 = vst.msk [vmem:[%s3626_s26 + $0x14] sm:$0xf] %vm2126_vm1, %v2442_v57  ;;  %v2771_v50 = vadd.f32 %v2770_v23, %v2769_v24  ;;  %v1872_v1 = vadd.f32 %v1871_v56, %v3570_v54  ;;  %v2772_v14 = vpop.f32.mrb[90].mxu0  ;;  %v2838_v9 = vpop.f32.mrb[90].mxu1 }
 0x1ac   : > { %v1976_v2 = vmax.f32 %v1880_v8, 0.0  ;;  %v1883_v60 = vadd.f32 %v2838_v9, %v3589_v52  ;;  %v2773_v29 = vpop.f32.mrb[91].mxu0  ;;  %v1874_v27 = vpop.f32.mrb[91].mxu1 }
 0x1ad   : > { %v1974_v3 = vmax.f32 %v1872_v1, 0.0  ;;  %v2774_v15 = vadd.f32 %v2773_v29, %v2772_v14  ;;  %v1875_v11 = vadd.f32 %v1874_v27, %v3575_v40  ;;  %v3666_v49 = vadd.f32 %v2771_v50, %v3539_v22 }
 0x1ae   : > { %v2447_v37 = vpack.c.bf16 %v1976_v2, %v1976_v2  ;;  %v1977_v54 = vmax.f32 %v1883_v60, 0.0 }
 0x1af   : > { %v2445_v38 = vpack.c.bf16 %v1974_v3, %v1974_v3  ;;  %v1975_v42 = vmax.f32 %v1875_v11, 0.0  ;;  %v3669_v5 = vadd.f32 %v2774_v15, %v3544_v4 }
 0x1b0   : > { %2137 = vst.msk [vmem:[%s3626_s26 + $0x28] sm:$0xf] %vm2126_vm1, %v2447_v37  ;;  %v2448_v52 = vpack.c.bf16 %v1977_v54, %v1977_v54 }
 0x1b1   : > { %2135 = vst.msk [vmem:[%s3626_s26 + $0x20] sm:$0xf] %vm2126_vm1, %v2445_v38  ;;  %v2446_v25 = vpack.c.bf16 %v1975_v42, %v1975_v42  ;;  %v2775_v33 = vpop.f32.mrb[92].mxu0  ;;  %v2841_v45 = vpop.f32.mrb[92].mxu1 }
 0x1b2   : > { %2138 = vst.msk [vmem:[%s3626_s26 + $0x2c] sm:$0xf] %vm2126_vm1, %v2448_v52  ;;  %v1896_v22 = vadd.f32 %v2841_v45, %v3612_v55  ;;  %v2776_v40 = vpop.f32.mrb[93].mxu0  ;;  %v1887_v36 = vpop.f32.mrb[93].mxu1 }
 0x1b3   : > { %2136 = vst.msk [vmem:[%s3626_s26 + $0x24] sm:$0xf] %vm2126_vm1, %v2446_v25  ;;  %v2777_v51 = vadd.f32 %v2776_v40, %v2775_v33  ;;  %v1888_v4 = vadd.f32 %v1887_v36, %v3598_v30  ;;  %v2778_v44 = vpop.f32.mrb[94].mxu0  ;;  %v2842_v43 = vpop.f32.mrb[94].mxu1 }
 0x1b4   : > { %v1980_v35 = vmax.f32 %v1896_v22, 0.0  ;;  %v1899_v61 = vadd.f32 %v2842_v43, %v3617_v12  ;;  %v2779_v48 = vpop.f32.mrb[95].mxu0  ;;  %v1890_v10 = vpop.f32.mrb[95].mxu1 }
 0x1b5   : > { %v1978_v7 = vmax.f32 %v1888_v4, 0.0  ;;  %v2780_v63 = vadd.f32 %v2779_v48, %v2778_v44  ;;  %v1891_v55 = vadd.f32 %v1890_v10, %v3603_v0  ;;  %v1767_v59 = vadd.f32 %v2777_v51, %v3553_v31 }
 0x1b6   : > { %v2451_v32 = vpack.c.bf16 %v1980_v35, %v1980_v35  ;;  %v1981_v26 = vmax.f32 %v1899_v61, 0.0 }
 0x1b7   : > { %v2449_v30 = vpack.c.bf16 %v1978_v7, %v1978_v7  ;;  %v1979_v17 = vmax.f32 %v1891_v55, 0.0  ;;  %v1770_v18 = vadd.f32 %v2780_v63, %v3558_v34 }
 0x1b8   : > { %2141 = vst.msk [vmem:[%s3626_s26 + $0x38] sm:$0xf] %vm2126_vm1, %v2451_v32  ;;  %v2452_v16 = vpack.c.bf16 %v1981_v26, %v1981_v26 }
 0x1b9   : > { %2139 = vst.msk [vmem:[%s3626_s26 + $0x30] sm:$0xf] %vm2126_vm1, %v2449_v30  ;;  %v2450_v12 = vpack.c.bf16 %v1979_v17, %v1979_v17  ;;  %v2781_v57 = vpop.f32.mrb[96].mxu0  ;;  %v2845_v24 = vpop.f32.mrb[96].mxu1 }
 0x1ba   : > { %2142 = vst.msk [vmem:[%s3626_s26 + $0x3c] sm:$0xf] %vm2126_vm1, %v2452_v16  ;;  %v1912_v0 = vadd.f32 %v2845_v24, %v3648_v6  ;;  %v2782_v31 = vpop.f32.mrb[97].mxu0  ;;  %v1903_v13 = vpop.f32.mrb[97].mxu1 }
 0x1bb   : > { %2140 = vst.msk [vmem:[%s3626_s26 + $0x34] sm:$0xf] %vm2126_vm1, %v2450_v12  ;;  %v2783_v8 = vadd.f32 %v2782_v31, %v2781_v57  ;;  %v1904_v23 = vadd.f32 %v1903_v13, %v3630_v19  ;;  %v2784_v34 = vpop.f32.mrb[98].mxu0  ;;  %v2846_v56 = vpop.f32.mrb[98].mxu1 }
 0x1bc   : > { %v1984_v50 = vmax.f32 %v1912_v0, 0.0  ;;  %v1915_v1 = vadd.f32 %v2846_v56, %v3651_v20  ;;  %v2785_v14 = vpop.f32.mrb[99].mxu0  ;;  %v1906_v9 = vpop.f32.mrb[99].mxu1 }
 0x1bd   : > { %v1982_v2 = vmax.f32 %v1904_v23, 0.0  ;;  %v2786_v60 = vadd.f32 %v2785_v14, %v2784_v34  ;;  %v1907_v6 = vadd.f32 %v1906_v9, %v3633_v39  ;;  %v1775_v29 = vadd.f32 %v2783_v8, %v3567_v21 }
 0x1be   : > { %v2455_v27 = vpack.c.bf16 %v1984_v50, %v1984_v50  ;;  %v1985_v3 = vmax.f32 %v1915_v1, 0.0 }
 0x1bf   : > { %v2453_v19 = vpack.c.bf16 %v1982_v2, %v1982_v2  ;;  %v1983_v15 = vmax.f32 %v1907_v6, 0.0  ;;  %v1778_v11 = vadd.f32 %v2786_v60, %v3572_v41 }
 0x1c0   : > { %2145 = vst.msk [vmem:[%s3626_s26 + $0x48] sm:$0xf] %vm2126_vm1, %v2455_v27  ;;  %v2456_v37 = vpack.c.bf16 %v1985_v3, %v1985_v3 }
 0x1c1   : > { %2143 = vst.msk [vmem:[%s3626_s26 + $0x40] sm:$0xf] %vm2126_vm1, %v2453_v19  ;;  %v2454_v20 = vpack.c.bf16 %v1983_v15, %v1983_v15  ;;  %v2787_v54 = vpop.f32.mrb[100].mxu0  ;;  %v2849_v38 = vpop.f32.mrb[100].mxu1 }
 0x1c2   : > { %2146 = vst.msk [vmem:[%s3626_s26 + $0x4c] sm:$0xf] %vm2126_vm1, %v2456_v37  ;;  %v1928_v39 = vadd.f32 %v2849_v38, %v1767_v59  ;;  %v2788_v42 = vpop.f32.mrb[101].mxu0  ;;  %v1919_v21 = vpop.f32.mrb[101].mxu1 }
 0x1c3   : > { %2144 = vst.msk [vmem:[%s3626_s26 + $0x44] sm:$0xf] %vm2126_vm1, %v2454_v20  ;;  %v2789_v52 = vadd.f32 %v2788_v42, %v2787_v54  ;;  %v1920_v25 = vadd.f32 %v1919_v21, %v3666_v49  ;;  %v2790_v41 = vpop.f32.mrb[102].mxu0  ;;  %v2850_v33 = vpop.f32.mrb[102].mxu1 }
 0x1c4   : > { %v1988_v45 = vmax.f32 %v1928_v39, 0.0  ;;  %v1931_v22 = vadd.f32 %v2850_v33, %v1770_v18  ;;  %v2791_v40 = vpop.f32.mrb[103].mxu0  ;;  %v1922_v36 = vpop.f32.mrb[103].mxu1 }
 0x1c5   : > { %v1986_v51 = vmax.f32 %v1920_v25, 0.0  ;;  %v2792_v4 = vadd.f32 %v2791_v40, %v2790_v41  ;;  %v1923_v44 = vadd.f32 %v1922_v36, %v3669_v5  ;;  %v1783_v43 = vadd.f32 %v2789_v52, %v3581_v47 }
 0x1c6   : > { %v2459_v35 = vpack.c.bf16 %v1988_v45, %v1988_v45  ;;  %v1989_v61 = vmax.f32 %v1931_v22, 0.0 }
 0x1c7   : > { %v2457_v48 = vpack.c.bf16 %v1986_v51, %v1986_v51  ;;  %v1987_v49 = vmax.f32 %v1923_v44, 0.0  ;;  %v1786_v10 = vadd.f32 %v2792_v4, %v3586_v58 }
 0x1c8   : > { %2149 = vst.msk [vmem:[%s3626_s26 + $0x58] sm:$0xf] %vm2126_vm1, %v2459_v35  ;;  %v2460_v7 = vpack.c.bf16 %v1989_v61, %v1989_v61 }
 0x1c9   : > { %2147 = vst.msk [vmem:[%s3626_s26 + $0x50] sm:$0xf] %vm2126_vm1, %v2457_v48  ;;  %v2458_v63 = vpack.c.bf16 %v1987_v49, %v1987_v49  ;;  %v2793_v55 = vpop.f32.mrb[104].mxu0  ;;  %v2853_v59 = vpop.f32.mrb[104].mxu1 }
 0x1ca   : > { %2150 = vst.msk [vmem:[%s3626_s26 + $0x5c] sm:$0xf] %vm2126_vm1, %v2460_v7  ;;  %v1944_v5 = vadd.f32 %v2853_v59, %v1783_v43  ;;  %v2794_v32 = vpop.f32.mrb[105].mxu0  ;;  %v1935_v47 = vpop.f32.mrb[105].mxu1 }
 0x1cb   : > { %2148 = vst.msk [vmem:[%s3626_s26 + $0x54] sm:$0xf] %vm2126_vm1, %v2458_v63  ;;  %v2795_v26 = vadd.f32 %v2794_v32, %v2793_v55  ;;  %v1936_v30 = vadd.f32 %v1935_v47, %v1775_v29  ;;  %v2796_v17 = vpop.f32.mrb[106].mxu0  ;;  %v2854_v58 = vpop.f32.mrb[106].mxu1 }
 0x1cc   : > { %v1992_v18 = vmax.f32 %v1944_v5, 0.0  ;;  %v1947_v16 = vadd.f32 %v2854_v58, %v1786_v10  ;;  %v2797_v12 = vpop.f32.mrb[107].mxu0  ;;  %v1938_v57 = vpop.f32.mrb[107].mxu1 }
 0x1cd   : > { %v1990_v24 = vmax.f32 %v1936_v30, 0.0  ;;  %v2798_v0 = vadd.f32 %v2797_v12, %v2796_v17  ;;  %v1939_v31 = vadd.f32 %v1938_v57, %v1778_v11  ;;  %v1791_v13 = vadd.f32 %v2795_v26, %v3595_v62 }
 0x1ce   : > { %v2463_v8 = vpack.c.bf16 %v1992_v18, %v1992_v18  ;;  %v1993_v23 = vmax.f32 %v1947_v16, 0.0 }
 0x1cf   : > { %v2461_v34 = vpack.c.bf16 %v1990_v24, %v1990_v24  ;;  %v1991_v56 = vmax.f32 %v1939_v31, 0.0  ;;  %v1794_v50 = vadd.f32 %v2798_v0, %v3600_v28 }
 0x1d0   : > { %2153 = vst.msk [vmem:[%s3626_s26 + $0x68] sm:$0xf] %vm2126_vm1, %v2463_v8  ;;  %v2464_v1 = vpack.c.bf16 %v1993_v23, %v1993_v23 }
 0x1d1   : > { %2151 = vst.msk [vmem:[%s3626_s26 + $0x60] sm:$0xf] %vm2126_vm1, %v2461_v34  ;;  %v2462_v14 = vpack.c.bf16 %v1991_v56, %v1991_v56  ;;  %v2799_v9 = vpop.f32.mrb[108].mxu0  ;;  %v2857_v2 = vpop.f32.mrb[108].mxu1 }
 0x1d2   : > { %2154 = vst.msk [vmem:[%s3626_s26 + $0x6c] sm:$0xf] %vm2126_vm1, %v2464_v1  ;;  %v2800_v60 = vpop.f32.mrb[109].mxu0  ;;  %v1951_v6 = vpop.f32.mrb[109].mxu1 }
 0x1d3   : > { %2152 = vst.msk [vmem:[%s3626_s26 + $0x64] sm:$0xf] %vm2126_vm1, %v2462_v14  ;;  %v2801_v62 = vadd.f32 %v2800_v60, %v2799_v9  ;;  %v1952_v29 = vadd.f32 %v1951_v6, %v1791_v13  ;;  %v2802_v27 = vpop.f32.mrb[110].mxu0  ;;  %v2858_v3 = vpop.f32.mrb[110].mxu1 }
 0x1d4   : > { %v2803_v28 = vpop.f32.mrb[111].mxu0  ;;  %v1954_v19 = vpop.f32.mrb[111].mxu1 }
 0x1d5   : > { %v1799_v15 = vadd.f32 %v2801_v62, %v3609_v46  ;;  %v1994_v11 = vmax.f32 %v1952_v29, 0.0  ;;  %v2804_v37 = vadd.f32 %v2803_v28, %v2802_v27  ;;  %v1955_v20 = vadd.f32 %v1954_v19, %v1794_v50 }
 0x1d7   : > { %v1960_v54 = vadd.f32 %v2857_v2, %v1799_v15  ;;  %v2465_v38 = vpack.c.bf16 %v1994_v11, %v1994_v11  ;;  %v1802_v39 = vadd.f32 %v2804_v37, %v3614_v53  ;;  %v1995_v42 = vmax.f32 %v1955_v20, 0.0 }
 0x1d9   : > { %v1996_v21 = vmax.f32 %v1960_v54, 0.0  ;;  %2155 = vst.msk [vmem:[%s3626_s26 + $0x70] sm:$0xf] %vm2126_vm1, %v2465_v38  ;;  %v1963_v52 = vadd.f32 %v2858_v3, %v1802_v39  ;;  %v2466_v25 = vpack.c.bf16 %v1995_v42, %v1995_v42 }
 0x1db   : > { %v2467_v41 = vpack.c.bf16 %v1996_v21, %v1996_v21  ;;  %v1997_v33 = vmax.f32 %v1963_v52, 0.0  ;;  %2156 = vst.msk [vmem:[%s3626_s26 + $0x74] sm:$0xf] %vm2126_vm1, %v2466_v25 }
 0x1dd   : > { %2157 = vst.msk [vmem:[%s3626_s26 + $0x78] sm:$0xf] %vm2126_vm1, %v2467_v41  ;;  %v2468_v46 = vpack.c.bf16 %v1997_v33, %v1997_v33 }
 0x1df   : > { %2158 = vst.msk [vmem:[%s3626_s26 + $0x7c] sm:$0xf] %vm2126_vm1, %v2468_v46 }
 0x1e0 PF: > { %s13_s12 = sadd.s32 1, %s3100_s12  }
 0x1e1   : > { %p10_p4 = scmp.ge.s32.totalorder %s13_s12, 4  }
 0x1e3   :  { %12 = sbr.rel (!%p10_p4) target bundleno = 1 (0x1), region = 62 }

// kernel: attention_forward.6
= control target key start
LH: loop header
LB: loop body
LE: loop exit
PB: predicated region body
PF: predicated region fallthrough
CT: control target
= control target key end

     0   :  { %vm595_vm0 = vcmask 1043456   ;;  %vm570_vm1 = vcmask 719872   ;;  %vm970_vm2 = vcmask 191488   ;;  %s1768_s1 = inlined_call_operand.vmem [shape: bf16[600,24], index: 1, kind: input, shape index: {}]   ;;  %s1769_s0 = inlined_call_operand.vmem [shape: bf16[128,600], index: 0, kind: input, shape index: {}]   ;;  %s1770_s2 = inlined_call_operand.vmem [shape: f32[1,24], index: 2, kind: input, shape index: {}]   ;;  %s1771_s3 = inlined_call_operand.vmem [shape: bf16[128,24], index: 3, kind: output, shape index: {}]  }
   0x1   :  { %v1294_v0 = vld [vmem:[%s1768_s1 + $0x40] sm:$0xff]   ;;  %v1298_v4 = vld [vmem:[%s1768_s1 + $0x48] sm:$0xff]   ;;  %v1302_v8 = vld [vmem:[%s1768_s1 + $0x50] sm:$0xff]  }
   0x2   :  { %v1295_v1 = vld [vmem:[%s1768_s1 + $0xc0] sm:$0xff]   ;;  %1110 = vmatprep.subr.bf16.mxu0 %v1294_v0  ;;  %v1299_v5 = vld [vmem:[%s1768_s1 + $0xc8] sm:$0xff]   ;;  %v1303_v9 = vld [vmem:[%s1768_s1 + $0xd0] sm:$0xff]  }
   0x3   :  { %v1296_v2 = vld [vmem:[%s1768_s1] sm:$0xff]   ;;  %1174 = vmatprep.subr.bf16.mxu1 %v1295_v1  ;;  %v1300_v6 = vld [vmem:[%s1768_s1 + $0x8] sm:$0xff]   ;;  %v1304_v10 = vld [vmem:[%s1768_s1 + $0x10] sm:$0xff]  }
   0x4   :  { %v1297_v3 = vld [vmem:[%s1768_s1 + $0x80] sm:$0xff]   ;;  %1111 = vmatpush3.bf16.msra.mxu0 %v1296_v2  ;;  %v1301_v7 = vld [vmem:[%s1768_s1 + $0x88] sm:$0xff]   ;;  %v1305_v11 = vld [vmem:[%s1768_s1 + $0x90] sm:$0xff]  }
   0x5   :  { %1175 = vmatpush3.bf16.msra.mxu1 %v1297_v3  ;;  %1112 = vmatprep.subr.bf16.mxu0 %v1298_v4  ;;  %v1306_v12 = vld [vmem:[%s1768_s1 + $0x58] sm:$0xff]   ;;  %v1310_v16 = vld [vmem:[%s1768_s1 + $0x60] sm:$0xff]   ;;  %v1314_v20 = vld [vmem:[%s1768_s1 + $0x68] sm:$0xff]  }
   0x6   :  { %1176 = vmatprep.subr.bf16.mxu1 %v1299_v5  ;;  %v1307_v13 = vld [vmem:[%s1768_s1 + $0xd8] sm:$0xff]   ;;  %v1311_v17 = vld [vmem:[%s1768_s1 + $0xe0] sm:$0xff]   ;;  %v1315_v21 = vld [vmem:[%s1768_s1 + $0xe8] sm:$0xff]  }
   0x7   :  { %v1308_v14 = vld [vmem:[%s1768_s1 + $0x18] sm:$0xff]   ;;  %v1312_v18 = vld [vmem:[%s1768_s1 + $0x20] sm:$0xff]   ;;  %v1316_v22 = vld [vmem:[%s1768_s1 + $0x28] sm:$0xff]  }
   0x8   :  { %1113 = vmatpush3.bf16.msra.mxu0 %v1300_v6  ;;  %v1309_v15 = vld [vmem:[%s1768_s1 + $0x98] sm:$0xff]   ;;  %v1313_v19 = vld [vmem:[%s1768_s1 + $0xa0] sm:$0xff]   ;;  %v1317_v23 = vld [vmem:[%s1768_s1 + $0xa8] sm:$0xff]  }
   0x9   :  { %1177 = vmatpush3.bf16.msra.mxu1 %v1301_v7  ;;  %1114 = vmatprep.subr.bf16.mxu0 %v1302_v8  ;;  %v1318_v24 = vld [vmem:[%s1768_s1 + $0x70] sm:$0xff]   ;;  %v1322_v28 = vld [vmem:[%s1768_s1 + $0x78] sm:$0xff]   ;;  %v1331_v35 = vld [vmem:[%s1769_s0 + $0xc] ss:$20 sps:$4 sm:$0xff]  }
   0xa   :  { %1178 = vmatprep.subr.bf16.mxu1 %v1303_v9  ;;  %v1319_v25 = vld [vmem:[%s1768_s1 + $0xf0] sm:$0xff]   ;;  %v1323_v29 = vld [vmem:[%s1768_s1 + $0xf8] sm:$0xff]   ;;  %v1332_v36 = vld [vmem:[%s1768_s1 + $0x100] sm:$0xff]   ;;  %728 = vmatprep.mubr.bf16.mxu1 %v1331_v35 }
   0xb   :  { %v1320_v26 = vld [vmem:[%s1768_s1 + $0x30] sm:$0xff]   ;;  %v1324_v30 = vld [vmem:[%s1768_s1 + $0x38] sm:$0xff]   ;;  %v1333_v37 = vld [vmem:[%s1769_s0 + $0x2c] ss:$20 sps:$4 sm:$0xff]  }
   0xc   :  { %1115 = vmatpush3.bf16.msra.mxu0 %v1304_v10  ;;  %v1321_v27 = vld [vmem:[%s1768_s1 + $0xb0] sm:$0xff]   ;;  %v1325_v31 = vld [vmem:[%s1768_s1 + $0xb8] sm:$0xff]   ;;  %v1339_v39 = vld [vmem:[%s1768_s1 + $0x108] sm:$0xff]  }
   0xd   :  { %1179 = vmatpush3.bf16.msra.mxu1 %v1305_v11  ;;  %1116 = vmatprep.subr.bf16.mxu0 %v1306_v12  ;;  %v1326_v32 = vld [vmem:[%s1769_s0] ss:$20 sps:$4 sm:$0xff]   ;;  %v1328_v33 = vld [vmem:[%s1769_s0 + $0x4] ss:$20 sps:$4 sm:$0xff]   ;;  %v1329_v34 = vld [vmem:[%s1769_s0 + $0x8] ss:$20 sps:$4 sm:$0xff]  }
   0xe   :  { %1180 = vmatprep.subr.bf16.mxu1 %v1307_v13  ;;  %631 = vmatprep.mubr.bf16.mxu0 %v1328_v33  ;;  %v1335_v38 = vld [vmem:[%s1769_s0 + $0x34] ss:$20 sps:$4 sm:$0xff]   ;;  %v1338_v41 = vld [vmem:[%s1769_s0 + $0x30] ss:$20 sps:$4 sm:$0xff]   ;;  %v1345_v46 = vld [vmem:[%s1769_s0 + $0x58] ss:$20 sps:$4 sm:$0xff]  }
   0xf   :  { %v1337_v40 = vld [vmem:[%s1769_s0 + $0x28] ss:$20 sps:$4 sm:$0xff]   ;;  %v1346_v44 = vld [vmem:[%s1768_s1 + $0x110] sm:$0xff]   ;;  %v1349_v49 = vld [vmem:[%s1769_s0 + $0x84] ss:$20 sps:$4 sm:$0xff]  }
  0x10   :  { %1117 = vmatpush3.bf16.msra.mxu0 %v1308_v14  ;;  %v1340_v42 = vld [vmem:[%s1769_s0 + $0x54] ss:$20 sps:$4 sm:$0xff]   ;;  %v1342_v43 = vld [vmem:[%s1769_s0 + $0x5c] ss:$20 sps:$4 sm:$0xff]   ;;  %v1366_v50 = vld [vmem:[%s1768_s1 + $0x120] sm:$0xff]  }
  0x11   :  { %1181 = vmatpush3.bf16.msra.mxu1 %v1309_v15  ;;  %1118 = vmatprep.subr.bf16.mxu0 %v1310_v16  ;;  %v1344_v45 = vld [vmem:[%s1769_s0 + $0x50] ss:$20 sps:$4 sm:$0xff]   ;;  %v1359_v48 = vld [vmem:[%s1768_s1 + $0x118] sm:$0xff]   ;;  %v1352_v52 = vld [vmem:[%s1769_s0 + $0x80] ss:$20 sps:$4 sm:$0xff]  }
  0x12   :  { %1182 = vmatprep.subr.bf16.mxu1 %v1311_v17  ;;  %v1347_v47 = vld [vmem:[%s1769_s0 + $0x7c] ss:$20 sps:$4 sm:$0xff]   ;;  %v1351_v51 = vld [vmem:[%s1769_s0 + $0x78] ss:$20 sps:$4 sm:$0xff]   ;;  %v1373_v53 = vld [vmem:[%s1768_s1 + $0x128] ss:$0 sps:$4 sm:$0xff]  }
  0x13   :  { %v1353_v54 = vld [vmem:[%s1769_s0 + $0xa4] ss:$20 sps:$4 sm:$0xff]   ;;  %v1355_v55 = vld [vmem:[%s1769_s0 + $0xac] ss:$20 sps:$4 sm:$0xff]   ;;  %v597_v56 = vsel %vm595_vm0, %v1373_v53, 0 }
  0x14   :  { %1119 = vmatpush3.bf16.msra.mxu0 %v1312_v18  ;;  %v1357_v57 = vld [vmem:[%s1769_s0 + $0xa0] ss:$20 sps:$4 sm:$0xff]   ;;  %v1358_v58 = vld [vmem:[%s1769_s0 + $0xa8] ss:$20 sps:$4 sm:$0xff]   ;;  %v1365_v62 = vld [vmem:[%s1769_s0 + $0xd0] ss:$20 sps:$4 sm:$0xff]  }
  0x15   :  { %1183 = vmatpush3.bf16.msra.mxu1 %v1313_v19  ;;  %1120 = vmatprep.subr.bf16.mxu0 %v1314_v20  ;;  %v1360_v59 = vld [vmem:[%s1769_s0 + $0xcc] ss:$20 sps:$4 sm:$0xff]   ;;  %v1362_v60 = vld [vmem:[%s1769_s0 + $0xd4] ss:$20 sps:$4 sm:$0xff]   ;;  %v1369_v0 = vld [vmem:[%s1769_s0 + $0xfc] ss:$20 sps:$4 sm:$0xff]  }
  0x16   :  { %1184 = vmatprep.subr.bf16.mxu1 %v1315_v21  ;;  %v1364_v61 = vld [vmem:[%s1769_s0 + $0xc8] ss:$20 sps:$4 sm:$0xff]   ;;  %v1371_v1 = vld [vmem:[%s1769_s0 + $0xf0] ss:$20 sps:$4 sm:$0xff]   ;;  %v1372_v2 = vld [vmem:[%s1769_s0 + $0xf8] ss:$20 sps:$4 sm:$0xff]  }
  0x17   :  { %v1367_v63 = vld [vmem:[%s1769_s0 + $0xf4] ss:$20 sps:$4 sm:$0xff]   ;;  %v1374_v3 = vld [vmem:[%s1769_s0 + $0x11c] ss:$20 sps:$4 sm:$0xff]   ;;  %v1376_v4 = vld [vmem:[%s1769_s0 + $0x124] ss:$20 sps:$4 sm:$0xff]  }
  0x18   :  { %1121 = vmatpush3.bf16.msra.mxu0 %v1316_v22  ;;  %v1378_v5 = vld [vmem:[%s1769_s0 + $0x118] ss:$20 sps:$4 sm:$0xff]   ;;  %v1379_v6 = vld [vmem:[%s1769_s0 + $0x120] ss:$20 sps:$4 sm:$0xff]   ;;  %v1380_v7 = vld [vmem:[%s1769_s0 + $0x10] ss:$20 sps:$4 sm:$0xff]  }
  0x19   :  { %1185 = vmatpush3.bf16.msra.mxu1 %v1317_v23  ;;  %1122 = vmatprep.subr.bf16.mxu0 %v1318_v24  ;;  %v1381_v8 = vld [vmem:[%s1769_s0 + $0xb0] ss:$20 sps:$4 sm:$0xff]   ;;  %v1382_v9 = vld [vmem:[%s1769_s0 + $0x38] ss:$20 sps:$4 sm:$0xff]   ;;  %v1384_v11 = vld [vmem:[%s1769_s0 + $0x60] ss:$20 sps:$4 sm:$0xff]  }
  0x1a   :  { %1186 = vmatprep.subr.bf16.mxu1 %v1319_v25  ;;  %v1383_v10 = vld [vmem:[%s1769_s0 + $0xd8] ss:$20 sps:$4 sm:$0xff]   ;;  %v1385_v12 = vld [vmem:[%s1769_s0 + $0x100] ss:$20 sps:$4 sm:$0xff]   ;;  %v1386_v13 = vld [vmem:[%s1769_s0 + $0x88] ss:$20 sps:$4 sm:$0xff]  }
  0x1b   :  { %v1387_v14 = vld [vmem:[%s1769_s0 + $0x128] ss:$20 sps:$4 sm:$0xff]   ;;  %v1653_v17 = vld [vmem:[%s1770_s2] ss:$0 sm:$0xff] }
  0x1c   :  { %1123 = vmatpush3.bf16.msra.mxu0 %v1320_v26 }
  0x1d   :  { %1187 = vmatpush3.bf16.msra.mxu1 %v1321_v27  ;;  %1124 = vmatprep.subr.bf16.mxu0 %v1322_v28 }
  0x1e   :  { %1188 = vmatprep.subr.bf16.mxu1 %v1323_v29 }
  0x20   :  { %1125 = vmatpush3.bf16.msra.mxu0 %v1324_v30 }
  0x21   :  { %1189 = vmatpush3.bf16.msra.mxu1 %v1325_v31  ;;  %1252 = vmatprep.subr.bf16.mxu0 %v1332_v36 }
  0x22   :  { %1280 = vmatprep.subr.bf16.mxu1 %v1332_v36 }
  0x23   :  { %632 = vmatmul.mubr.bf16.vlgmr.msra.gmra.mrb[0].mxu0 %v1326_v32 }
  0x24   :  { %729 = vmatmul.mubr.bf16.vlgmr.msra.gmra.mrb[0].mxu1 %v1329_v34  ;;  %1253 = vmatpush3.bf16.msra.mxu0 %v1332_v36 }
  0x25   :  { %1286 = vmatpush3.bf16.msra.mxu1 %v1332_v36  ;;  %639 = vmatprep.mubr.bf16.mxu0 %v1333_v37 }
  0x26   :  { %736 = vmatprep.mubr.bf16.mxu1 %v1335_v38  ;;  %1254 = vmatprep.subr.bf16.mxu0 %v1339_v39 }
  0x27   :  { %1281 = vmatprep.subr.bf16.mxu1 %v1339_v39 }
  0x28   :  { %1255 = vmatpush3.bf16.msra.mxu0 %v1339_v39 }
  0x29   :  { %1287 = vmatpush3.bf16.msra.mxu1 %v1339_v39  ;;  %1256 = vmatprep.subr.bf16.mxu0 %v1346_v44 }
  0x2a   :  { %1282 = vmatprep.subr.bf16.mxu1 %v1346_v44 }
  0x2b   :  { %640 = vmatmul.mubr.bf16.gmra.mrb[4].mxu0 %v1337_v40 }
  0x2c   :  { %737 = vmatmul.mubr.bf16.gmra.mrb[4].mxu1 %v1338_v41  ;;  %647 = vmatprep.mubr.bf16.mxu0 %v1340_v42 }
  0x2d   :  { %744 = vmatprep.mubr.bf16.mxu1 %v1342_v43  ;;  %1257 = vmatpush3.bf16.msra.mxu0 %v1346_v44 }
  0x2e   :  { %1288 = vmatpush3.bf16.msra.mxu1 %v1346_v44  ;;  %1258 = vmatprep.subr.bf16.mxu0 %v1359_v48 }
  0x2f   :  { %1283 = vmatprep.subr.bf16.mxu1 %v1359_v48 }
  0x31   :  { %1259 = vmatpush3.bf16.msra.mxu0 %v1359_v48 }
  0x32   :  { %1289 = vmatpush3.bf16.msra.mxu1 %v1359_v48  ;;  %1260 = vmatprep.subr.bf16.mxu0 %v1366_v50 }
  0x33   :  { %648 = vmatmul.mubr.bf16.gmra.mrb[8].mxu0 %v1344_v45  ;;  %1284 = vmatprep.subr.bf16.mxu1 %v1366_v50 }
  0x34   :  { %745 = vmatmul.mubr.bf16.gmra.mrb[8].mxu1 %v1345_v46  ;;  %655 = vmatprep.mubr.bf16.mxu0 %v1347_v47 }
  0x35   :  { %752 = vmatprep.mubr.bf16.mxu1 %v1349_v49  ;;  %1261 = vmatpush3.bf16.msra.mxu0 %v1366_v50 }
  0x36   :  { %1290 = vmatpush3.bf16.msra.mxu1 %v1366_v50  ;;  %1292 = vmatprep.subr.msk.bf16.mxu0 %vm595_vm0, %v1373_v53 }
  0x37   :  { %1293 = vmatprep.subr.msk.bf16.mxu1 %vm595_vm0, %v1373_v53 }
  0x39   :  { %1263 = vmatpush3.bf16.msra.mxu0 %v597_v56 }
  0x3a   :  { %1291 = vmatpush3.bf16.msra.mxu1 %v597_v56 }
  0x3b   :  { %656 = vmatmul.mubr.bf16.gmra.mrb[12].mxu0 %v1351_v51 }
  0x3c   :  { %753 = vmatmul.mubr.bf16.gmra.mrb[12].mxu1 %v1352_v52  ;;  %663 = vmatprep.mubr.bf16.mxu0 %v1353_v54 }
  0x3d   :  { %760 = vmatprep.mubr.bf16.mxu1 %v1355_v55 }
  0x43   :  { %664 = vmatmul.mubr.bf16.gmra.mrb[16].mxu0 %v1357_v57 }
  0x44   :  { %761 = vmatmul.mubr.bf16.gmra.mrb[16].mxu1 %v1358_v58  ;;  %671 = vmatprep.mubr.bf16.mxu0 %v1360_v59 }
  0x45   :  { %768 = vmatprep.mubr.bf16.mxu1 %v1362_v60 }
  0x4b   :  { %672 = vmatmul.mubr.bf16.gmra.mrb[20].mxu0 %v1364_v61 }
  0x4c   :  { %769 = vmatmul.mubr.bf16.gmra.mrb[20].mxu1 %v1365_v62  ;;  %679 = vmatprep.mubr.bf16.mxu0 %v1367_v63 }
  0x4d   :  { %776 = vmatprep.mubr.bf16.mxu1 %v1369_v0 }
  0x53   :  { %680 = vmatmul.mubr.bf16.gmra.mrb[24].mxu0 %v1371_v1 }
  0x54   :  { %777 = vmatmul.mubr.bf16.gmra.mrb[24].mxu1 %v1372_v2  ;;  %687 = vmatprep.mubr.bf16.mxu0 %v1374_v3 }
  0x55   :  { %784 = vmatprep.mubr.bf16.mxu1 %v1376_v4 }
  0x5b   :  { %688 = vmatmul.mubr.bf16.gmra.mrb[28].mxu0 %v1378_v5 }
  0x5c   :  { %785 = vmatmul.mubr.bf16.gmra.mrb[28].mxu1 %v1379_v6  ;;  %1264 = vmatprep.mubr.msk.bf16.mxu0 %vm570_vm1, %v1380_v7 }
  0x5d   :  { %1272 = vmatprep.mubr.msk.bf16.mxu1 %vm570_vm1, %v1381_v8 }
  0x63   :  { %1265 = vmatmul.mubr.msk.bf16.vlgmr.msra.gmra.mrb[32].mxu0 %vm570_vm1, %v1382_v9 }
  0x64   :  { %1273 = vmatmul.mubr.msk.bf16.vlgmr.msra.gmra.mrb[32].mxu1 %vm570_vm1, %v1383_v10  ;;  %1268 = vmatprep.mubr.msk.bf16.mxu0 %vm570_vm1, %v1384_v11 }
  0x65   :  { %1276 = vmatprep.mubr.msk.bf16.mxu1 %vm570_vm1, %v1385_v12 }
  0x6b   :  { %1269 = vmatmul.mubr.msk.bf16.gmra.mrb[36].mxu0 %vm570_vm1, %v1386_v13 }
  0x6c   :  { %1277 = vmatmul.mubr.msk.bf16.gmra.mrb[36].mxu1 %vm570_vm1, %v1387_v14 }
  0xf6   :  { %v1126_v15 = vpop.f32.mrb[0].mxu0 }
  0xf7   :  { %v1190_v16 = vpop.f32.mrb[0].mxu1  ;;  %v1127_v18 = vpop.f32.mrb[1].mxu0 }
  0xf8   :  { %v1128_v19 = vadd.f32 %v1127_v18, %v1126_v15  ;;  %v1191_v20 = vpop.f32.mrb[1].mxu1  ;;  %v1129_v21 = vpop.f32.mrb[2].mxu0 }
  0xf9   :  { %v1192_v22 = vadd.f32 %v1191_v20, %v1190_v16  ;;  %v1193_v23 = vpop.f32.mrb[2].mxu1  ;;  %v1130_v24 = vpop.f32.mrb[3].mxu0 }
  0xfa   :  { %v634_v25 = vadd.f32 %v1128_v19, %v1653_v17  ;;  %v1131_v26 = vadd.f32 %v1130_v24, %v1129_v21  ;;  %v1194_v27 = vpop.f32.mrb[3].mxu1 }
  0xfb   :  { %v1195_v28 = vadd.f32 %v1194_v27, %v1193_v23 }
  0xfc   :  { %v637_v29 = vadd.f32 %v1131_v26, %v1653_v17  ;;  %v1657_v30 = vadd.f32 %v1192_v22, %v634_v25 }
  0xfe   :  { %v1132_v31 = vpop.f32.mrb[4].mxu0  ;;  %v1659_v32 = vadd.f32 %v1195_v28, %v637_v29 }
  0xff   :  { %v1196_v33 = vpop.f32.mrb[4].mxu1  ;;  %v1133_v34 = vpop.f32.mrb[5].mxu0 }
 0x100   :  { %v1134_v35 = vadd.f32 %v1133_v34, %v1132_v31  ;;  %v1197_v36 = vpop.f32.mrb[5].mxu1  ;;  %v1135_v37 = vpop.f32.mrb[6].mxu0 }
 0x101   :  { %v1198_v38 = vadd.f32 %v1197_v36, %v1196_v33  ;;  %v1199_v39 = vpop.f32.mrb[6].mxu1  ;;  %v1136_v40 = vpop.f32.mrb[7].mxu0 }
 0x102   :  { %v642_v41 = vadd.f32 %v1134_v35, %v1653_v17  ;;  %v1137_v42 = vadd.f32 %v1136_v40, %v1135_v37  ;;  %v1200_v43 = vpop.f32.mrb[7].mxu1 }
 0x103   :  { %v1201_v44 = vadd.f32 %v1200_v43, %v1199_v39 }
 0x104   :  { %v645_v45 = vadd.f32 %v1137_v42, %v1653_v17  ;;  %v1663_v46 = vadd.f32 %v1198_v38, %v642_v41 }
 0x106   :  { %v1138_v47 = vpop.f32.mrb[8].mxu0  ;;  %v1665_v48 = vadd.f32 %v1201_v44, %v645_v45 }
 0x107   :  { %v1202_v49 = vpop.f32.mrb[8].mxu1  ;;  %v1139_v50 = vpop.f32.mrb[9].mxu0 }
 0x108   :  { %v1140_v51 = vadd.f32 %v1139_v50, %v1138_v47  ;;  %v1203_v52 = vpop.f32.mrb[9].mxu1  ;;  %v1141_v53 = vpop.f32.mrb[10].mxu0 }
 0x109   :  { %v1204_v54 = vadd.f32 %v1203_v52, %v1202_v49  ;;  %v1205_v55 = vpop.f32.mrb[10].mxu1  ;;  %v1142_v56 = vpop.f32.mrb[11].mxu0 }
 0x10a   :  { %v650_v57 = vadd.f32 %v1140_v51, %v1653_v17  ;;  %v1143_v58 = vadd.f32 %v1142_v56, %v1141_v53  ;;  %v1206_v59 = vpop.f32.mrb[11].mxu1 }
 0x10b   :  { %v1207_v60 = vadd.f32 %v1206_v59, %v1205_v55 }
 0x10c   :  { %v653_v61 = vadd.f32 %v1143_v58, %v1653_v17  ;;  %v1669_v62 = vadd.f32 %v1204_v54, %v650_v57 }
 0x10e   :  { %v1144_v63 = vpop.f32.mrb[12].mxu0  ;;  %v1671_v0 = vadd.f32 %v1207_v60, %v653_v61 }
 0x10f   :  { %v1208_v1 = vpop.f32.mrb[12].mxu1  ;;  %v1145_v2 = vpop.f32.mrb[13].mxu0 }
 0x110   :  { %v1146_v3 = vadd.f32 %v1145_v2, %v1144_v63  ;;  %v1209_v4 = vpop.f32.mrb[13].mxu1  ;;  %v1147_v5 = vpop.f32.mrb[14].mxu0 }
 0x111   :  { %v1210_v6 = vadd.f32 %v1209_v4, %v1208_v1  ;;  %v1211_v7 = vpop.f32.mrb[14].mxu1  ;;  %v1148_v8 = vpop.f32.mrb[15].mxu0 }
 0x112   :  { %v658_v9 = vadd.f32 %v1146_v3, %v1653_v17  ;;  %v1149_v10 = vadd.f32 %v1148_v8, %v1147_v5  ;;  %v1212_v11 = vpop.f32.mrb[15].mxu1 }
 0x113   :  { %v1213_v12 = vadd.f32 %v1212_v11, %v1211_v7 }
 0x114   :  { %v661_v13 = vadd.f32 %v1149_v10, %v1653_v17  ;;  %v1675_v14 = vadd.f32 %v1210_v6, %v658_v9 }
 0x116   :  { %v1150_v15 = vpop.f32.mrb[16].mxu0  ;;  %v1677_v16 = vadd.f32 %v1213_v12, %v661_v13 }
 0x117   :  { %v1214_v18 = vpop.f32.mrb[16].mxu1  ;;  %v1151_v19 = vpop.f32.mrb[17].mxu0 }
 0x118   :  { %v1152_v20 = vadd.f32 %v1151_v19, %v1150_v15  ;;  %v1215_v21 = vpop.f32.mrb[17].mxu1  ;;  %v1153_v22 = vpop.f32.mrb[18].mxu0 }
 0x119   :  { %v1216_v23 = vadd.f32 %v1215_v21, %v1214_v18  ;;  %v1217_v24 = vpop.f32.mrb[18].mxu1  ;;  %v1154_v25 = vpop.f32.mrb[19].mxu0 }
 0x11a   :  { %v666_v26 = vadd.f32 %v1152_v20, %v1653_v17  ;;  %v1155_v27 = vadd.f32 %v1154_v25, %v1153_v22  ;;  %v1218_v28 = vpop.f32.mrb[19].mxu1 }
 0x11b   :  { %v1219_v29 = vadd.f32 %v1218_v28, %v1217_v24 }
 0x11c   :  { %v669_v31 = vadd.f32 %v1155_v27, %v1653_v17  ;;  %v763_v33 = vadd.f32 %v1216_v23, %v666_v26 }
 0x11e   :  { %v1156_v34 = vpop.f32.mrb[20].mxu0  ;;  %v1681_v35 = vadd.f32 %v1219_v29, %v669_v31 }
 0x11f   :  { %v1220_v36 = vpop.f32.mrb[20].mxu1  ;;  %v1157_v37 = vpop.f32.mrb[21].mxu0 }
 0x120   :  { %v1158_v38 = vadd.f32 %v1157_v37, %v1156_v34  ;;  %v1221_v39 = vpop.f32.mrb[21].mxu1  ;;  %v1159_v40 = vpop.f32.mrb[22].mxu0 }
 0x121   :  { %v1222_v41 = vadd.f32 %v1221_v39, %v1220_v36  ;;  %v1223_v42 = vpop.f32.mrb[22].mxu1  ;;  %v1160_v43 = vpop.f32.mrb[23].mxu0 }
 0x122   :  { %v674_v44 = vadd.f32 %v1158_v38, %v1653_v17  ;;  %v1161_v45 = vadd.f32 %v1160_v43, %v1159_v40  ;;  %v1224_v47 = vpop.f32.mrb[23].mxu1 }
 0x123   :  { %v1225_v49 = vadd.f32 %v1224_v47, %v1223_v42 }
 0x124   :  { %v677_v50 = vadd.f32 %v1161_v45, %v1653_v17  ;;  %v771_v51 = vadd.f32 %v1222_v41, %v674_v44 }
 0x126   :  { %v1162_v52 = vpop.f32.mrb[24].mxu0  ;;  %v774_v53 = vadd.f32 %v1225_v49, %v677_v50 }
 0x127   :  { %v1226_v54 = vpop.f32.mrb[24].mxu1  ;;  %v1163_v55 = vpop.f32.mrb[25].mxu0 }
 0x128   :  { %v1164_v56 = vadd.f32 %v1163_v55, %v1162_v52  ;;  %v1227_v57 = vpop.f32.mrb[25].mxu1  ;;  %v1165_v58 = vpop.f32.mrb[26].mxu0 }
 0x129   :  { %v1228_v59 = vadd.f32 %v1227_v57, %v1226_v54  ;;  %v1229_v60 = vpop.f32.mrb[26].mxu1  ;;  %v1166_v61 = vpop.f32.mrb[27].mxu0 }
 0x12a   :  { %v682_v63 = vadd.f32 %v1164_v56, %v1653_v17  ;;  %v1167_v1 = vadd.f32 %v1166_v61, %v1165_v58  ;;  %v1230_v2 = vpop.f32.mrb[27].mxu1 }
 0x12b   :  { %v1231_v3 = vadd.f32 %v1230_v2, %v1229_v60 }
 0x12c   :  { %v685_v4 = vadd.f32 %v1167_v1, %v1653_v17  ;;  %v1687_v5 = vadd.f32 %v1228_v59, %v682_v63 }
 0x12e   :  { %v1168_v6 = vpop.f32.mrb[28].mxu0  ;;  %v1689_v7 = vadd.f32 %v1231_v3, %v685_v4 }
 0x12f   :  { %v1232_v8 = vpop.f32.mrb[28].mxu1  ;;  %v1169_v9 = vpop.f32.mrb[29].mxu0 }
 0x130   :  { %v1170_v10 = vadd.f32 %v1169_v9, %v1168_v6  ;;  %v1233_v11 = vpop.f32.mrb[29].mxu1  ;;  %v1171_v12 = vpop.f32.mrb[30].mxu0 }
 0x131   :  { %v1234_v13 = vadd.f32 %v1233_v11, %v1232_v8  ;;  %v1235_v15 = vpop.f32.mrb[30].mxu1  ;;  %v1172_v18 = vpop.f32.mrb[31].mxu0 }
 0x132   :  { %v690_v19 = vadd.f32 %v1170_v10, %v1653_v17  ;;  %v1173_v20 = vadd.f32 %v1172_v18, %v1171_v12  ;;  %v1236_v21 = vpop.f32.mrb[31].mxu1 }
 0x133   :  { %v1237_v22 = vadd.f32 %v1236_v21, %v1235_v15 }
 0x134   :  { %v693_v23 = vadd.f32 %v1173_v20, %v1653_v17  ;;  %v787_v24 = vadd.f32 %v1234_v13, %v690_v19 }
 0x136   :  { %v1266_v25 = vpop.f32.mrb[32].mxu0  ;;  %v790_v26 = vadd.f32 %v1237_v22, %v693_v23 }
 0x137   :  { %v836_v27 = vadd.f32 %v1266_v25, %v1663_v46  ;;  %v1274_v28 = vpop.f32.mrb[32].mxu1  ;;  %v827_v29 = vpop.f32.mrb[33].mxu0 }
 0x138   :  { %v868_v31 = vadd.f32 %v1274_v28, %v771_v51  ;;  %v828_v34 = vadd.f32 %v827_v29, %v1657_v30  ;;  %v859_v36 = vpop.f32.mrb[33].mxu1  ;;  %v1267_v37 = vpop.f32.mrb[34].mxu0 }
 0x139   :  { %v892_v38 = vmax.f32 %v836_v27, 0.0  ;;  %v860_v39 = vadd.f32 %v859_v36, %v763_v33  ;;  %v839_v40 = vadd.f32 %v1267_v37, %v1665_v48  ;;  %v1275_v41 = vpop.f32.mrb[34].mxu1  ;;  %v830_v42 = vpop.f32.mrb[35].mxu0 }
 0x13a   :  { %v900_v17 = vmax.f32 %v868_v31, 0.0  ;;  %v890_v43 = vmax.f32 %v828_v34, 0.0  ;;  %v871_v44 = vadd.f32 %v1275_v41, %v774_v53  ;;  %v831_v45 = vadd.f32 %v830_v42, %v1659_v32  ;;  %v862_v46 = vpop.f32.mrb[35].mxu1 }
 0x13b   :  { %v1096_v47 = vpack.c.bf16 %v892_v38, %v892_v38  ;;  %v898_v49 = vmax.f32 %v860_v39, 0.0  ;;  %v893_v50 = vmax.f32 %v839_v40, 0.0  ;;  %v863_v30 = vadd.f32 %v862_v46, %v1681_v35 }
 0x13c   :  { %v1104_v51 = vpack.c.bf16 %v900_v17, %v900_v17  ;;  %v1094_v52 = vpack.c.bf16 %v890_v43, %v890_v43  ;;  %v901_v54 = vmax.f32 %v871_v44, 0.0  ;;  %v891_v55 = vmax.f32 %v831_v45, 0.0 }
 0x13d   :  { %973 = vst.msk [vmem:[%s1771_s3 + $0x8] sm:$0xf] %vm970_vm2, %v1096_v47  ;;  %v1102_v48 = vpack.c.bf16 %v898_v49, %v898_v49  ;;  %v1097_v33 = vpack.c.bf16 %v893_v50, %v893_v50  ;;  %v899_v53 = vmax.f32 %v863_v30, 0.0 }
 0x13e   :  { %981 = vst.msk [vmem:[%s1771_s3 + $0x28] sm:$0xf] %vm970_vm2, %v1104_v51  ;;  %971 = vst.msk [vmem:[%s1771_s3] sm:$0xf] %vm970_vm2, %v1094_v52  ;;  %v1105_v32 = vpack.c.bf16 %v901_v54, %v901_v54  ;;  %v1095_v35 = vpack.c.bf16 %v891_v55, %v891_v55  ;;  %v1270_v56 = vpop.f32.mrb[36].mxu0 }
 0x13f   :  { %979 = vst.msk [vmem:[%s1771_s3 + $0x20] sm:$0xf] %vm970_vm2, %v1102_v48  ;;  %974 = vst.msk [vmem:[%s1771_s3 + $0xc] sm:$0xf] %vm970_vm2, %v1097_v33  ;;  %v1103_v57 = vpack.c.bf16 %v899_v53, %v899_v53  ;;  %v852_v58 = vadd.f32 %v1270_v56, %v1675_v14  ;;  %v1278_v59 = vpop.f32.mrb[36].mxu1  ;;  %v843_v60 = vpop.f32.mrb[37].mxu0 }
 0x140   :  { %982 = vst.msk [vmem:[%s1771_s3 + $0x2c] sm:$0xf] %vm970_vm2, %v1105_v32  ;;  %972 = vst.msk [vmem:[%s1771_s3 + $0x4] sm:$0xf] %vm970_vm2, %v1095_v35  ;;  %v884_v61 = vadd.f32 %v1278_v59, %v787_v24  ;;  %v844_v63 = vadd.f32 %v843_v60, %v1669_v62  ;;  %v875_v1 = vpop.f32.mrb[37].mxu1  ;;  %v1271_v2 = vpop.f32.mrb[38].mxu0 }
 0x141   :  { %980 = vst.msk [vmem:[%s1771_s3 + $0x24] sm:$0xf] %vm970_vm2, %v1103_v57  ;;  %v896_v14 = vmax.f32 %v852_v58, 0.0  ;;  %v876_v3 = vadd.f32 %v875_v1, %v1687_v5  ;;  %v855_v4 = vadd.f32 %v1271_v2, %v1677_v16  ;;  %v1279_v6 = vpop.f32.mrb[38].mxu1  ;;  %v846_v8 = vpop.f32.mrb[39].mxu0 }
 0x142   :  { %v904_v9 = vmax.f32 %v884_v61, 0.0  ;;  %v894_v10 = vmax.f32 %v844_v63, 0.0  ;;  %v887_v11 = vadd.f32 %v1279_v6, %v790_v26  ;;  %v847_v12 = vadd.f32 %v846_v8, %v1671_v0  ;;  %v878_v62 = vpop.f32.mrb[39].mxu1 }
 0x143   :  { %v1100_v13 = vpack.c.bf16 %v896_v14, %v896_v14  ;;  %v902_v15 = vmax.f32 %v876_v3, 0.0  ;;  %v897_v18 = vmax.f32 %v855_v4, 0.0  ;;  %v879_v19 = vadd.f32 %v878_v62, %v1689_v7 }
 0x144   :  { %v1108_v20 = vpack.c.bf16 %v904_v9, %v904_v9  ;;  %v1098_v21 = vpack.c.bf16 %v894_v10, %v894_v10  ;;  %v905_v22 = vmax.f32 %v887_v11, 0.0  ;;  %v895_v23 = vmax.f32 %v847_v12, 0.0 }
 0x145   :  { %977 = vst.msk [vmem:[%s1771_s3 + $0x18] sm:$0xf] %vm970_vm2, %v1100_v13  ;;  %v1106_v16 = vpack.c.bf16 %v902_v15, %v902_v15  ;;  %v1101_v5 = vpack.c.bf16 %v897_v18, %v897_v18  ;;  %v903_v24 = vmax.f32 %v879_v19, 0.0 }
 0x146   :  { %985 = vst.msk [vmem:[%s1771_s3 + $0x38] sm:$0xf] %vm970_vm2, %v1108_v20  ;;  %975 = vst.msk [vmem:[%s1771_s3 + $0x10] sm:$0xf] %vm970_vm2, %v1098_v21  ;;  %v1109_v0 = vpack.c.bf16 %v905_v22, %v905_v22  ;;  %v1099_v7 = vpack.c.bf16 %v895_v23, %v895_v23 }
 0x147   :  { %983 = vst.msk [vmem:[%s1771_s3 + $0x30] sm:$0xf] %vm970_vm2, %v1106_v16  ;;  %978 = vst.msk [vmem:[%s1771_s3 + $0x1c] sm:$0xf] %vm970_vm2, %v1101_v5  ;;  %v1107_v25 = vpack.c.bf16 %v903_v24, %v903_v24 }
 0x148   :  { %986 = vst.msk [vmem:[%s1771_s3 + $0x3c] sm:$0xf] %vm970_vm2, %v1109_v0  ;;  %976 = vst.msk [vmem:[%s1771_s3 + $0x14] sm:$0xf] %vm970_vm2, %v1099_v7 }
 0x149   :  { %984 = vst.msk [vmem:[%s1771_s3 + $0x34] sm:$0xf] %vm970_vm2, %v1107_v25 }

// kernel: attention_forward.7
= control target key start
LH: loop header
LB: loop body
LE: loop exit
PB: predicated region body
PF: predicated region fallthrough
CT: control target
= control target key end

     0   :  { %v229_v28 = vlaneseq  ;;  %v1665_v36 = vmov 1966171168   ;;  %s2055_s0 = inlined_call_operand.vmem [shape: bf16[2,1536], index: 0, kind: input, shape index: {}]   ;;  %s2056_s1 = inlined_call_operand.vmem [shape: bf16[1536,64], index: 1, kind: input, shape index: {}]   ;;  %s2057_s2 = inlined_call_operand.vmem [shape: f32[1,64], index: 2, kind: input, shape index: {}]   ;;  %s2058_s3 = inlined_call_operand.vmem [shape: f32[64,13], index: 3, kind: input, shape index: {}]   ;;  %s2059_s4 = inlined_call_operand.vmem [shape: f32[1,13], index: 4, kind: input, shape index: {}]   ;;  %s2060_s5 = inlined_call_operand.hbm [shape: f32[2,12], index: 5, kind: output, shape index: {}]  }
   0x1   :  { %v1536_v0 = vld [vmem:[%s2056_s1 + $0x40] sm:$0xff]   ;;  %v1540_v4 = vld [vmem:[%s2056_s1 + $0x48] sm:$0xff]   ;;  %v1544_v8 = vld [vmem:[%s2056_s1 + $0x50] sm:$0xff]   ;;  %v227_v37 = vunpack.c.l.s4 %v1665_v36 }
   0x2   :  { %v1537_v1 = vld [vmem:[%s2056_s1 + $0xc0] sm:$0xff]   ;;  %1356 = vmatprep.subr.bf16.mxu0 %v1536_v0  ;;  %v1541_v5 = vld [vmem:[%s2056_s1 + $0xc8] sm:$0xff]   ;;  %v1545_v9 = vld [vmem:[%s2056_s1 + $0xd0] sm:$0xff]   ;;  %v230_v33 = vshrl.u32 %v229_v28, 7 }
   0x3   :  { %v1538_v2 = vld [vmem:[%s2056_s1] sm:$0xff]   ;;  %1378 = vmatprep.subr.bf16.mxu1 %v1537_v1  ;;  %v1542_v6 = vld [vmem:[%s2056_s1 + $0x8] sm:$0xff]   ;;  %v1546_v10 = vld [vmem:[%s2056_s1 + $0x10] sm:$0xff]   ;;  %v228_v40 = vunpack.c.0.s8 %v227_v37 }
   0x4   :  { %v1539_v3 = vld [vmem:[%s2056_s1 + $0x80] sm:$0xff]   ;;  %1357 = vmatpush3.bf16.msra.mxu0 %v1538_v2  ;;  %v1543_v7 = vld [vmem:[%s2056_s1 + $0x88] sm:$0xff]   ;;  %v1547_v11 = vld [vmem:[%s2056_s1 + $0x90] sm:$0xff]  }
   0x5   :  { %1379 = vmatpush3.bf16.msra.mxu1 %v1539_v3  ;;  %1358 = vmatprep.subr.bf16.mxu0 %v1540_v4  ;;  %v1548_v12 = vld [vmem:[%s2056_s1 + $0x58] sm:$0xff]   ;;  %v1552_v16 = vld [vmem:[%s2056_s1 + $0x60] sm:$0xff]   ;;  %v1556_v20 = vld [vmem:[%s2056_s1 + $0x68] sm:$0xff]   ;;  %v1806_v41 = vsub.s32 %v228_v40, %v230_v33 }
   0x6   :  { %1380 = vmatprep.subr.bf16.mxu1 %v1541_v5  ;;  %v1549_v13 = vld [vmem:[%s2056_s1 + $0xd8] sm:$0xff]   ;;  %v1553_v17 = vld [vmem:[%s2056_s1 + $0xe0] sm:$0xff]   ;;  %v1557_v21 = vld [vmem:[%s2056_s1 + $0xe8] sm:$0xff]  }
   0x7   :  { %v1550_v14 = vld [vmem:[%s2056_s1 + $0x18] sm:$0xff]   ;;  %v1554_v18 = vld [vmem:[%s2056_s1 + $0x20] sm:$0xff]   ;;  %v1558_v22 = vld [vmem:[%s2056_s1 + $0x28] sm:$0xff]  }
   0x8   :  { %1359 = vmatpush3.bf16.msra.mxu0 %v1542_v6  ;;  %v1551_v15 = vld [vmem:[%s2056_s1 + $0x98] sm:$0xff]   ;;  %v1555_v19 = vld [vmem:[%s2056_s1 + $0xa0] sm:$0xff]   ;;  %v1559_v23 = vld [vmem:[%s2056_s1 + $0xa8] sm:$0xff]  }
   0x9   :  { %1381 = vmatpush3.bf16.msra.mxu1 %v1543_v7  ;;  %1360 = vmatprep.subr.bf16.mxu0 %v1544_v8  ;;  %v1560_v24 = vld [vmem:[%s2056_s1 + $0x70] sm:$0xff]   ;;  %v1564_v29 = vld [vmem:[%s2056_s1 + $0x78] sm:$0xff]   ;;  %v22_v34 = vld [vmem:[%s2055_s0] sm:$0xff] }
   0xa   :  { %1382 = vmatprep.subr.bf16.mxu1 %v1545_v9  ;;  %v1561_v25 = vld [vmem:[%s2056_s1 + $0xf0] sm:$0xff]   ;;  %v1565_v30 = vld [vmem:[%s2056_s1 + $0xf8] sm:$0xff]   ;;  %v1569_v35 = vld [vmem:[%s2056_s1 + $0x140] sm:$0xff]   ;;  %v225_v39 = vcombine.high %v22_v34, %v22_v34  ;;  %v232_v42 = vrot.slane %v22_v34, %v1806_v41 }
   0xb   :  { %v1562_v26 = vld [vmem:[%s2056_s1 + $0x30] sm:$0xff]   ;;  %v1566_v31 = vld [vmem:[%s2056_s1 + $0x38] sm:$0xff]   ;;  %v1570_v38 = vld [vmem:[%s2056_s1 + $0x1c0] sm:$0xff]  }
   0xc   :  { %1361 = vmatpush3.bf16.msra.mxu0 %v1546_v10  ;;  %v1563_v27 = vld [vmem:[%s2056_s1 + $0xb0] sm:$0xff]   ;;  %v1567_v32 = vld [vmem:[%s2056_s1 + $0xb8] sm:$0xff]   ;;  %v1810_v43 = vrot.slane %v225_v39, %v1806_v41  ;;  %v240_v44 = vcombine.high %v232_v42, %v232_v42  ;;  %v248_v45 = vrot.slane %v232_v42, %v1806_v41  ;;  %v1571_v48 = vld [vmem:[%s2056_s1 + $0x100] sm:$0xff]  }
   0xd   :  { %1383 = vmatpush3.bf16.msra.mxu1 %v1547_v11  ;;  %1362 = vmatprep.subr.bf16.mxu0 %v1548_v12  ;;  %v1573_v51 = vld [vmem:[%s2056_s1 + $0x148] sm:$0xff]   ;;  %v1572_v53 = vld [vmem:[%s2056_s1 + $0x180] sm:$0xff]   ;;  %v1577_v57 = vld [vmem:[%s2056_s1 + $0x150] sm:$0xff]  }
   0xe   :  { %1384 = vmatprep.subr.bf16.mxu1 %v1549_v13  ;;  %v241_v46 = vcombine.high %v1810_v43, %v1810_v43  ;;  %v262_v47 = vrot.slane %v240_v44, %v1806_v41  ;;  %v270_v50 = vcombine.high %v248_v45, %v248_v45  ;;  %v1574_v54 = vld [vmem:[%s2056_s1 + $0x1c8] sm:$0xff]   ;;  %v1578_v59 = vld [vmem:[%s2056_s1 + $0x1d0] sm:$0xff]   ;;  %v1581_v61 = vld [vmem:[%s2056_s1 + $0x158] sm:$0xff]  }
   0xf   :  { %v1575_v56 = vld [vmem:[%s2056_s1 + $0x108] sm:$0xff]   ;;  %v1579_v60 = vld [vmem:[%s2056_s1 + $0x110] sm:$0xff]   ;;  %v1582_v63 = vld [vmem:[%s2056_s1 + $0x1d8] sm:$0xff]  }
  0x10   :  { %1363 = vmatpush3.bf16.msra.mxu0 %v1550_v14  ;;  %v269_v49 = vrot.slane %v241_v46, %v1806_v41  ;;  %918 = vmatprep.mubr.bf16.mxu0 %v262_v47  ;;  %v272_v52 = vcombine.high %v262_v47, %v262_v47  ;;  %v1576_v58 = vld [vmem:[%s2056_s1 + $0x188] sm:$0xff]   ;;  %v1580_v62 = vld [vmem:[%s2056_s1 + $0x190] sm:$0xff]   ;;  %v1583_v0 = vld [vmem:[%s2056_s1 + $0x118] sm:$0xff]  }
  0x11   :  { %1385 = vmatpush3.bf16.msra.mxu1 %v1551_v15  ;;  %1364 = vmatprep.subr.bf16.mxu0 %v1552_v16  ;;  %v1585_v1 = vld [vmem:[%s2056_s1 + $0x160] sm:$0xff]   ;;  %v1584_v2 = vld [vmem:[%s2056_s1 + $0x198] sm:$0xff]   ;;  %v1589_v5 = vld [vmem:[%s2056_s1 + $0x168] sm:$0xff]  }
  0x12   :  { %1386 = vmatprep.subr.bf16.mxu1 %v1553_v17  ;;  %v273_v55 = vcombine.high %v269_v49, %v269_v49  ;;  %958 = vmatprep.mubr.bf16.mxu1 %v272_v52  ;;  %v1586_v3 = vld [vmem:[%s2056_s1 + $0x1e0] sm:$0xff]   ;;  %v1590_v7 = vld [vmem:[%s2056_s1 + $0x1e8] sm:$0xff]   ;;  %v1593_v9 = vld [vmem:[%s2056_s1 + $0x170] sm:$0xff]   ;;  %v255_v17 = vrot.slane %v1810_v43, %v1806_v41 }
  0x13   :  { %v1587_v4 = vld [vmem:[%s2056_s1 + $0x120] sm:$0xff]   ;;  %v1591_v8 = vld [vmem:[%s2056_s1 + $0x128] sm:$0xff]   ;;  %v1594_v11 = vld [vmem:[%s2056_s1 + $0x1f0] sm:$0xff]  }
  0x14   :  { %1365 = vmatpush3.bf16.msra.mxu0 %v1554_v18  ;;  %v1588_v6 = vld [vmem:[%s2056_s1 + $0x1a0] sm:$0xff]   ;;  %v1592_v10 = vld [vmem:[%s2056_s1 + $0x1a8] sm:$0xff]   ;;  %v1595_v12 = vld [vmem:[%s2056_s1 + $0x130] sm:$0xff]  }
  0x15   :  { %1387 = vmatpush3.bf16.msra.mxu1 %v1555_v19  ;;  %1366 = vmatprep.subr.bf16.mxu0 %v1556_v20  ;;  %v1597_v13 = vld [vmem:[%s2056_s1 + $0x178] sm:$0xff]   ;;  %v1596_v14 = vld [vmem:[%s2056_s1 + $0x1b0] sm:$0xff]   ;;  %v1601_v18 = vld [vmem:[%s2056_s1 + $0x240] sm:$0xff]  }
  0x16   :  { %1388 = vmatprep.subr.bf16.mxu1 %v1557_v21  ;;  %v1598_v15 = vld [vmem:[%s2056_s1 + $0x1f8] sm:$0xff]   ;;  %v1602_v20 = vld [vmem:[%s2056_s1 + $0x2c0] sm:$0xff]   ;;  %v1608_v28 = vld [vmem:[%s2056_s1 + $0x288] sm:$0xff]  }
  0x17   :  { %v1599_v16 = vld [vmem:[%s2056_s1 + $0x138] sm:$0xff]   ;;  %v1603_v21 = vld [vmem:[%s2056_s1 + $0x200] sm:$0xff]   ;;  %v1621_v39 = vld [vmem:[%s2056_s1 + $0x268] sm:$0xff]  }
  0x18   :  { %1367 = vmatpush3.bf16.msra.mxu0 %v1558_v22  ;;  %v1600_v19 = vld [vmem:[%s2056_s1 + $0x1b8] sm:$0xff]   ;;  %v271_v22 = vcombine.high %v255_v17, %v255_v17  ;;  %v1618_v37 = vld [vmem:[%s2056_s1 + $0x2e0] sm:$0xff]   ;;  %v1622_v42 = vld [vmem:[%s2056_s1 + $0x2e8] sm:$0xff]  }
  0x19   :  { %1389 = vmatpush3.bf16.msra.mxu1 %v1559_v23  ;;  %1368 = vmatprep.subr.bf16.mxu0 %v1560_v24  ;;  %v1605_v23 = vld [vmem:[%s2056_s1 + $0x248] sm:$0xff]   ;;  %v1604_v24 = vld [vmem:[%s2056_s1 + $0x280] sm:$0xff]   ;;  %v1614_v33 = vld [vmem:[%s2056_s1 + $0x2d8] sm:$0xff]  }
  0x1a   :  { %1390 = vmatprep.subr.bf16.mxu1 %v1561_v25  ;;  %v1606_v25 = vld [vmem:[%s2056_s1 + $0x2c8] sm:$0xff]   ;;  %v1615_v34 = vld [vmem:[%s2056_s1 + $0x218] sm:$0xff]   ;;  %v1620_v40 = vld [vmem:[%s2056_s1 + $0x2a0] sm:$0xff]  }
  0x1b   :  { %v1616_v36 = vld [vmem:[%s2056_s1 + $0x298] sm:$0xff]   ;;  %v1623_v43 = vld [vmem:[%s2056_s1 + $0x228] sm:$0xff]   ;;  %v1625_v44 = vld [vmem:[%s2056_s1 + $0x270] sm:$0xff]  }
  0x1c   :  { %1369 = vmatpush3.bf16.msra.mxu0 %v1562_v26  ;;  %v1607_v26 = vld [vmem:[%s2056_s1 + $0x208] sm:$0xff]  }
  0x1d   :  { %1391 = vmatpush3.bf16.msra.mxu1 %v1563_v27  ;;  %1370 = vmatprep.subr.bf16.mxu0 %v1564_v29  ;;  %v1609_v27 = vld [vmem:[%s2056_s1 + $0x250] sm:$0xff]   ;;  %v1624_v46 = vld [vmem:[%s2056_s1 + $0x2a8] sm:$0xff]  }
  0x1e   :  { %1392 = vmatprep.subr.bf16.mxu1 %v1565_v30  ;;  %v1610_v29 = vld [vmem:[%s2056_s1 + $0x2d0] sm:$0xff]  }
  0x1f   :  { %v1611_v30 = vld [vmem:[%s2056_s1 + $0x210] sm:$0xff]  }
  0x20   :  { %1371 = vmatpush3.bf16.msra.mxu0 %v1566_v31  ;;  %v1613_v31 = vld [vmem:[%s2056_s1 + $0x258] sm:$0xff]  }
  0x21   :  { %1393 = vmatpush3.bf16.msra.mxu1 %v1567_v32  ;;  %1400 = vmatprep.subr.bf16.mxu0 %v1569_v35  ;;  %v1612_v32 = vld [vmem:[%s2056_s1 + $0x290] sm:$0xff]   ;;  %v1617_v35 = vld [vmem:[%s2056_s1 + $0x260] sm:$0xff]  }
  0x22   :  { %1422 = vmatprep.subr.bf16.mxu1 %v1570_v38  ;;  %v1619_v38 = vld [vmem:[%s2056_s1 + $0x220] sm:$0xff]  }
  0x23   :  { %919 = vmatmul.mubr.bf16.vlgmr.msra.gmra.mrb[0].mxu0 %v248_v45  ;;  %v1256_v45 = vld.sshfl [vmem:[%s2055_s0 + $0x8] sm:$0x33 pattern:$0x75316420] }
  0x24   :  { %1401 = vmatpush3.bf16.msra.mxu0 %v1571_v48  ;;  %959 = vmatmul.mubr.bf16.vlgmr.msra.gmra.mrb[0].mxu1 %v270_v50  ;;  %v281_v47 = vcombine.high %v1256_v45, %v1256_v45 }
  0x25   :  { %1402 = vmatprep.subr.bf16.mxu0 %v1573_v51  ;;  %1423 = vmatpush3.bf16.msra.mxu1 %v1572_v53 }
  0x26   :  { %998 = vmatprep.mubr.bf16.mxu0 %v269_v49  ;;  %1424 = vmatprep.subr.bf16.mxu1 %v1574_v54 }
  0x27   :  { %1038 = vmatprep.mubr.bf16.mxu1 %v273_v55 }
  0x28   :  { %1403 = vmatpush3.bf16.msra.mxu0 %v1575_v56 }
  0x29   :  { %1404 = vmatprep.subr.bf16.mxu0 %v1577_v57  ;;  %1425 = vmatpush3.bf16.msra.mxu1 %v1576_v58 }
  0x2a   :  { %1426 = vmatprep.subr.bf16.mxu1 %v1578_v59 }
  0x2c   :  { %1405 = vmatpush3.bf16.msra.mxu0 %v1579_v60 }
  0x2d   :  { %1406 = vmatprep.subr.bf16.mxu0 %v1581_v61  ;;  %1427 = vmatpush3.bf16.msra.mxu1 %v1580_v62 }
  0x2e   :  { %1428 = vmatprep.subr.bf16.mxu1 %v1582_v63 }
  0x30   :  { %1407 = vmatpush3.bf16.msra.mxu0 %v1583_v0 }
  0x31   :  { %1408 = vmatprep.subr.bf16.mxu0 %v1585_v1  ;;  %1429 = vmatpush3.bf16.msra.mxu1 %v1584_v2 }
  0x32   :  { %1430 = vmatprep.subr.bf16.mxu1 %v1586_v3 }
  0x34   :  { %1409 = vmatpush3.bf16.msra.mxu0 %v1587_v4 }
  0x35   :  { %1410 = vmatprep.subr.bf16.mxu0 %v1589_v5  ;;  %1431 = vmatpush3.bf16.msra.mxu1 %v1588_v6 }
  0x36   :  { %1432 = vmatprep.subr.bf16.mxu1 %v1590_v7 }
  0x38   :  { %1411 = vmatpush3.bf16.msra.mxu0 %v1591_v8 }
  0x39   :  { %1412 = vmatprep.subr.bf16.mxu0 %v1593_v9  ;;  %1433 = vmatpush3.bf16.msra.mxu1 %v1592_v10 }
  0x3a   :  { %1434 = vmatprep.subr.bf16.mxu1 %v1594_v11 }
  0x3c   :  { %1413 = vmatpush3.bf16.msra.mxu0 %v1595_v12 }
  0x3d   :  { %1414 = vmatprep.subr.bf16.mxu0 %v1597_v13  ;;  %1435 = vmatpush3.bf16.msra.mxu1 %v1596_v14 }
  0x3e   :  { %1436 = vmatprep.subr.bf16.mxu1 %v1598_v15 }
  0x40   :  { %1415 = vmatpush3.bf16.msra.mxu0 %v1599_v16 }
  0x41   :  { %1444 = vmatprep.subr.bf16.mxu0 %v1601_v18  ;;  %1437 = vmatpush3.bf16.msra.mxu1 %v1600_v19 }
  0x42   :  { %1466 = vmatprep.subr.bf16.mxu1 %v1602_v20 }
  0x43   :  { %999 = vmatmul.mubr.bf16.vlgmr.msra.gmra.mrb[4].mxu0 %v255_v17 }
  0x44   :  { %1445 = vmatpush3.bf16.msra.mxu0 %v1603_v21  ;;  %1039 = vmatmul.mubr.bf16.vlgmr.msra.gmra.mrb[4].mxu1 %v271_v22 }
  0x45   :  { %1446 = vmatprep.subr.bf16.mxu0 %v1605_v23  ;;  %1467 = vmatpush3.bf16.msra.mxu1 %v1604_v24 }
  0x46   :  { %1468 = vmatprep.subr.bf16.mxu1 %v1606_v25 }
  0x48   :  { %1447 = vmatpush3.bf16.msra.mxu0 %v1607_v26 }
  0x49   :  { %1448 = vmatprep.subr.bf16.mxu0 %v1609_v27  ;;  %1469 = vmatpush3.bf16.msra.mxu1 %v1608_v28 }
  0x4a   :  { %1470 = vmatprep.subr.bf16.mxu1 %v1610_v29 }
  0x4c   :  { %1449 = vmatpush3.bf16.msra.mxu0 %v1611_v30 }
  0x4d   :  { %1450 = vmatprep.subr.bf16.mxu0 %v1613_v31  ;;  %1471 = vmatpush3.bf16.msra.mxu1 %v1612_v32 }
  0x4e   :  { %1472 = vmatprep.subr.bf16.mxu1 %v1614_v33 }
  0x50   :  { %1451 = vmatpush3.bf16.msra.mxu0 %v1615_v34 }
  0x51   :  { %1452 = vmatprep.subr.bf16.mxu0 %v1617_v35  ;;  %1473 = vmatpush3.bf16.msra.mxu1 %v1616_v36 }
  0x52   :  { %1474 = vmatprep.subr.bf16.mxu1 %v1618_v37 }
  0x54   :  { %1453 = vmatpush3.bf16.msra.mxu0 %v1619_v38 }
  0x55   :  { %1454 = vmatprep.subr.bf16.mxu0 %v1621_v39  ;;  %1475 = vmatpush3.bf16.msra.mxu1 %v1620_v40 }
  0x56   :  { %10 = vsyncpa [#allocation3], 0  ;;  %1476 = vmatprep.subr.bf16.mxu1 %v1622_v42  ;;  %v1626_v48 = vld [vmem:[%s2056_s1 + $0x2f0] sm:$0xff]   ;;  %v295_v50 = vrot.slane %v281_v47, %v1806_v41  ;;  %v1629_v51 = vld [vmem:[%s2056_s1 + $0x278] sm:$0xff]   ;;  %v288_v56 = vrot.slane %v1256_v45, %v1806_v41  ;;  %v1666_v61 = vmov 0.0|0.0   ;;  %vm1667_vm0 = vmmov 0  }
  0x57   :  { %v1627_v49 = vld [vmem:[%s2056_s1 + $0x230] sm:$0xff]   ;;  %v1630_v54 = vld [vmem:[%s2056_s1 + $0x2f8] sm:$0xff]   ;;  %v1126_v59 = vld [vmem:[%s2058_s3] sm:$0xff]  ;;  %v1668_v7 = vmov 0.0   ;;  %vm1141_vm1 = vcmask 523264   ;;  %vm1215_vm2 = vcmask 91136  }
  0x58   :  { %1455 = vmatpush3.bf16.msra.mxu0 %v1623_v43  ;;  %v1628_v52 = vld [vmem:[%s2056_s1 + $0x2b0] sm:$0xff]   ;;  %1078 = vmatprep.mubr.bf16.mxu0 %v295_v50  ;;  %v297_v53 = vcombine.high %v295_v50, %v295_v50  ;;  %v1631_v55 = vld [vmem:[%s2056_s1 + $0x238] sm:$0xff]   ;;  %v296_v58 = vcombine.high %v288_v56, %v288_v56  ;;  %v1127_v60 = vld [vmem:[%s2058_s3 + $0x8] sm:$0xff] }
  0x59   :  { %1456 = vmatprep.subr.bf16.mxu0 %v1625_v44  ;;  %1477 = vmatpush3.bf16.msra.mxu1 %v1624_v46  ;;  %v1632_v57 = vld [vmem:[%s2056_s1 + $0x2b8] sm:$0xff]   ;;  %v1128_v41 = vld [vmem:[%s2058_s3 + $0x10] sm:$0xff]  ;;  %v1517_v62 = vpack.c.bf16 %v1127_v60, %v1126_v59  ;;  %v1130_v1 = vld [vmem:[%s2058_s3 + $0x20] sm:$0xff]  ;;  %v1669_v46 = vmov 12  }
  0x5a   :  { %1478 = vmatprep.subr.bf16.mxu1 %v1626_v48  ;;  %1118 = vmatprep.mubr.bf16.mxu1 %v297_v53  ;;  %v1129_v63 = vld [vmem:[%s2058_s3 + $0x18] sm:$0xff]  ;;  %v1131_v2 = vld [vmem:[%s2058_s3 + $0x28] sm:$0xff]  ;;  %v1132_v4 = vld [vmem:[%s2058_s3 + $0x30] sm:$0xff] }
  0x5b   :  { %v1520_v0 = vpack.c.bf16 %v1129_v63, %v1128_v41  ;;  %v1523_v3 = vpack.c.bf16 %v1131_v2, %v1130_v1  ;;  %v1133_v5 = vld [vmem:[%s2058_s3 + $0x38] sm:$0xff]  ;;  %v1255_v9 = vld [vmem:[%s2057_s2] ss:$0 sm:$0xff]  ;;  %1534 = vset.pattern.permute.xlu1 %v1669_v46  ;;  %1535 = vset.pattern.permute.xlu0 %v1669_v46 }
  0x5c   :  { %1457 = vmatpush3.bf16.msra.mxu0 %v1627_v49  ;;  %v1526_v6 = vpack.c.bf16 %v1133_v5, %v1132_v4  ;;  %v1353_v47 = vld [vmem:[%s2059_s4] ss:$0 sm:$0xff]  ;;  %s1670_s4 = smov [#allocation2]  }
  0x5d   :  { %1458 = vmatprep.subr.bf16.mxu0 %v1629_v51  ;;  %1479 = vmatpush3.bf16.msra.mxu1 %v1628_v52  ;;  %s1247_s29 = sshll.u32 %s1670_s4, 4  ;;  %s1248_s29 = int_to_ptr.vmem [resolvable:$true] %s1247_s29 }
  0x5e   :  { %1480 = vmatprep.subr.bf16.mxu1 %v1630_v54  ;;  %s1641_s30 = scalar_lea.vmem %s1248_s29, 32  ;;  %p1646_p1 = scmp.lt.s32.totalorder %s1248_s29, %s1248_s29 }
  0x5f   :  { %p1642_p0 = scmp.ne.s32.totalorder %s1248_s29, %s1641_s30  ;;  %p1647_p2 = scmp.lt.s32.totalorder %s1641_s30, %s1641_s30 }
  0x60   :  { %1459 = vmatpush3.bf16.msra.mxu0 %v1631_v55 }
  0x61   :  { %1481 = vmatpush3.bf16.msra.mxu1 %v1632_v57  ;;  %1516 = vmatprep.subr.bf16.mxu0 %v1666_v61  ;;  %p1648_p3 = por %p1647_p2, %p1646_p1 }
  0x63   :  { %1079 = vmatmul.mubr.bf16.vlgmr.msra.gmra.mrb[8].mxu0 %v288_v56  ;;  %p1649_p4 = pnand %p1648_p3, %p1642_p0 }
  0x64   :  { %1119 = vmatmul.mubr.bf16.vlgmr.msra.gmra.mrb[8].mxu1 %v296_v58  ;;  %1518 = vmatpush3.bf16.msra.mxu0 %v1517_v62 }
  0x65   :  { %1519 = vmatprep.subr.bf16.mxu0 %v1666_v61  ;;  %1513 = vmatprep.mubr.msk.f32.mxu0 %vm1667_vm0, %v1668_v7 }
  0x68   :  { %1521 = vmatpush3.bf16.msra.mxu0 %v1520_v0 }
  0x69   :  { %1522 = vmatprep.subr.bf16.mxu0 %v1666_v61 }
  0x6c   :  { %1524 = vmatpush3.bf16.msra.mxu0 %v1523_v3 }
  0x6d   :  { %1525 = vmatprep.subr.bf16.mxu0 %v1666_v61 }
  0x70   :  { %1527 = vmatpush3.bf16.msra.mxu0 %v1526_v6 }
  0xf6   :  { %v1372_v8 = vpop.f32.mrb[0].mxu0 }
  0xf7   :  { %v1373_v10 = vpop.f32.mrb[1].mxu0  ;;  %v1394_v11 = vpop.f32.mrb[0].mxu1 }
  0xf8   :  { %v1374_v12 = vadd.f32 %v1373_v10, %v1372_v8  ;;  %v1375_v13 = vpop.f32.mrb[2].mxu0  ;;  %v1395_v14 = vpop.f32.mrb[1].mxu1 }
  0xf9   :  { %v1376_v15 = vpop.f32.mrb[3].mxu0  ;;  %v1396_v17 = vadd.f32 %v1395_v14, %v1394_v11  ;;  %v1397_v18 = vpop.f32.mrb[2].mxu1 }
  0xfa   :  { %v921_v16 = vadd.f32 %v1374_v12, %v1255_v9  ;;  %v1398_v19 = vpop.f32.mrb[3].mxu1 }
  0xfc   :  { %v961_v20 = vadd.f32 %v1396_v17, %v921_v16 }
 0x116   :  { %v1416_v21 = vpop.f32.mrb[4].mxu0 }
 0x117   :  { %v1417_v22 = vpop.f32.mrb[5].mxu0  ;;  %v1438_v23 = vpop.f32.mrb[4].mxu1 }
 0x118   :  { %v1418_v24 = vadd.f32 %v1417_v22, %v1416_v21  ;;  %v1419_v25 = vpop.f32.mrb[6].mxu0  ;;  %v1439_v26 = vpop.f32.mrb[5].mxu1 }
 0x119   :  { %v1420_v27 = vpop.f32.mrb[7].mxu0  ;;  %v1440_v29 = vadd.f32 %v1439_v26, %v1438_v23  ;;  %v1441_v30 = vpop.f32.mrb[6].mxu1 }
 0x11a   :  { %v1001_v28 = vadd.f32 %v1418_v24, %v961_v20  ;;  %v1442_v31 = vpop.f32.mrb[7].mxu1 }
 0x11c   :  { %v1041_v32 = vadd.f32 %v1440_v29, %v1001_v28 }
 0x136   :  { %v1460_v33 = vpop.f32.mrb[8].mxu0 }
 0x137   :  { %v1461_v34 = vpop.f32.mrb[9].mxu0  ;;  %v1482_v35 = vpop.f32.mrb[8].mxu1 }
 0x138   :  { %v1462_v36 = vadd.f32 %v1461_v34, %v1460_v33  ;;  %v1463_v37 = vpop.f32.mrb[10].mxu0  ;;  %v1483_v38 = vpop.f32.mrb[9].mxu1 }
 0x139   :  { %v1464_v39 = vpop.f32.mrb[11].mxu0  ;;  %v1484_v42 = vadd.f32 %v1483_v38, %v1482_v35  ;;  %v1485_v43 = vpop.f32.mrb[10].mxu1 }
 0x13a   :  { %v1081_v40 = vadd.f32 %v1462_v36, %v1041_v32  ;;  %v1486_v44 = vpop.f32.mrb[11].mxu1 }
 0x13c   :  { %v1121_v45 = vadd.f32 %v1484_v42, %v1081_v40 }
 0x13e   :  { %1514 = vmatmul.mubr.msk.f32.vlgmr.msra.gmra.mrb[12].mxu0 %vm1141_vm1, %v1121_v45 }
 0x211   :  { %v1211_v48 = vpop.f32.mrb[12].mxu0 }
 0x212   :  { %v1212_v49 = vadd.f32 %v1353_v47, %v1211_v48  ;;  %v1515_v50 = vpop.f32.mrb[13].mxu0 }
 0x214   :  { %v1355_v51 = vmul.f32 -1.442695, %v1212_v49  ;;  %v1216_v52 = vsel %vm1215_vm2, %v1212_v49, -inf }
 0x215   :  { %1217 = vmax.xlane.f32.xlu0 %v1216_v52 }
 0x216   :  { %1633 = vpow2.f32 %v1355_v51 }
 0x220   :  { %v1634_v53 = vpop.eup %1633 }
 0x221   :  { %v1230_v54 = vadd.f32 1.0, %v1634_v53 }
 0x223   :  { %1635 = vrcp.f32 %v1230_v54 }
 0x22d   :  { %v1636_v55 = vpop.eup %1635 }
 0x22e   :  { %v1233_v56 = vmul.f32 2.0, %v1636_v55 }
 0x230   :  { %1236 = vperm.xlu1 %1534, %v1233_v56  }
 0x2a2   :  { %v1218_v57 = vpop.xlane.xlu0 %1217 }
 0x2a3   :  { %v1219_v58 = vsub.f32 %v1212_v49, %v1218_v57 }
 0x2a5   :  { %v1220_v59 = vmul.f32 1.442695, %v1219_v58 }
 0x2a7   :  { %1637 = vpow2.f32 %v1220_v59 }
 0x2af   :  { %v1237_v0 = vpop.permute.xlu1 %1236 }
 0x2b1   :  { %v1638_v60 = vpop.eup %1637 }
 0x2b2   :  { %v1222_v41 = vsel %vm1215_vm2, %v1638_v60, 0.0 }
 0x2b3   :  { %1223 = vadd.xlane.f32.xlu0 %v1222_v41 }
 0x340   :  { %v1224_v61 = vpop.xlane.xlu0 %1223 }
 0x341   :  { %1639 = vrcp.f32 %v1224_v61 }
 0x34b   :  { %v1640_v62 = vpop.eup %1639 }
 0x34c   :  { %v1226_v63 = vmul.f32 %v1640_v62, %v1638_v60 }
 0x34e   :  { %v1239_v1 = vmul.f32 %v1237_v0, %v1226_v63 }
 0x350   :  { %1240 = vst.msk [vmem:[#allocation2] sm:$0x3] %vm1215_vm2, %v1239_v1 }
 0x351   :  { %1652 = shalt.err (!%p1649_p4)
}
 0x352   :  { %s1653_s8 = scalar_lea.hbm %s2060_s5, 32 }
 0x353   :  { %p1654_p5 = scmp.ne.s32.totalorder %s2060_s5, %s1653_s8  ;;  %p1657_p6 = scmp.lt.u32.totalorder %s1653_s8, %s2060_s5 }
 0x355   :  { %p1659_p7 = pnand %p1657_p6, %p1654_p5 }
 0x357   :  { %1662 = shalt.err (!%p1659_p7)
}
 0x358   :  { %1250 = dma.vmem_to_hbm [thread:$0]  %s1248_s29, 32, %s2060_s5, [#allocation3]  }
 0x359   :  { %1663 = dma.done.wait [#allocation3], 32  }
 0x35a   :  { %1664 = vsyncadd [#allocation3], 4294967264 }
 0x35b   :  { %1254 = vsyncpa [#allocation3], 1 }

</bundles_post_ra>
